<compile_context>
chip_gen: v6e
topology: v6e:2x2x1
jax: 0.10.0
libtpu: 0.0.40
codegen_flags: <defaults>
</compile_context>

<pallas_src>
import math

import jax
import jax.numpy as jnp
from jax.experimental import pallas as pl
from jax.experimental.pallas import tpu as pltpu

_HIGHEST = jax.lax.Precision.HIGHEST


# -----------------------------------------------------------------------------
# Exact GELU: erf via Abramowitz & Stegun 7.1.26 (|abs err| < 1.5e-7); the
# exp() lands on the EUP, the divide is kept exact for parity with F.gelu.
# -----------------------------------------------------------------------------
def _gelu_exact(x):
    a1, a2, a3, a4, a5 = (0.254829592, -0.284496736, 1.421413741,
                          -1.453152027, 1.061405429)
    p = 0.3275911
    z = x * 0.7071067811865476
    za = jnp.abs(z)
    t = 1.0 / (1.0 + p * za)
    poly = ((((a5 * t + a4) * t + a3) * t + a2) * t + a1) * t
    erf_abs = 1.0 - poly * jnp.exp(-za * za)
    erf = jnp.where(z < 0.0, -erf_abs, erf_abs)
    return 0.5 * x * (1.0 + erf)


# -----------------------------------------------------------------------------
# Fused kernel.  One grid step = one image.  Layout: (F, T*C), lane = t*C + c.
#   y1  = conv1(gelu(LN1(x)))  + b1
#   out = conv2(gelu(LN2(y1))) + b2 + x
# -----------------------------------------------------------------------------
def _make_kernel(F, T, C, K, eps):
    TC = T * C
    pad = K // 2

    def kernel(x_ref, g1_ref, b1_ref, g2_ref, b2_ref, w1_ref, w2_ref,
               cb1_ref, cb2_ref, o_ref):
        x = x_ref[0]                                          # (F, TC)

        # 0/1 feature-shift matrices: (S_d @ a)[f] = a[f + d], zero out of
        # range == Conv2d's zero padding along the feature axis.
        row = jax.lax.broadcasted_iota(jnp.int32, (F, F), 0)
        col = jax.lax.broadcasted_iota(jnp.int32, (F, F), 1)
        shift = {d: (col == row + d).astype(jnp.float32)
                 for d in range(-pad, pad + 1) if d != 0}

        def layer_norm(v, g, b):                              # over feature axis
            mean = jnp.mean(v, axis=0, keepdims=True)         # (1, TC)
            d = v - mean
            var = jnp.mean(d * d, axis=0, keepdims=True)
            return d * jax.lax.rsqrt(var + eps) * g + b

        def taps(a):                                          # (F, K*TC)
            slabs = []
            for kh in range(K):
                d = kh - pad
                if d == 0:
                    slabs.append(a)
                else:
                    slabs.append(jnp.dot(shift[d], a, precision=_HIGHEST,
                                         preferred_element_type=jnp.float32))
            return jnp.concatenate(slabs, axis=1)

        def block(v, g, b, w, cb):                            # LN+GELU+conv+bias
            act = _gelu_exact(layer_norm(v, g, b))
            return jnp.dot(taps(act), w, precision=_HIGHEST,
                           preferred_element_type=jnp.float32) + cb

        y1 = block(x, g1_ref[...], b1_ref[...], w1_ref[...], cb1_ref[...])
        o_ref[0] = block(y1, g2_ref[...], b2_ref[...], w2_ref[...],
                         cb2_ref[...]) + x

    return kernel


# -----------------------------------------------------------------------------
# XLA-side weight packing (tiny, one-off): (Cout, Cin, K, K) -> block-Toeplitz
# (K*T*Cin, T*Cout) so that the conv over time + cin->cout mixing is a single
# MXU matmul against the (F, K*T*Cin) feature-tap operand built in-kernel.
# -----------------------------------------------------------------------------
def _pack_weight_toeplitz(w_oihw, T):
    Cout, Cin, K, _ = w_oihw.shape
    pad = K // 2
    w = jnp.transpose(w_oihw.astype(jnp.float32), (2, 3, 1, 0))   # (kh,kw,ci,co)
    t_in = jnp.arange(T)[:, None]
    t_out = jnp.arange(T)[None, :]
    kw_idx = t_in - t_out + pad                                   # (T_in, T_out)
    valid = ((kw_idx >= 0) & (kw_idx < K)).astype(jnp.float32)
    wt = w[:, jnp.clip(kw_idx, 0, K - 1), :, :]       # (kh, T_in, T_out, ci, co)
    wt = wt * valid[None, :, :, None, None]
    wt = jnp.transpose(wt, (0, 1, 3, 2, 4))           # (kh, T_in, ci, T_out, co)
    return wt.reshape(K * T * Cin, T * Cout)


# -----------------------------------------------------------------------------
# ResidualCNN forward (stride=1, in_channels == out_channels as required by the
# residual add in the PyTorch module).  Input/output layout: NCHW (B, C, F, T).
# -----------------------------------------------------------------------------
def residual_cnn_forward(x, params, *, eps=1e-5):
    B, C, F, T = x.shape
    K = params["w1_oihw"].shape[2]
    assert params["w1_oihw"].shape[0] == C, "residual add needs in == out chans"
    assert K % 2 == 1, "odd kernel (padding = K // 2) assumed"
    TC = T * C

    # Layout glue (a few tiny XLA ops): NCHW -> (B, F, T*C), lane = t*C + c.
    x_ftc = jnp.transpose(x, (0, 2, 3, 1)).reshape(B, F, TC).astype(jnp.float32)

    g1 = params["ln1_g"].astype(jnp.float32).reshape(F, 1)
    b1 = params["ln1_b"].astype(jnp.float32).reshape(F, 1)
    g2 = params["ln2_g"].astype(jnp.float32).reshape(F, 1)
    b2 = params["ln2_b"].astype(jnp.float32).reshape(F, 1)
    w1 = _pack_weight_toeplitz(params["w1_oihw"], T)              # (K*T*C, T*C)
    w2 = _pack_weight_toeplitz(params["w2_oihw"], T)
    cb1 = jnp.tile(params["b1"].astype(jnp.float32), T).reshape(1, TC)
    cb2 = jnp.tile(params["b2"].astype(jnp.float32), T).reshape(1, TC)

    out = pl.pallas_call(
        _make_kernel(F, T, C, K, eps),
        out_shape=jax.ShapeDtypeStruct((B, F, TC), jnp.float32),
        grid=(B,),
        in_specs=[
            pl.BlockSpec((1, F, TC), lambda b: (b, 0, 0)),        # x
            pl.BlockSpec((F, 1), lambda b: (0, 0)),               # ln1 gamma
            pl.BlockSpec((F, 1), lambda b: (0, 0)),               # ln1 beta
            pl.BlockSpec((F, 1), lambda b: (0, 0)),               # ln2 gamma
            pl.BlockSpec((F, 1), lambda b: (0, 0)),               # ln2 beta
            pl.BlockSpec((K * TC, TC), lambda b: (0, 0)),         # w1 Toeplitz
            pl.BlockSpec((K * TC, TC), lambda b: (0, 0)),         # w2 Toeplitz
            pl.BlockSpec((1, TC), lambda b: (0, 0)),              # conv bias 1
            pl.BlockSpec((1, TC), lambda b: (0, 0)),              # conv bias 2
        ],
        out_specs=pl.BlockSpec((1, F, TC), lambda b: (b, 0, 0)),
        compiler_params=pltpu.CompilerParams(
            dimension_semantics=("parallel",)),
    )(x_ftc, g1, b1, g2, b2, w1, w2, cb1, cb2)

    return jnp.transpose(out.reshape(B, F, T, C), (0, 3, 1, 2))


# -----------------------------------------------------------------------------
# Pure-JAX reference (same math, no Pallas) for the correctness check.
# -----------------------------------------------------------------------------
def reference_forward(x, params):
    eps = 1e-5

    def cnn_layer_norm(v, g, b):
        vt = jnp.transpose(v, (0, 1, 3, 2))                    # (B, C, T, F)
        m = jnp.mean(vt, axis=-1, keepdims=True)
        var = jnp.mean((vt - m) ** 2, axis=-1, keepdims=True)
        vn = (vt - m) / jnp.sqrt(var + eps) * g + b
        return jnp.transpose(vn, (0, 1, 3, 2))

    def conv(v, w_oihw, bias):
        y = jax.lax.conv_general_dilated(
            v, w_oihw, window_strides=(1, 1), padding="SAME",
            dimension_numbers=("NCHW", "OIHW", "NCHW"),
            precision=jax.lax.Precision.HIGHEST)
        return y + bias[None, :, None, None]

    h = cnn_layer_norm(x, params["ln1_g"], params["ln1_b"])
    h = jax.nn.gelu(h, approximate=False)
    h = conv(h, params["w1_oihw"], params["b1"])
    h = cnn_layer_norm(h, params["ln2_g"], params["ln2_b"])
    h = jax.nn.gelu(h, approximate=False)
    h = conv(h, params["w2_oihw"], params["b2"])
    return h + x


# -----------------------------------------------------------------------------
def init_params(key, in_channels, out_channels, kernel, n_feats):
    ks = jax.random.split(key, 8)
    b1lim = 1.0 / math.sqrt(in_channels * kernel * kernel)
    b2lim = 1.0 / math.sqrt(out_channels * kernel * kernel)
    w1 = jax.random.uniform(ks[0], (out_channels, in_channels, kernel, kernel),
                            jnp.float32, -b1lim, b1lim)
    b1 = jax.random.uniform(ks[1], (out_channels,), jnp.float32, -b1lim, b1lim)
    w2 = jax.random.uniform(ks[2], (out_channels, out_channels, kernel, kernel),
                            jnp.float32, -b2lim, b2lim)
    b2 = jax.random.uniform(ks[3], (out_channels,), jnp.float32, -b2lim, b2lim)
    ln1_g = 1.0 + 0.1 * jax.random.normal(ks[4], (n_feats,), jnp.float32)
    ln1_b = 0.1 * jax.random.normal(ks[5], (n_feats,), jnp.float32)
    ln2_g = 1.0 + 0.1 * jax.random.normal(ks[6], (n_feats,), jnp.float32)
    ln2_b = 0.1 * jax.random.normal(ks[7], (n_feats,), jnp.float32)
    return {"w1_oihw": w1, "b1": b1, "w2_oihw": w2, "b2": b2,
            "ln1_g": ln1_g, "ln1_b": ln1_b, "ln2_g": ln2_g, "ln2_b": ln2_b}


if __name__ == "__main__":
    # ResidualCNN(in_channels=8, out_channels=8, kernel=3, stride=1,
    #             dropout=0.1, n_feats=16); input (batch, channel, feature, time)
    B, C, F, T = 2, 8, 16, 16
    K = 3

    root = jax.random.PRNGKey(0)
    kx, kp = jax.random.split(root)
    x = jax.random.normal(kx, (B, C, F, T), jnp.float32)
    params = init_params(kp, C, C, K, F)

    fwd = jax.jit(residual_cnn_forward)
    out = jax.block_until_ready(fwd(x, params))
    assert out.shape == (B, C, F, T), out.shape

    ref = jax.block_until_ready(jax.jit(reference_forward)(x, params))
    max_err = float(jnp.max(jnp.abs(out - ref)))
    # Expected error ~1e-5 (exact erf divide, HIGHEST-precision matmuls); the
    # tolerance leaves headroom for MXU f32 pass-decomposition differences
    # between the Mosaic matmul and XLA's conv.
    if not jnp.allclose(out, ref, atol=5e-3, rtol=5e-3):
        raise AssertionError(
            f"Pallas kernel mismatch vs reference, max abs err {max_err}")

    print("KERNEL_OK")
</pallas_src>

<mosaic_0001>
module attributes {stable_mosaic.version = 11 : i64} {
  func.func @kernel(%arg0: i32, %arg1: memref<1x16x128xf32, #tpu.memory_space<vmem>>, %arg2: memref<16x1xf32, #tpu.memory_space<vmem>>, %arg3: memref<16x1xf32, #tpu.memory_space<vmem>>, %arg4: memref<16x1xf32, #tpu.memory_space<vmem>>, %arg5: memref<16x1xf32, #tpu.memory_space<vmem>>, %arg6: memref<384x128xf32, #tpu.memory_space<vmem>>, %arg7: memref<384x128xf32, #tpu.memory_space<vmem>>, %arg8: memref<1x128xf32, #tpu.memory_space<vmem>>, %arg9: memref<1x128xf32, #tpu.memory_space<vmem>>, %arg10: memref<1x16x128xf32, #tpu.memory_space<vmem>>) attributes {dimension_semantics = [#tpu.dimension_semantics<parallel>], iteration_bounds = array<i64: 2>, scalar_prefetch = 0 : i64, scratch_operands = 0 : i64, tpu.core_type = #tpu.core_type<tc>, window_params = [{transform_indices = @transform_0, window_bounds = array<i64: 1, 16, 128>}, {pipeline_mode = #tpu.pipeline_mode<synchronous>, transform_indices = @transform_1, window_bounds = array<i64: 16, 1>}, {pipeline_mode = #tpu.pipeline_mode<synchronous>, transform_indices = @transform_2, window_bounds = array<i64: 16, 1>}, {pipeline_mode = #tpu.pipeline_mode<synchronous>, transform_indices = @transform_3, window_bounds = array<i64: 16, 1>}, {pipeline_mode = #tpu.pipeline_mode<synchronous>, transform_indices = @transform_4, window_bounds = array<i64: 16, 1>}, {pipeline_mode = #tpu.pipeline_mode<synchronous>, transform_indices = @transform_5, window_bounds = array<i64: 384, 128>}, {pipeline_mode = #tpu.pipeline_mode<synchronous>, transform_indices = @transform_6, window_bounds = array<i64: 384, 128>}, {pipeline_mode = #tpu.pipeline_mode<synchronous>, transform_indices = @transform_7, window_bounds = array<i64: 1, 128>}, {pipeline_mode = #tpu.pipeline_mode<synchronous>, transform_indices = @transform_8, window_bounds = array<i64: 1, 128>}, {transform_indices = @transform_9, window_bounds = array<i64: 1, 16, 128>}]} {
    %c0 = arith.constant 0 : index
    %c0_0 = arith.constant 0 : index
    %c0_1 = arith.constant 0 : index
    %0 = vector.load %arg1[%c0, %c0_0, %c0_1] : memref<1x16x128xf32, #tpu.memory_space<vmem>>, vector<1x16x128xf32>
    %1 = vector.shape_cast %0 : vector<1x16x128xf32> to vector<16x128xf32>
    %2 = tpu.iota {dimensions = array<i32: 0>} : vector<16x16xi32>
    %3 = tpu.iota {dimensions = array<i32: 1>} : vector<16x16xi32>
    %c-1_i32 = arith.constant -1 : i32
    %4 = vector.broadcast %c-1_i32 : i32 to vector<16x16xi32>
    %5 = arith.addi %2, %4 : vector<16x16xi32>
    %6 = arith.cmpi eq, %3, %5 : vector<16x16xi32>
    %7 = arith.extui %6 : vector<16x16xi1> to vector<16x16xi32>
    %8 = arith.sitofp %7 : vector<16x16xi32> to vector<16x16xf32>
    %c1_i32 = arith.constant 1 : i32
    %9 = vector.broadcast %c1_i32 : i32 to vector<16x16xi32>
    %10 = arith.addi %2, %9 : vector<16x16xi32>
    %11 = arith.cmpi eq, %3, %10 : vector<16x16xi32>
    %12 = arith.extui %11 : vector<16x16xi1> to vector<16x16xi32>
    %13 = arith.sitofp %12 : vector<16x16xi32> to vector<16x16xf32>
    %c0_2 = arith.constant 0 : index
    %c0_3 = arith.constant 0 : index
    %14 = vector.load %arg2[%c0_2, %c0_3] : memref<16x1xf32, #tpu.memory_space<vmem>>, vector<16x1xf32>
    %c0_4 = arith.constant 0 : index
    %c0_5 = arith.constant 0 : index
    %15 = vector.load %arg3[%c0_4, %c0_5] : memref<16x1xf32, #tpu.memory_space<vmem>>, vector<16x1xf32>
    %c0_6 = arith.constant 0 : index
    %c0_7 = arith.constant 0 : index
    %16 = vector.load %arg6[%c0_6, %c0_7] : memref<384x128xf32, #tpu.memory_space<vmem>>, vector<384x128xf32>
    %c0_8 = arith.constant 0 : index
    %c0_9 = arith.constant 0 : index
    %17 = vector.load %arg8[%c0_8, %c0_9] : memref<1x128xf32, #tpu.memory_space<vmem>>, vector<1x128xf32>
    %cst = arith.constant dense<0.000000e+00> : vector<128xf32>
    %18 = vector.multi_reduction <add>, %1, %cst [0] : vector<16x128xf32> to vector<128xf32>
    %19 = vector.shape_cast %18 : vector<128xf32> to vector<1x128xf32>
    %cst_10 = arith.constant 1.600000e+01 : f32
    %20 = vector.broadcast %cst_10 : f32 to vector<1x128xf32>
    %21 = arith.divf %19, %20 : vector<1x128xf32>
    %22 = vector.broadcast %21 : vector<1x128xf32> to vector<16x128xf32>
    %23 = arith.subf %1, %22 : vector<16x128xf32>
    %24 = arith.mulf %23, %23 : vector<16x128xf32>
    %cst_11 = arith.constant dense<0.000000e+00> : vector<128xf32>
    %25 = vector.multi_reduction <add>, %24, %cst_11 [0] : vector<16x128xf32> to vector<128xf32>
    %26 = vector.shape_cast %25 : vector<128xf32> to vector<1x128xf32>
    %cst_12 = arith.constant 1.600000e+01 : f32
    %27 = vector.broadcast %cst_12 : f32 to vector<1x128xf32>
    %28 = arith.divf %26, %27 : vector<1x128xf32>
    %cst_13 = arith.constant 9.99999974E-6 : f32
    %29 = vector.broadcast %cst_13 : f32 to vector<1x128xf32>
    %30 = arith.addf %28, %29 : vector<1x128xf32>
    %31 = math.rsqrt %30 : vector<1x128xf32>
    %32 = vector.broadcast %31 : vector<1x128xf32> to vector<16x128xf32>
    %33 = arith.mulf %23, %32 : vector<16x128xf32>
    %34 = vector.broadcast %14 : vector<16x1xf32> to vector<16x128xf32>
    %35 = arith.mulf %33, %34 : vector<16x128xf32>
    %36 = vector.broadcast %15 : vector<16x1xf32> to vector<16x128xf32>
    %37 = arith.addf %35, %36 : vector<16x128xf32>
    %cst_14 = arith.constant 0.707106769 : f32
    %38 = vector.broadcast %cst_14 : f32 to vector<16x128xf32>
    %39 = arith.mulf %37, %38 : vector<16x128xf32>
    %40 = math.absf %39 : vector<16x128xf32>
    %cst_15 = arith.constant 0.327591091 : f32
    %41 = vector.broadcast %cst_15 : f32 to vector<16x128xf32>
    %42 = arith.mulf %41, %40 : vector<16x128xf32>
    %cst_16 = arith.constant 1.000000e+00 : f32
    %43 = vector.broadcast %cst_16 : f32 to vector<16x128xf32>
    %44 = arith.addf %43, %42 : vector<16x128xf32>
    %cst_17 = arith.constant 1.000000e+00 : f32
    %45 = vector.broadcast %cst_17 : f32 to vector<16x128xf32>
    %46 = arith.divf %45, %44 : vector<16x128xf32>
    %cst_18 = arith.constant 1.06140542 : f32
    %47 = vector.broadcast %cst_18 : f32 to vector<16x128xf32>
    %48 = arith.mulf %47, %46 : vector<16x128xf32>
    %cst_19 = arith.constant -1.45315206 : f32
    %49 = vector.broadcast %cst_19 : f32 to vector<16x128xf32>
    %50 = arith.addf %48, %49 : vector<16x128xf32>
    %51 = arith.mulf %50, %46 : vector<16x128xf32>
    %cst_20 = arith.constant 1.42141378 : f32
    %52 = vector.broadcast %cst_20 : f32 to vector<16x128xf32>
    %53 = arith.addf %51, %52 : vector<16x128xf32>
    %54 = arith.mulf %53, %46 : vector<16x128xf32>
    %cst_21 = arith.constant -0.284496725 : f32
    %55 = vector.broadcast %cst_21 : f32 to vector<16x128xf32>
    %56 = arith.addf %54, %55 : vector<16x128xf32>
    %57 = arith.mulf %56, %46 : vector<16x128xf32>
    %cst_22 = arith.constant 0.254829586 : f32
    %58 = vector.broadcast %cst_22 : f32 to vector<16x128xf32>
    %59 = arith.addf %57, %58 : vector<16x128xf32>
    %60 = arith.mulf %59, %46 : vector<16x128xf32>
    %cst_23 = arith.constant 0.000000e+00 : f32
    %61 = vector.broadcast %cst_23 : f32 to vector<16x128xf32>
    %62 = arith.subf %61, %40 : vector<16x128xf32>
    %63 = arith.mulf %62, %40 : vector<16x128xf32>
    %64 = math.exp %63 : vector<16x128xf32>
    %65 = arith.mulf %60, %64 : vector<16x128xf32>
    %cst_24 = arith.constant 1.000000e+00 : f32
    %66 = vector.broadcast %cst_24 : f32 to vector<16x128xf32>
    %67 = arith.subf %66, %65 : vector<16x128xf32>
    %cst_25 = arith.constant 0.000000e+00 : f32
    %68 = vector.broadcast %cst_25 : f32 to vector<16x128xf32>
    %69 = arith.cmpf olt, %39, %68 : vector<16x128xf32>
    %cst_26 = arith.constant 0.000000e+00 : f32
    %70 = vector.broadcast %cst_26 : f32 to vector<16x128xf32>
    %71 = arith.subf %70, %67 : vector<16x128xf32>
    %72 = arith.select %69, %71, %67 : vector<16x128xi1>, vector<16x128xf32>
    %cst_27 = arith.constant 5.000000e-01 : f32
    %73 = vector.broadcast %cst_27 : f32 to vector<16x128xf32>
    %74 = arith.mulf %73, %37 : vector<16x128xf32>
    %cst_28 = arith.constant 1.000000e+00 : f32
    %75 = vector.broadcast %cst_28 : f32 to vector<16x128xf32>
    %76 = arith.addf %75, %72 : vector<16x128xf32>
    %77 = arith.mulf %74, %76 : vector<16x128xf32>
    %cst_29 = arith.constant dense<0.000000e+00> : vector<16x128xf32>
    %78 = tpu.matmul %8, %77, %cst_29 {dimension_numbers = #tpu.dot_dimension_numbers<[1], [0], [0], [1], [0, 0, 1, 1], [], []>, precision = #tpu.contract_precision<fp32>} : vector<16x16xf32>, vector<16x128xf32>, vector<16x128xf32> -> vector<16x128xf32>
    %cst_30 = arith.constant dense<0.000000e+00> : vector<16x128xf32>
    %79 = tpu.matmul %13, %77, %cst_30 {dimension_numbers = #tpu.dot_dimension_numbers<[1], [0], [0], [1], [0, 0, 1, 1], [], []>, precision = #tpu.contract_precision<fp32>} : vector<16x16xf32>, vector<16x128xf32>, vector<16x128xf32> -> vector<16x128xf32>
    %80 = tpu.concatenate %78, %77, %79 in 1 : vector<16x128xf32>, vector<16x128xf32>, vector<16x128xf32> -> vector<16x384xf32>
    %cst_31 = arith.constant dense<0.000000e+00> : vector<16x128xf32>
    %81 = tpu.matmul %80, %16, %cst_31 {dimension_numbers = #tpu.dot_dimension_numbers<[1], [0], [0], [1], [0, 0, 1, 1], [], []>, precision = #tpu.contract_precision<fp32>} : vector<16x384xf32>, vector<384x128xf32>, vector<16x128xf32> -> vector<16x128xf32>
    %82 = vector.broadcast %17 : vector<1x128xf32> to vector<16x128xf32>
    %83 = arith.addf %81, %82 : vector<16x128xf32>
    %c0_32 = arith.constant 0 : index
    %c0_33 = arith.constant 0 : index
    %84 = vector.load %arg4[%c0_32, %c0_33] : memref<16x1xf32, #tpu.memory_space<vmem>>, vector<16x1xf32>
    %c0_34 = arith.constant 0 : index
    %c0_35 = arith.constant 0 : index
    %85 = vector.load %arg5[%c0_34, %c0_35] : memref<16x1xf32, #tpu.memory_space<vmem>>, vector<16x1xf32>
    %c0_36 = arith.constant 0 : index
    %c0_37 = arith.constant 0 : index
    %86 = vector.load %arg7[%c0_36, %c0_37] : memref<384x128xf32, #tpu.memory_space<vmem>>, vector<384x128xf32>
    %c0_38 = arith.constant 0 : index
    %c0_39 = arith.constant 0 : index
    %87 = vector.load %arg9[%c0_38, %c0_39] : memref<1x128xf32, #tpu.memory_space<vmem>>, vector<1x128xf32>
    %cst_40 = arith.constant dense<0.000000e+00> : vector<128xf32>
    %88 = vector.multi_reduction <add>, %83, %cst_40 [0] : vector<16x128xf32> to vector<128xf32>
    %89 = vector.shape_cast %88 : vector<128xf32> to vector<1x128xf32>
    %cst_41 = arith.constant 1.600000e+01 : f32
    %90 = vector.broadcast %cst_41 : f32 to vector<1x128xf32>
    %91 = arith.divf %89, %90 : vector<1x128xf32>
    %92 = vector.broadcast %91 : vector<1x128xf32> to vector<16x128xf32>
    %93 = arith.subf %83, %92 : vector<16x128xf32>
    %94 = arith.mulf %93, %93 : vector<16x128xf32>
    %cst_42 = arith.constant dense<0.000000e+00> : vector<128xf32>
    %95 = vector.multi_reduction <add>, %94, %cst_42 [0] : vector<16x128xf32> to vector<128xf32>
    %96 = vector.shape_cast %95 : vector<128xf32> to vector<1x128xf32>
    %cst_43 = arith.constant 1.600000e+01 : f32
    %97 = vector.broadcast %cst_43 : f32 to vector<1x128xf32>
    %98 = arith.divf %96, %97 : vector<1x128xf32>
    %cst_44 = arith.constant 9.99999974E-6 : f32
    %99 = vector.broadcast %cst_44 : f32 to vector<1x128xf32>
    %100 = arith.addf %98, %99 : vector<1x128xf32>
    %101 = math.rsqrt %100 : vector<1x128xf32>
    %102 = vector.broadcast %101 : vector<1x128xf32> to vector<16x128xf32>
    %103 = arith.mulf %93, %102 : vector<16x128xf32>
    %104 = vector.broadcast %84 : vector<16x1xf32> to vector<16x128xf32>
    %105 = arith.mulf %103, %104 : vector<16x128xf32>
    %106 = vector.broadcast %85 : vector<16x1xf32> to vector<16x128xf32>
    %107 = arith.addf %105, %106 : vector<16x128xf32>
    %cst_45 = arith.constant 0.707106769 : f32
    %108 = vector.broadcast %cst_45 : f32 to vector<16x128xf32>
    %109 = arith.mulf %107, %108 : vector<16x128xf32>
    %110 = math.absf %109 : vector<16x128xf32>
    %cst_46 = arith.constant 0.327591091 : f32
    %111 = vector.broadcast %cst_46 : f32 to vector<16x128xf32>
    %112 = arith.mulf %111, %110 : vector<16x128xf32>
    %cst_47 = arith.constant 1.000000e+00 : f32
    %113 = vector.broadcast %cst_47 : f32 to vector<16x128xf32>
    %114 = arith.addf %113, %112 : vector<16x128xf32>
    %cst_48 = arith.constant 1.000000e+00 : f32
    %115 = vector.broadcast %cst_48 : f32 to vector<16x128xf32>
    %116 = arith.divf %115, %114 : vector<16x128xf32>
    %cst_49 = arith.constant 1.06140542 : f32
    %117 = vector.broadcast %cst_49 : f32 to vector<16x128xf32>
    %118 = arith.mulf %117, %116 : vector<16x128xf32>
    %cst_50 = arith.constant -1.45315206 : f32
    %119 = vector.broadcast %cst_50 : f32 to vector<16x128xf32>
    %120 = arith.addf %118, %119 : vector<16x128xf32>
    %121 = arith.mulf %120, %116 : vector<16x128xf32>
    %cst_51 = arith.constant 1.42141378 : f32
    %122 = vector.broadcast %cst_51 : f32 to vector<16x128xf32>
    %123 = arith.addf %121, %122 : vector<16x128xf32>
    %124 = arith.mulf %123, %116 : vector<16x128xf32>
    %cst_52 = arith.constant -0.284496725 : f32
    %125 = vector.broadcast %cst_52 : f32 to vector<16x128xf32>
    %126 = arith.addf %124, %125 : vector<16x128xf32>
    %127 = arith.mulf %126, %116 : vector<16x128xf32>
    %cst_53 = arith.constant 0.254829586 : f32
    %128 = vector.broadcast %cst_53 : f32 to vector<16x128xf32>
    %129 = arith.addf %127, %128 : vector<16x128xf32>
    %130 = arith.mulf %129, %116 : vector<16x128xf32>
    %cst_54 = arith.constant 0.000000e+00 : f32
    %131 = vector.broadcast %cst_54 : f32 to vector<16x128xf32>
    %132 = arith.subf %131, %110 : vector<16x128xf32>
    %133 = arith.mulf %132, %110 : vector<16x128xf32>
    %134 = math.exp %133 : vector<16x128xf32>
    %135 = arith.mulf %130, %134 : vector<16x128xf32>
    %cst_55 = arith.constant 1.000000e+00 : f32
    %136 = vector.broadcast %cst_55 : f32 to vector<16x128xf32>
    %137 = arith.subf %136, %135 : vector<16x128xf32>
    %cst_56 = arith.constant 0.000000e+00 : f32
    %138 = vector.broadcast %cst_56 : f32 to vector<16x128xf32>
    %139 = arith.cmpf olt, %109, %138 : vector<16x128xf32>
    %cst_57 = arith.constant 0.000000e+00 : f32
    %140 = vector.broadcast %cst_57 : f32 to vector<16x128xf32>
    %141 = arith.subf %140, %137 : vector<16x128xf32>
    %142 = arith.select %139, %141, %137 : vector<16x128xi1>, vector<16x128xf32>
    %cst_58 = arith.constant 5.000000e-01 : f32
    %143 = vector.broadcast %cst_58 : f32 to vector<16x128xf32>
    %144 = arith.mulf %143, %107 : vector<16x128xf32>
    %cst_59 = arith.constant 1.000000e+00 : f32
    %145 = vector.broadcast %cst_59 : f32 to vector<16x128xf32>
    %146 = arith.addf %145, %142 : vector<16x128xf32>
    %147 = arith.mulf %144, %146 : vector<16x128xf32>
    %cst_60 = arith.constant dense<0.000000e+00> : vector<16x128xf32>
    %148 = tpu.matmul %8, %147, %cst_60 {dimension_numbers = #tpu.dot_dimension_numbers<[1], [0], [0], [1], [0, 0, 1, 1], [], []>, precision = #tpu.contract_precision<fp32>} : vector<16x16xf32>, vector<16x128xf32>, vector<16x128xf32> -> vector<16x128xf32>
    %cst_61 = arith.constant dense<0.000000e+00> : vector<16x128xf32>
    %149 = tpu.matmul %13, %147, %cst_61 {dimension_numbers = #tpu.dot_dimension_numbers<[1], [0], [0], [1], [0, 0, 1, 1], [], []>, precision = #tpu.contract_precision<fp32>} : vector<16x16xf32>, vector<16x128xf32>, vector<16x128xf32> -> vector<16x128xf32>
    %150 = tpu.concatenate %148, %147, %149 in 1 : vector<16x128xf32>, vector<16x128xf32>, vector<16x128xf32> -> vector<16x384xf32>
    %cst_62 = arith.constant dense<0.000000e+00> : vector<16x128xf32>
    %151 = tpu.matmul %150, %86, %cst_62 {dimension_numbers = #tpu.dot_dimension_numbers<[1], [0], [0], [1], [0, 0, 1, 1], [], []>, precision = #tpu.contract_precision<fp32>} : vector<16x384xf32>, vector<384x128xf32>, vector<16x128xf32> -> vector<16x128xf32>
    %152 = vector.broadcast %87 : vector<1x128xf32> to vector<16x128xf32>
    %153 = arith.addf %151, %152 : vector<16x128xf32>
    %154 = arith.addf %153, %1 : vector<16x128xf32>
    %c0_63 = arith.constant 0 : index
    %c0_64 = arith.constant 0 : index
    %c0_65 = arith.constant 0 : index
    %155 = vector.load %arg10[%c0_63, %c0_64, %c0_65] : memref<1x16x128xf32, #tpu.memory_space<vmem>>, vector<1x16x128xf32>
    %156 = vector.shape_cast %155 : vector<1x16x128xf32> to vector<16x128xf32>
    %157 = vector.shape_cast %154 : vector<16x128xf32> to vector<1x16x128xf32>
    tpu.vector_store %arg10[%c0_63, %c0_64, %c0_65], %157 {strides = array<i32>} : memref<1x16x128xf32, #tpu.memory_space<vmem>>, vector<1x16x128xf32>,
    return
  }
  func.func @transform_0(%arg0: i32) -> (i32, i32, i32) {
    %c0_i32 = arith.constant 0 : i32
    %c0_i32_0 = arith.constant 0 : i32
    %c0_i32_1 = arith.constant 0 : i32
    return %arg0, %c0_i32, %c0_i32_0 : i32, i32, i32
  }
  func.func @transform_1(%arg0: i32) -> (i32, i32) {
    %c0_i32 = arith.constant 0 : i32
    %c0_i32_0 = arith.constant 0 : i32
    %c0_i32_1 = arith.constant 0 : i32
    return %c0_i32, %c0_i32_0 : i32, i32
  }
  func.func @transform_2(%arg0: i32) -> (i32, i32) {
    %c0_i32 = arith.constant 0 : i32
    %c0_i32_0 = arith.constant 0 : i32
    %c0_i32_1 = arith.constant 0 : i32
    return %c0_i32, %c0_i32_0 : i32, i32
  }
  func.func @transform_3(%arg0: i32) -> (i32, i32) {
    %c0_i32 = arith.constant 0 : i32
    %c0_i32_0 = arith.constant 0 : i32
    %c0_i32_1 = arith.constant 0 : i32
    return %c0_i32, %c0_i32_0 : i32, i32
  }
  func.func @transform_4(%arg0: i32) -> (i32, i32) {
    %c0_i32 = arith.constant 0 : i32
    %c0_i32_0 = arith.constant 0 : i32
    %c0_i32_1 = arith.constant 0 : i32
    return %c0_i32, %c0_i32_0 : i32, i32
  }
  func.func @transform_5(%arg0: i32) -> (i32, i32) {
    %c0_i32 = arith.constant 0 : i32
    %c0_i32_0 = arith.constant 0 : i32
    %c0_i32_1 = arith.constant 0 : i32
    return %c0_i32, %c0_i32_0 : i32, i32
  }
  func.func @transform_6(%arg0: i32) -> (i32, i32) {
    %c0_i32 = arith.constant 0 : i32
    %c0_i32_0 = arith.constant 0 : i32
    %c0_i32_1 = arith.constant 0 : i32
    return %c0_i32, %c0_i32_0 : i32, i32
  }
  func.func @transform_7(%arg0: i32) -> (i32, i32) {
    %c0_i32 = arith.constant 0 : i32
    %c0_i32_0 = arith.constant 0 : i32
    %c0_i32_1 = arith.constant 0 : i32
    return %c0_i32, %c0_i32_0 : i32, i32
  }
  func.func @transform_8(%arg0: i32) -> (i32, i32) {
    %c0_i32 = arith.constant 0 : i32
    %c0_i32_0 = arith.constant 0 : i32
    %c0_i32_1 = arith.constant 0 : i32
    return %c0_i32, %c0_i32_0 : i32, i32
  }
  func.func @transform_9(%arg0: i32) -> (i32, i32, i32) {
    %c0_i32 = arith.constant 0 : i32
    %c0_i32_0 = arith.constant 0 : i32
    %c0_i32_1 = arith.constant 0 : i32
    return %arg0, %c0_i32, %c0_i32_0 : i32, i32, i32
  }
}

</mosaic_0001>

<bundles_post_ra>
// kernel: tile.13
= control target key start
LH: loop header
LB: loop body
LE: loop exit
PB: predicated region body
PF: predicated region fallthrough
CT: control target
= control target key end

     0   :  { %s28_s0 = inlined_call_operand.vmem [shape: f32[8], index: 0, kind: input, shape index: {}]   ;;  %s29_s1 = inlined_call_operand.vmem [shape: f32[16,8], index: 1, kind: output, shape index: {}]  }
   0x1   :  { %v4_v0 = vld [vmem:[%s28_s0] ss:$0 sm:$0xff] }
   0x2   :  { %5 = vst [vmem:[%s29_s1] sm:$0xff] %v4_v0  ;;  %8 = vst [vmem:[%s29_s1 + $0x8] sm:$0xff] %v4_v0 }

// kernel: tile.14
= control target key start
LH: loop header
LB: loop body
LE: loop exit
PB: predicated region body
PF: predicated region fallthrough
CT: control target
= control target key end

     0   :  { %s133_s10 = smov 120   ;;  %s134_s11 = smov 104   ;;  %vm3_vm0 = vcmask 64512   ;;  %vm9_vm1 = vcmask 1048512   ;;  %vm15_vm2 = vcmask 982912   ;;  %vm21_vm3 = vcmask 917312   ;;  %s209_s0 = inlined_call_operand.vmem [shape: f32[16,8], index: 0, kind: input, shape index: {}]   ;;  %s210_s1 = inlined_call_operand.vmem [shape: f32[1,128], index: 1, kind: output, shape index: {}]  }
   0x1   :  { %v103_v0 = vld [vmem:[%s209_s0 + $0xf] sm:$0x1]   ;;  %v105_v1 = vld [vmem:[%s209_s0 + $0xd] sm:$0x1]   ;;  %v104_v2 = vld [vmem:[%s209_s0 + $0xe] sm:$0x1]  }
   0x2   :  { %7 = vrot.lane.b32.xlu0 %v103_v0, %s133_s10  ;;  %19 = vrot.lane.b32.xlu1 %v105_v1, %s134_s11  ;;  %v106_v3 = vld [vmem:[%s209_s0 + $0xc] sm:$0x1]   ;;  %s135_s16 = smov 112   ;;  %s136_s17 = smov 96   ;;  %v107_v4 = vld [vmem:[%s209_s0 + $0xb] sm:$0x1]  }
   0x3   :  { %v108_v5 = vld [vmem:[%s209_s0 + $0xa] sm:$0x1]   ;;  %v2_v6 = vld [vmem:[%s209_s0] sm:$0x1]   ;;  %s137_s24 = smov 88   ;;  %s138_s25 = smov 80  }
   0x4   :  { %4 = vst.msk [vmem:[#allocation0] sm:$0x1] %vm3_vm0, %v2_v6   ;;  %v109_v7 = vld [vmem:[%s209_s0 + $0x9] sm:$0x1]   ;;  %v110_v8 = vld [vmem:[%s209_s0 + $0x8] sm:$0x1]  }
   0x5   :  { %s139_s30 = smov 72   ;;  %s140_s2 = smov 64   ;;  %v111_v9 = vld [vmem:[%s209_s0 + $0x7] sm:$0x1]   ;;  %v112_v10 = vld [vmem:[%s209_s0 + $0x6] sm:$0x1]  }
   0x6   :  { %13 = vrot.lane.b32.xlu0 %v104_v2, %s135_s16  ;;  %25 = vrot.lane.b32.xlu1 %v106_v3, %s136_s17  ;;  %s141_s7 = smov 56   ;;  %s142_s8 = smov 48   ;;  %v113_v11 = vld [vmem:[%s209_s0 + $0x5] sm:$0x1]   ;;  %v114_v12 = vld [vmem:[%s209_s0 + $0x4] sm:$0x1]  }
   0x7   :  { %s143_s13 = smov 40   ;;  %s144_s14 = smov 32   ;;  %v115_v13 = vld [vmem:[%s209_s0 + $0x3] sm:$0x1]   ;;  %v116_v14 = vld [vmem:[%s209_s0 + $0x2] sm:$0x1]  }
   0x8   :  { %s145_s19 = smov 24   ;;  %s146_s20 = smov 16   ;;  %v117_v15 = vld [vmem:[%s209_s0 + $0x1] sm:$0x1]   ;;  %vm27_vm4 = vcmask 851712   ;;  %vm33_vm5 = vcmask 786112  }
   0x9   :  { %s147_s0 = smov 8   ;;  %vm39_vm6 = vcmask 720512   ;;  %vm45_vm7 = vcmask 654912   ;;  %vm51_vm8 = vcmask 589312   ;;  %vm57_vm9 = vcmask 523712  }
   0xa   :  { %31 = vrot.lane.b32.xlu0 %v107_v4, %s137_s24  ;;  %37 = vrot.lane.b32.xlu1 %v108_v5, %s138_s25  ;;  %vm63_vm10 = vcmask 458112   ;;  %vm69_vm11 = vcmask 392512   ;;  %vm75_vm12 = vcmask 326912   ;;  %vm81_vm13 = vcmask 261312  }
   0xb   :  { %vm87_vm14 = vcmask 195712   ;;  %vm93_vm15 = vcmask 130112  }
   0xe   :  { %43 = vrot.lane.b32.xlu0 %v109_v7, %s139_s30  ;;  %49 = vrot.lane.b32.xlu1 %v110_v8, %s140_s2 }
  0x12   :  { %55 = vrot.lane.b32.xlu0 %v111_v9, %s141_s7  ;;  %61 = vrot.lane.b32.xlu1 %v112_v10, %s142_s8 }
  0x16   :  { %67 = vrot.lane.b32.xlu0 %v113_v11, %s143_s13  ;;  %73 = vrot.lane.b32.xlu1 %v114_v12, %s144_s14 }
  0x1a   :  { %79 = vrot.lane.b32.xlu0 %v115_v13, %s145_s19  ;;  %85 = vrot.lane.b32.xlu1 %v116_v14, %s146_s20 }
  0x1e   :  { %91 = vrot.lane.b32.xlu0 %v117_v15, %s147_s0 }
  0x74   :  { %v8_v16 = vpop.permute.xlu0 %7   ;;  %v20_v17 = vpop.permute.xlu1 %19  }
  0x75   :  { %10 = vst.msk [vmem:[#allocation0] sm:$0x1] %vm9_vm1, %v8_v16  }
  0x78   :  { %v14_v18 = vpop.permute.xlu0 %13   ;;  %v26_v19 = vpop.permute.xlu1 %25  }
  0x79   :  { %16 = vst.msk [vmem:[#allocation0] sm:$0x1] %vm15_vm2, %v14_v18  }
  0x7a   :  { %22 = vst.msk [vmem:[#allocation0] sm:$0x1] %vm21_vm3, %v20_v17  }
  0x7b   :  { %28 = vst.msk [vmem:[#allocation0] sm:$0x1] %vm27_vm4, %v26_v19  }
  0x7c   :  { %v32_v20 = vpop.permute.xlu0 %31   ;;  %v38_v21 = vpop.permute.xlu1 %37  }
  0x7d   :  { %34 = vst.msk [vmem:[#allocation0] sm:$0x1] %vm33_vm5, %v32_v20  }
  0x7e   :  { %40 = vst.msk [vmem:[#allocation0] sm:$0x1] %vm39_vm6, %v38_v21  }
  0x80   :  { %v44_v22 = vpop.permute.xlu0 %43   ;;  %v50_v23 = vpop.permute.xlu1 %49  }
  0x81   :  { %46 = vst.msk [vmem:[#allocation0] sm:$0x1] %vm45_vm7, %v44_v22  }
  0x82   :  { %52 = vst.msk [vmem:[#allocation0] sm:$0x1] %vm51_vm8, %v50_v23  }
  0x84   :  { %v56_v24 = vpop.permute.xlu0 %55   ;;  %v62_v25 = vpop.permute.xlu1 %61  }
  0x85   :  { %58 = vst.msk [vmem:[#allocation0] sm:$0x1] %vm57_vm9, %v56_v24  }
  0x86   :  { %64 = vst.msk [vmem:[#allocation0] sm:$0x1] %vm63_vm10, %v62_v25  }
  0x88   :  { %v68_v26 = vpop.permute.xlu0 %67   ;;  %v74_v27 = vpop.permute.xlu1 %73  }
  0x89   :  { %70 = vst.msk [vmem:[#allocation0] sm:$0x1] %vm69_vm11, %v68_v26  }
  0x8a   :  { %76 = vst.msk [vmem:[#allocation0] sm:$0x1] %vm75_vm12, %v74_v27  }
  0x8c   :  { %v80_v28 = vpop.permute.xlu0 %79   ;;  %v86_v29 = vpop.permute.xlu1 %85  }
  0x8d   :  { %82 = vst.msk [vmem:[#allocation0] sm:$0x1] %vm81_vm13, %v80_v28  }
  0x8e   :  { %88 = vst.msk [vmem:[#allocation0] sm:$0x1] %vm87_vm14, %v86_v29  }
  0x90   :  { %v92_v30 = vpop.permute.xlu0 %91  }
  0x91   :  { %94 = vst.msk [vmem:[#allocation0] sm:$0x1] %vm93_vm15, %v92_v30  }
  0x98   :  { %v99_v31 = vld [vmem:[#allocation0] sm:$0x1] }
  0x99   :  { %102 = vst [vmem:[%s210_s1] sm:$0x1] %v99_v31 }

// kernel: residual_cnn_forward.1
= control target key start
LH: loop header
LB: loop body
LE: loop exit
PB: predicated region body
PF: predicated region fallthrough
CT: control target
= control target key end

     0   :  { %s7456_s30 = smov 0   ;;  %s9844_s0 = inlined_call_operand.vmem [shape: f32[2,16,128], index: 0, kind: input, shape index: {}]   ;;  %s9845_s1 = inlined_call_operand.vmem [shape: f32[16,1], index: 1, kind: input, shape index: {}]   ;;  %s9846_s2 = inlined_call_operand.vmem [shape: f32[16,1], index: 2, kind: input, shape index: {}]   ;;  %s9847_s3 = inlined_call_operand.vmem [shape: f32[16,1], index: 3, kind: input, shape index: {}]   ;;  %s9848_s4 = inlined_call_operand.vmem [shape: f32[16,1], index: 4, kind: input, shape index: {}]   ;;  %s9849_s5 = inlined_call_operand.vmem [shape: f32[384,128], index: 5, kind: input, shape index: {}]   ;;  %s9850_s6 = inlined_call_operand.vmem [shape: f32[384,128], index: 6, kind: input, shape index: {}]   ;;  %s9851_s7 = inlined_call_operand.vmem [shape: f32[1,128], index: 7, kind: input, shape index: {}]   ;;  %s9852_s8 = inlined_call_operand.vmem [shape: f32[1,128], index: 8, kind: input, shape index: {}]   ;;  %s9853_s9 = inlined_call_operand.vmem [shape: f32[2,16,128], index: 9, kind: output, shape index: {}]  }
   0x1 LB: > { %s5963_s10 = sadd.s32 4294967295, %s7402_s30   ;;  %p5967_p0 = scmp.ge.s32.totalorder %s7402_s30, 1  ;;  %s7402_s30 = sphi %s7456_s30, %s19_s30  }
   0x2   : > { %p287_p1 = scmp.lt.s32.totalorder %s7402_s30, 3 }
   0x4   : > { %p288_p2 = pnand %p5967_p0, %p287_p1 }
   0x6   : > { %291 = sbr.rel (%p288_p2) target bundleno = 1518 (0x5ee), region = 56 }
   0xb   : > { %v359_v0 = vld [vmem:[%s9846_s2 + $0x8] sm:$0xff]  ;;  %v7404_v2 = vmov 0   ;;  %v358_v3 = vld [vmem:[%s9846_s2] sm:$0xff]  ;;  %p323_p3 = scmp.lt.s32.totalorder %s5963_s10, 1  ;;  %v335_v15 = vlaneseq  ;;  %v7405_v23 = vmov 0.0   ;;  %vm512_vm1 = vcmask 130048  }
   0xc   : > { %v357_v1 = vld [vmem:[%s9845_s1 + $0x8] sm:$0xff]  ;;  %7373 = vset.pattern.permute.xlu1 %v7404_v2  ;;  %7372 = vset.pattern.permute.xlu0 %v7404_v2  ;;  %v356_v4 = vld [vmem:[%s9845_s1] sm:$0xff] }
   0xd   : > { %453 = vperm.xlu1 %7373, %v359_v0   ;;  %441 = vperm.xlu0 %7372, %v357_v1   ;;  %v3137_v5 = vld [vmem:[%s9847_s3] sm:$0xff]  ;;  %v3138_v6 = vld [vmem:[%s9847_s3 + $0x8] sm:$0xff]  ;;  %s10295_s10 = smov (!%p323_p3, %s5963_s10), 1  ;;  %v336_v16 = vshrl.u32 %v335_v15, 7  ;;  %v339_v19 = vand.u32 127, %v335_v15 }
   0xe   : > { %v3139_v7 = vld [vmem:[%s9848_s4] sm:$0xff]  ;;  %v3140_v8 = vld [vmem:[%s9848_s4 + $0x8] sm:$0xff]  ;;  %s6004_s27 = sshll.u32 %s10295_s10, 4 }
   0xf   : > { %s7496_s11 = scalar_lea.vmem %s9844_s0, %s6004_s27  ;;  %v337_v18 = vadd.s32 8, %v336_v16  ;;  %v340_v20 = vadd.s32 4294967295, %v336_v16  ;;  %v348_v33 = vadd.s32 1, %v336_v16  ;;  %s332_s23 = scalar_lea.vmem %s9853_s9, %s6004_s27 }
  0x10   : > { %v333_v9 = vld [vmem:[%s7496_s11] sm:$0xff]  ;;  %v334_v10 = vld [vmem:[%s7496_s11 + $0x8] sm:$0xff] }
  0x11   : > { %448 = vperm.xlu1 %7373, %v358_v3   ;;  %436 = vperm.xlu0 %7372, %v356_v4   ;;  %v409_v11 = vadd.f32 %v334_v10, %v333_v9  ;;  %v341_v21 = vadd.s32 4294967295, %v337_v18  ;;  %vm342_vm0 = vcmp.eq.s32.totalorder %v339_v19, %v340_v20  ;;  %v349_v36 = vadd.s32 1, %v337_v18 }
  0x12   : > { %v7500_v24 = vsel %vm342_vm0, 1.0, %v7405_v23  ;;  %vm350_vm3 = vcmp.eq.s32.totalorder %v339_v19, %v348_v33 }
  0x13   : > { %v410_v12 = vrot.slane %v409_v11, 4  ;;  %10048 = vst [vmem:[#allocation2_spill] sm:$0xff] %v7500_v24  ;;  %vm343_vm2 = vcmp.eq.s32.totalorder %v339_v19, %v341_v21  ;;  %v514_v25 = vsel %vm512_vm1, %v7500_v24, 0  ;;  %6785 = vmatprep.mubr.msk.f32.mxu1 %vm512_vm1, %v7500_v24  ;;  %v7518_v37 = vsel %vm350_vm3, 1.0, %v7405_v23 }
  0x14   : > { %v7504_v26 = vsel %vm343_vm2, 1.0, %v7405_v23  ;;  %v7508_v27 = vsub.f32 %v514_v25, %v514_v25  ;;  %10053 = vst [vmem:[#allocation7_spill] sm:$0xff] %v7518_v37  ;;  %vm351_vm4 = vcmp.eq.s32.totalorder %v339_v19, %v349_v36 }
  0x15   : > { %3216 = vperm.xlu1 %7373, %v3137_v5   ;;  %3221 = vperm.xlu0 %7372, %v3138_v6   ;;  %v411_v13 = vadd.f32 %v410_v12, %v409_v11  ;;  %10049 = vst [vmem:[#allocation3_spill] sm:$0xff] %v7504_v26  ;;  %v7520_v38 = vsel %vm351_vm4, 1.0, %v7405_v23 }
  0x16   : > { %10050 = vst [vmem:[#allocation4_spill] sm:$0xff] %v7508_v27  ;;  %v7511_v29 = vand.u32 4294901760, %v7508_v27  ;;  %10054 = vst [vmem:[#allocation8_spill] sm:$0xff] %v7520_v38 }
  0x17   : > { %v412_v14 = vrot.slane %v411_v13, 2 }
  0x18   : > { %10051 = vst [vmem:[#allocation5_spill] sm:$0xff] %v7511_v29  ;;  %v589_v30 = vsub.f32 %v7508_v27, %v7511_v29 }
  0x19   : > { %3228 = vperm.xlu1 %7373, %v3139_v7   ;;  %3233 = vperm.xlu0 %7372, %v3140_v8   ;;  %v413_v17 = vadd.f32 %v412_v14, %v411_v13 }
  0x1a   : > { %v7515_v32 = vand.u32 4294901760, %v589_v30 }
  0x1b   : > { %v414_v22 = vrot.slane %v413_v17, 1 }
  0x1c   : > { %10052 = vst [vmem:[#allocation6_spill] sm:$0xff] %v7515_v32  ;;  %6778 = vmatprep.mubr.f32.mxu0 %v7515_v32 }
  0x1d   : > { %v415_v28 = vadd.f32 %v414_v22, %v413_v17 }
  0x1f   : > { %v417_v31 = vmul.f32 0.0625, %v415_v28 }
  0x21   : > { %v418_v34 = vsub.f32 %v333_v9, %v417_v31  ;;  %v419_v35 = vsub.f32 %v334_v10, %v417_v31 }
  0x23   : > { %v420_v39 = vmul.f32 %v418_v34, %v418_v34  ;;  %v421_v40 = vmul.f32 %v419_v35, %v419_v35 }
  0x25   : > { %v422_v41 = vadd.f32 %v421_v40, %v420_v39  ;;  %v517_v39 = vsel %vm512_vm1, %v7504_v26, 0 }
  0x27   : > { %v423_v42 = vrot.slane %v422_v41, 4 }
  0x29   : > { %v424_v43 = vadd.f32 %v423_v42, %v422_v41 }
  0x2b   : > { %v425_v44 = vrot.slane %v424_v43, 2 }
  0x2d   : > { %v426_v45 = vadd.f32 %v425_v44, %v424_v43  ;;  %v7524_v43 = vsub.f32 %v517_v39, %v517_v39 }
  0x2f   : > { %v427_v46 = vrot.slane %v426_v45, 1  ;;  %10055 = vst [vmem:[#allocation9_spill] sm:$0xff] %v7524_v43 }
  0x31   : > { %v428_v47 = vadd.f32 %v427_v46, %v426_v45 }
  0x33   : > { %v429_v48 = vmul.f32 0.0625, %v428_v47 }
  0x35   : > { %v430_v49 = vadd.f32 1e-05, %v429_v48 }
  0x37   : > { %7374 = vrsqrt.f32 %v430_v49 }
  0x44   : > { %v7375_v50 = vpop.eup %7374 }
  0x45   : > { %v433_v51 = vmul.f32 %v7375_v50, %v419_v35  ;;  %v432_v55 = vmul.f32 %v7375_v50, %v418_v34  ;;  %v7527_v50 = vand.u32 4294901760, %v7524_v43 }
  0x47   : > { %10056 = vst [vmem:[#allocation10_spill] sm:$0xff] %v7527_v50 }
  0x88   : > { %v454_v52 = vpop.permute.xlu1 %453  ;;  %v442_v53 = vpop.permute.xlu0 %441 }
  0x89   : > { %v445_v54 = vmul.f32 %v442_v53, %v433_v51 }
  0x8b   : > { %v457_v56 = vadd.f32 %v454_v52, %v445_v54 }
  0x8c   : > { %v437_v57 = vpop.permute.xlu0 %436  ;;  %v449_v60 = vpop.permute.xlu1 %448 }
  0x8d   : > { %v459_v58 = vmul.f32 0.70710677, %v457_v56  ;;  %v444_v59 = vmul.f32 %v437_v57, %v432_v55  ;;  %v507_v48 = vmul.f32 0.5, %v457_v56  ;;  %v1022_v56 = vsel %vm512_vm1, %v7518_v37, 0 }
  0x8f   : > { %v461_v61 = vand.u32 2147483647, %v459_v58  ;;  %v456_v62 = vadd.f32 %v449_v60, %v444_v59  ;;  %vm501_vm5 = vcmp.lt.f32.partialorder %v459_v58, 0.0  ;;  %v599_v59 = vsub.f32 %v7524_v43, %v7527_v50 }
  0x91   : > { %v463_v63 = vmul.f32 0.3275911, %v461_v61  ;;  %v458_v0 = vmul.f32 0.70710677, %v456_v62  ;;  %v489_v5 = vsub.f32 0.0, %v461_v61  ;;  %v506_v55 = vmul.f32 0.5, %v456_v62 }
  0x93   : > { %v465_v1 = vadd.f32 1.0, %v463_v63  ;;  %v460_v2 = vand.u32 2147483647, %v458_v0  ;;  %v491_v6 = vmul.f32 %v489_v5, %v461_v61  ;;  %vm500_vm6 = vcmp.lt.f32.partialorder %v458_v0, 0.0 }
  0x94   : > { %v7542_v63 = vand.u32 4294901760, %v599_v59  ;;  %v1025_v0 = vsel %vm512_vm1, %v7520_v38, 0 }
  0x95   : > { %7376 = vrcp.f32 %v465_v1  ;;  %v462_v3 = vmul.f32 0.3275911, %v460_v2  ;;  %v488_v7 = vsub.f32 0.0, %v460_v2  ;;  %v494_v10 = vmul.f32 1.442695, %v491_v6 }
  0x96   : > { %10060 = vst [vmem:[#allocation14_spill] sm:$0xff] %v7542_v63  ;;  %v7549_v1 = vsub.f32 %v1022_v56, %v1022_v56  ;;  %v369_v56 = vld [vmem:[%s9849_s5 + $0x48] sm:$0xff] }
  0x97   : > { %v464_v4 = vadd.f32 1.0, %v462_v3  ;;  %v490_v11 = vmul.f32 %v488_v7, %v460_v2 }
  0x98   : > { %10062 = vst [vmem:[#allocation16_spill] sm:$0xff] %v7549_v1  ;;  %v7570_v7 = vand.u32 4294901760, %v7549_v1 }
  0x99   : > { %7378 = vrcp.f32 %v464_v4  ;;  %v492_v16 = vmul.f32 1.442695, %v490_v11  ;;  %v7558_v4 = vsub.f32 %v1025_v0, %v1025_v0 }
  0x9a   : > { %7380 = vpow2.f32 %v494_v10  ;;  %10064 = vst [vmem:[#allocation18_spill] sm:$0xff] %v7570_v7  ;;  %v1097_v11 = vsub.f32 %v7549_v1, %v7570_v7 }
  0x9b   : > { %7382 = vpow2.f32 %v492_v16  ;;  %10063 = vst [vmem:[#allocation17_spill] sm:$0xff] %v7558_v4  ;;  %v375_v16 = vld [vmem:[%s9849_s5 + $0x78] sm:$0xff] }
  0xa2   : > { %v7377_v8 = vpop.eup %7376 }
  0xa3   : > { %v471_v9 = vmul.f32 1.0614054, %v7377_v8 }
  0xa5   : > { %v473_v12 = vadd.f32 -1.4531521, %v471_v9  ;;  %v7579_v9 = vand.u32 4294901760, %v7558_v4 }
  0xa6   : > { %v7379_v13 = vpop.eup %7378 }
  0xa7   : > { %v475_v14 = vmul.f32 %v7377_v8, %v473_v12  ;;  %v470_v15 = vmul.f32 1.0614054, %v7379_v13  ;;  %v7381_v34 = vpop.eup %7380  ;;  %10065 = vst [vmem:[#allocation19_spill] sm:$0xff] %v7579_v9  ;;  %v1107_v12 = vsub.f32 %v7558_v4, %v7579_v9 }
  0xa8   : > { %v7383_v42 = vpop.eup %7382 }
  0xa9   : > { %v477_v17 = vadd.f32 1.4214138, %v475_v14  ;;  %v472_v18 = vadd.f32 -1.4531521, %v470_v15  ;;  %v7608_v14 = vand.u32 4294901760, %v1107_v12  ;;  %v391_v15 = vld [vmem:[%s9849_s5 + $0xf8] sm:$0xff] }
  0xab   : > { %v479_v19 = vmul.f32 %v7377_v8, %v477_v17  ;;  %v474_v20 = vmul.f32 %v7379_v13, %v472_v18  ;;  %10067 = vst [vmem:[#allocation21_spill] sm:$0xff] %v7608_v14  ;;  %v390_v17 = vld [vmem:[%s9849_s5 + $0xf0] sm:$0xff]  ;;  %v7625_v18 = vand.u32 4294901760, %v391_v15 }
  0xad   : > { %v481_v21 = vadd.f32 -0.28449672, %v479_v19  ;;  %v476_v22 = vadd.f32 1.4214138, %v474_v20  ;;  %10068 = vst [vmem:[#allocation22_spill] sm:$0xff] %v7625_v18  ;;  %v374_v19 = vld [vmem:[%s9849_s5 + $0x70] sm:$0xff] }
  0xae   : > { %v7632_v20 = vand.u32 4294901760, %v375_v16 }
  0xaf   : > { %v483_v23 = vmul.f32 %v7377_v8, %v481_v21  ;;  %v478_v25 = vmul.f32 %v7379_v13, %v476_v22  ;;  %v389_v21 = vld [vmem:[%s9849_s5 + $0xe8] sm:$0xff]  ;;  %v7639_v22 = vand.u32 4294901760, %v390_v17 }
  0xb1   : > { %v485_v28 = vadd.f32 0.2548296, %v483_v23  ;;  %v480_v30 = vadd.f32 -0.28449672, %v478_v25  ;;  %v373_v23 = vld [vmem:[%s9849_s5 + $0x68] sm:$0xff]  ;;  %v7646_v25 = vand.u32 4294901760, %v374_v19  ;;  %v7676_v39 = vsub.f32 %v390_v17, %v7639_v22 }
  0xb3   : > { %v487_v31 = vmul.f32 %v7377_v8, %v485_v28  ;;  %v482_v33 = vmul.f32 %v7379_v13, %v480_v30  ;;  %v388_v28 = vld [vmem:[%s9849_s5 + $0xe0] sm:$0xff]  ;;  %v7655_v30 = vsub.f32 %v391_v15, %v7625_v18 }
  0xb5   : > { %v497_v35 = vmul.f32 %v7381_v34, %v487_v31  ;;  %v484_v36 = vadd.f32 0.2548296, %v482_v33  ;;  %10069 = vst [vmem:[#allocation23_spill] sm:$0xff] %v7655_v30  ;;  %v7657_v31 = vand.u32 4294901760, %v389_v21  ;;  %v372_v33 = vld [vmem:[%s9849_s5 + $0x60] sm:$0xff]  ;;  %v7665_v34 = vsub.f32 %v375_v16, %v7632_v20 }
  0xb7   : > { %v499_v40 = vsub.f32 1.0, %v497_v35  ;;  %v486_v41 = vmul.f32 %v7379_v13, %v484_v36  ;;  %v7602_v13 = vand.u32 4294901760, %v1097_v11  ;;  %v7667_v35 = vand.u32 4294901760, %v373_v23  ;;  %v387_v36 = vld [vmem:[%s9849_s5 + $0xd8] sm:$0xff] }
  0xb9   : > { %v503_v44 = vsub.f32 0.0, %v499_v40  ;;  %v496_v45 = vmul.f32 %v7383_v42, %v486_v41  ;;  %10066 = vst [vmem:[#allocation20_spill] sm:$0xff] %v7602_v13  ;;  %v371_v41 = vld [vmem:[%s9849_s5 + $0x58] sm:$0xff]  ;;  %v7686_v42 = vsub.f32 %v374_v19, %v7646_v25 }
  0xbb   : > { %v505_v46 = vsel %vm501_vm5, %v503_v44, %v499_v40  ;;  %v498_v47 = vsub.f32 1.0, %v496_v45  ;;  %v7678_v40 = vand.u32 4294901760, %v388_v28  ;;  %v7688_v44 = vand.u32 4294901760, %v372_v33  ;;  %v386_v45 = vld [vmem:[%s9849_s5 + $0xd0] sm:$0xff] }
  0xbc   : > { %v509_v49 = vadd.f32 1.0, %v505_v46  ;;  %v9856_v46 = vand.u32 4294901760, %v7655_v30  ;;  %v9857_v0 = vand.u32 4294901760, %v7686_v42 }
  0xbd   : > { %v502_v51 = vsub.f32 0.0, %v498_v47  ;;  %v7720_v59 = vsub.f32 %v388_v28, %v7678_v40 }
  0xbe   : > { %v511_v52 = vmul.f32 %v509_v49, %v507_v48  ;;  %v7699_v48 = vand.u32 4294901760, %v387_v36  ;;  %v370_v49 = vld [vmem:[%s9849_s5 + $0x50] sm:$0xff]  ;;  %v1778_v11 = vsub.f32 %v7655_v30, %v9856_v46 }
  0xbf   : > { %v504_v53 = vsel %vm500_vm6, %v502_v51, %v498_v47  ;;  %v7697_v47 = vsub.f32 %v389_v21, %v7657_v31  ;;  %v9854_v51 = vand.u32 4294901760, %v7665_v34 }
  0xc0   : > { %v7529_v54 = vand.u32 4294901760, %v511_v52  ;;  %v508_v57 = vadd.f32 1.0, %v504_v53  ;;  %v7710_v53 = vand.u32 4294901760, %v371_v41  ;;  %v7744_v15 = vsub.f32 %v387_v36, %v7699_v48 }
  0xc1   : > { %v9858_v12 = vand.u32 4294901760, %v7697_v47  ;;  %v1666_v17 = vsub.f32 %v7665_v34, %v9854_v51 }
  0xc2   : > { %10057 = vst [vmem:[#allocation11_spill] sm:$0xff] %v7529_v54  ;;  %v7534_v58 = vsub.f32 %v511_v52, %v7529_v54  ;;  %v510_v60 = vmul.f32 %v508_v57, %v506_v55  ;;  %6774 = vmatprep.subr.mxu0 %v7529_v54  ;;  %v7708_v52 = vsub.f32 %v373_v23, %v7667_v35  ;;  %v385_v55 = vld [vmem:[%s9849_s5 + $0xc8] sm:$0xff]  ;;  %v9855_v57 = vand.u32 4294901760, %v7676_v39 }
  0xc3   : > { %6775 = vmatpush3.msra.mxu0 %v7529_v54  ;;  %v7746_v16 = vand.u32 4294901760, %v385_v55  ;;  %v7756_v21 = vsub.f32 %v371_v41, %v7710_v53  ;;  %v7758_v23 = vand.u32 4294901760, %v369_v56  ;;  %v1673_v41 = vsub.f32 %v7686_v42, %v9857_v0 }
  0xc4   : > { %10058 = vst [vmem:[#allocation12_spill] sm:$0xff] %v7534_v58  ;;  %v7540_v61 = vand.u32 4294901760, %v510_v60  ;;  %v7545_v62 = vand.u32 4294901760, %v7534_v58  ;;  %v9860_v19 = vand.u32 4294901760, %v7708_v52  ;;  %v1785_v28 = vsub.f32 %v7676_v39, %v9855_v57 }
  0xc5   : > { %v1779_v57 = vand.u32 4294901760, %v1778_v11 }
  0xc6   : > { %10059 = vst [vmem:[#allocation13_spill] sm:$0xff] %v7540_v61  ;;  %10061 = vst [vmem:[#allocation15_spill] sm:$0xff] %v7545_v62  ;;  %v7552_v2 = vsub.f32 %v510_v60, %v7540_v61  ;;  %6776 = vmatprep.subr.mxu0 %v7540_v61  ;;  %v638_v3 = vsub.f32 %v7534_v58, %v7545_v62  ;;  %v7722_v60 = vand.u32 4294901760, %v386_v45 }
  0xc7   : > { %6777 = vmatpush3.msra.mxu0 %v7540_v61  ;;  %v1680_v0 = vsub.f32 %v7708_v52, %v9860_v19 }
  0xc8   : > { %6779 = vmatmul.mubr.f32.vlgmr.msra.gmra.mxu0 %v7542_v63  ;;  %6788 = vmatprep.subr.mxu0 %v7534_v58  ;;  %v7562_v5 = vand.u32 4294901760, %v638_v3  ;;  %v7565_v6 = vand.u32 4294901760, %v7552_v2  ;;  %v7732_v3 = vsub.f32 %v372_v33, %v7688_v44  ;;  %v7767_v36 = vsub.f32 %v386_v45, %v7722_v60 }
  0xc9   : > { %6789 = vmatpush3.msra.mxu0 %v7534_v58  ;;  %6792 = vmatprep.mubr.f32.mxu0 %v7508_v27  ;;  %v1792_v45 = vsub.f32 %v7697_v47, %v9858_v12  ;;  %v7785_v33 = vsub.f32 %v385_v55, %v7746_v16  ;;  %v1786_v12 = vand.u32 4294901760, %v1785_v28  ;;  %v10070_v55 = vand.u32 4294901760, %v7720_v59  ;;  %v364_v27 = vld [vmem:[%s9849_s5 + $0x20] sm:$0xff] }
  0xca   : > { %6781 = vmatprep.subr.mxu1 %v7562_v5  ;;  %6790 = vmatprep.subr.mxu0 %v7552_v2  ;;  %v645_v8 = vsub.f32 %v7552_v2, %v7565_v6  ;;  %v10071_v19 = vand.u32 4294901760, %v7732_v3  ;;  %v7944_v63 = vand.u32 4294901760, %v364_v27 }
  0xcb   : > { %6782 = vmatpush3.msra.mxu1 %v7562_v5  ;;  %6791 = vmatpush3.msra.mxu0 %v7552_v2  ;;  %v1799_v46 = vsub.f32 %v7720_v59, %v10070_v55  ;;  %v1793_v28 = vand.u32 4294901760, %v1792_v45  ;;  %v10072_v55 = vand.u32 4294901760, %v7744_v15 }
  0xcc   : > { %6793 = vmatmul.mubr.f32.vlgmr.msra.gmra.mxu0 %v7524_v43  ;;  %6802 = vmatprep.subr.mxu0 %v7545_v62  ;;  %v7583_v10 = vand.u32 4294901760, %v645_v8  ;;  %v7734_v8 = vand.u32 4294901760, %v370_v49  ;;  %v1687_v11 = vsub.f32 %v7732_v3, %v10071_v19  ;;  %v10073_v19 = vand.u32 4294901760, %v7756_v21  ;;  %10087 = vst [vmem:[#allocation33_spill] sm:$0xff] %v7944_v63 }
  0xcd   : > { %6803 = vmatpush3.msra.mxu0 %v7545_v62  ;;  %6806 = vmatprep.mubr.msk.f32.mxu0 %vm512_vm1, %v7500_v24 }
  0xce   : > { %6783 = vmatprep.subr.mxu1 %v7583_v10  ;;  %6804 = vmatprep.subr.mxu0 %v7565_v6  ;;  %v7776_v51 = vsub.f32 %v370_v49, %v7734_v8  ;;  %v1667_v49 = vand.u32 4294901760, %v1666_v17  ;;  %v1806_v17 = vsub.f32 %v7744_v15, %v10072_v55  ;;  %v1688_v55 = vand.u32 4294901760, %v1687_v11 }
  0xcf   : > { %6784 = vmatpush3.msra.mxu1 %v7583_v10  ;;  %6805 = vmatpush3.msra.mxu0 %v7565_v6 }
  0xd0   : > { %6786 = vmatmul.mubr.msk.f32.vlgmr.msra.gmra.mxu1 %vm512_vm1, %v7504_v26  ;;  %6795 = vmatprep.subr.mxu1 %v7529_v54 }
  0xd1   : > { %6807 = vmatmul.mubr.msk.f32.vlgmr.msra.gmra.mxu0 %vm512_vm1, %v7504_v26  ;;  %6816 = vmatprep.subr.mxu0 %v7529_v54 }
  0xd2   : > { %6796 = vmatpush3.msra.mxu1 %v7529_v54  ;;  %6817 = vmatpush3.msra.mxu0 %v7529_v54 }
  0xd3   : > { %6797 = vmatprep.subr.mxu1 %v7540_v61  ;;  %6818 = vmatprep.subr.mxu0 %v7540_v61 }
  0xd4   : > { %6798 = vmatpush3.msra.mxu1 %v7540_v61  ;;  %6799 = vmatprep.mubr.f32.mxu1 %v7511_v29 }
  0xd5   : > { %6819 = vmatpush3.msra.mxu0 %v7540_v61  ;;  %6820 = vmatprep.mubr.f32.mxu0 %v7602_v13 }
  0xd6   : > { %6800 = vmatmul.mubr.f32.vlgmr.msra.gmra.mxu1 %v7527_v50  ;;  %6809 = vmatprep.subr.mxu1 %v7529_v54 }
  0xd7   : > { %6821 = vmatmul.mubr.f32.vlgmr.msra.gmra.mxu0 %v7608_v14  ;;  %6830 = vmatprep.subr.mxu0 %v7534_v58  ;;  %v365_v14 = vld [vmem:[%s9849_s5 + $0x28] sm:$0xff] }
  0xd8   : > { %6810 = vmatpush3.msra.mxu1 %v7529_v54  ;;  %6831 = vmatpush3.msra.mxu0 %v7534_v58 }
  0xd9   : > { %6811 = vmatprep.subr.mxu1 %v7540_v61  ;;  %6832 = vmatprep.subr.mxu0 %v7552_v2 }
  0xda   : > { %6812 = vmatpush3.msra.mxu1 %v7540_v61  ;;  %6813 = vmatprep.mubr.msk.f32.mxu1 %vm512_vm1, %v7500_v24 }
  0xdb   : > { %6833 = vmatpush3.msra.mxu0 %v7552_v2  ;;  %6834 = vmatprep.mubr.f32.mxu0 %v7549_v1 }
  0xdc   : > { %6814 = vmatmul.mubr.msk.f32.vlgmr.msra.gmra.mxu1 %vm512_vm1, %v7504_v26  ;;  %6823 = vmatprep.subr.mxu1 %v7562_v5 }
  0xdd   : > { %6835 = vmatmul.mubr.f32.vlgmr.msra.gmra.mxu0 %v7558_v4  ;;  %6844 = vmatprep.subr.mxu0 %v7545_v62 }
  0xde   : > { %6824 = vmatpush3.msra.mxu1 %v7562_v5  ;;  %6845 = vmatpush3.msra.mxu0 %v7545_v62 }
  0xdf   : > { %6825 = vmatprep.subr.mxu1 %v7583_v10  ;;  %6846 = vmatprep.subr.mxu0 %v7565_v6 }
  0xe0   : > { %6826 = vmatpush3.msra.mxu1 %v7583_v10  ;;  %6827 = vmatprep.mubr.msk.f32.mxu1 %vm512_vm1, %v7518_v37 }
  0xe1   : > { %6847 = vmatpush3.msra.mxu0 %v7565_v6  ;;  %6848 = vmatprep.mubr.msk.f32.mxu0 %vm512_vm1, %v7518_v37 }
  0xe2   : > { %6828 = vmatmul.mubr.msk.f32.vlgmr.msra.gmra.mxu1 %vm512_vm1, %v7520_v38  ;;  %6837 = vmatprep.subr.mxu1 %v7529_v54 }
  0xe3   : > { %6849 = vmatmul.mubr.msk.f32.vlgmr.msra.gmra.mxu0 %vm512_vm1, %v7520_v38  ;;  %6838 = vmatpush3.msra.mxu1 %v7529_v54 }
  0xe4   : > { %1636 = vmatprep.mubr.f32.mxu0 %v7583_v10  ;;  %6839 = vmatprep.subr.mxu1 %v7540_v61  ;;  %v7795_v10 = vsub.f32 %v369_v56, %v7758_v23 }
  0xe5   : > { %6840 = vmatpush3.msra.mxu1 %v7540_v61  ;;  %6841 = vmatprep.mubr.f32.mxu1 %v7570_v7  ;;  %v9867_v7 = vand.u32 4294901760, %v7785_v33 }
  0xe6   : > { %6842 = vmatmul.mubr.f32.vlgmr.msra.gmra.mxu1 %v7579_v9  ;;  %6851 = vmatprep.subr.mxu1 %v7529_v54  ;;  %v1674_v9 = vand.u32 4294901760, %v1673_v41  ;;  %v1681_v41 = vand.u32 4294901760, %v1680_v0  ;;  %v9866_v56 = vand.u32 4294901760, %v7795_v10  ;;  %v10075_v0 = vand.u32 4294901760, %v7776_v51 }
  0xe7   : > { %6852 = vmatpush3.msra.mxu1 %v7529_v54  ;;  %6855 = vmatprep.mubr.msk.f32.mxu1 %vm512_vm1, %v7518_v37  ;;  %v1694_v37 = vsub.f32 %v7756_v21, %v10073_v19  ;;  %v1807_v19 = vand.u32 4294901760, %v1806_v17 }
  0xe8   : > { %6853 = vmatprep.subr.mxu1 %v7540_v61  ;;  %6054 = vmatprep.subr.mxu0 %v7625_v18 }
  0xe9   : > { %6854 = vmatpush3.msra.mxu1 %v7540_v61  ;;  %6055 = vmatpush3.msra.mxu0 %v7632_v20 }
  0xea   : > { %6856 = vmatmul.mubr.msk.f32.vlgmr.msra.gmra.mxu1 %vm512_vm1, %v7520_v38  ;;  %6092 = vmatprep.subr.mxu1 %v1779_v57  ;;  %v1800_v38 = vand.u32 4294901760, %v1799_v46  ;;  %v10074_v57 = vand.u32 4294901760, %v7767_v36  ;;  %v1820_v46 = vsub.f32 %v7785_v33, %v9867_v7  ;;  %v381_v7 = vld [vmem:[%s9849_s5 + $0xa8] sm:$0xff] }
  0xeb   : > { %1887 = vmatprep.mubr.f32.mxu1 %v7540_v61  ;;  %6093 = vmatpush3.msra.mxu1 %v1667_v49  ;;  %v1701_v49 = vsub.f32 %v7776_v51, %v10075_v0  ;;  %v367_v0 = vld [vmem:[%s9849_s5 + $0x38] sm:$0xff]  ;;  %v7912_v29 = vand.u32 4294901760, %v381_v7 }
  0xec   : > { %6094 = vmatprep.subr.mxu1 %v1786_v12  ;;  %6056 = vmatprep.subr.mxu0 %v7639_v22  ;;  %v1813_v45 = vsub.f32 %v7767_v36, %v10074_v57  ;;  %v1695_v12 = vand.u32 4294901760, %v1694_v37 }
  0xed   : > { %6095 = vmatpush3.msra.mxu1 %v1674_v9  ;;  %6057 = vmatpush3.msra.mxu0 %v7646_v25  ;;  %v1708_v9 = vsub.f32 %v7795_v10, %v9866_v56  ;;  %v1702_v17 = vand.u32 4294901760, %v1701_v49 }
  0xee   : > { %6096 = vmatprep.subr.mxu1 %v1793_v28  ;;  %6058 = vmatprep.subr.mxu0 %v7657_v31  ;;  %v1814_v11 = vand.u32 4294901760, %v1813_v45  ;;  %v1821_v28 = vand.u32 4294901760, %v1820_v46 }
  0xef   : > { %6097 = vmatpush3.msra.mxu1 %v1681_v41  ;;  %6059 = vmatpush3.msra.mxu0 %v7667_v35  ;;  %v1709_v37 = vand.u32 4294901760, %v1708_v9  ;;  %v368_v41 = vld [vmem:[%s9849_s5 + $0x40] sm:$0xff]  ;;  %v382_v9 = vld [vmem:[%s9849_s5 + $0xb0] sm:$0xff] }
  0xf0   : > { %6098 = vmatprep.subr.mxu1 %v1800_v38  ;;  %6060 = vmatprep.subr.mxu0 %v7678_v40  ;;  %v384_v38 = vld [vmem:[%s9849_s5 + $0xc0] sm:$0xff]  ;;  %v7852_v45 = vand.u32 4294901760, %v368_v41 }
  0xf1   : > { %6099 = vmatpush3.msra.mxu1 %v1688_v55  ;;  %6061 = vmatpush3.msra.mxu0 %v7688_v44  ;;  %v7850_v57 = vand.u32 4294901760, %v384_v38  ;;  %v383_v55 = vld [vmem:[%s9849_s5 + $0xb8] sm:$0xff] }
  0xf2   : > { %6100 = vmatprep.subr.mxu1 %v1807_v19  ;;  %6062 = vmatprep.subr.mxu0 %v7699_v48  ;;  %v7864_v19 = vsub.f32 %v368_v41, %v7852_v45  ;;  %v7866_v46 = vand.u32 4294901760, %v383_v55  ;;  %v7887_v41 = vand.u32 4294901760, %v382_v9 }
  0xf3   : > { %6101 = vmatpush3.msra.mxu1 %v1695_v12  ;;  %6063 = vmatpush3.msra.mxu0 %v7710_v53  ;;  %v7861_v49 = vsub.f32 %v384_v38, %v7850_v57  ;;  %v7868_v12 = vand.u32 4294901760, %v367_v0  ;;  %v366_v38 = vld [vmem:[%s9849_s5 + $0x30] sm:$0xff] }
  0xf4   : > { %6102 = vmatprep.subr.mxu1 %v1814_v11  ;;  %6064 = vmatprep.subr.mxu0 %v7722_v60  ;;  %10077 = vst [vmem:[#allocation25_spill] sm:$0xff] %v7864_v19  ;;  %v7889_v56 = vand.u32 4294901760, %v366_v38  ;;  %v7907_v50 = vsub.f32 %v382_v9, %v7887_v41 }
  0xf5   : > { %6103 = vmatpush3.msra.mxu1 %v1702_v17  ;;  %6065 = vmatpush3.msra.mxu0 %v7734_v8  ;;  %10076 = vst [vmem:[#allocation24_spill] sm:$0xff] %v7861_v49  ;;  %v9874_v11 = vand.u32 4294901760, %v7861_v49  ;;  %v9875_v17 = vand.u32 4294901760, %v7864_v19 }
  0xf6   : > { %6104 = vmatprep.subr.mxu1 %v1821_v28  ;;  %6066 = vmatprep.subr.mxu0 %v7746_v16  ;;  %v7878_v28 = vsub.f32 %v383_v55, %v7866_v46  ;;  %10080 = vst [vmem:[#allocation28_spill] sm:$0xff] %v7907_v50  ;;  %v7910_v13 = vsub.f32 %v366_v38, %v7889_v56 }
  0xf7   : > { %6105 = vmatpush3.msra.mxu1 %v1709_v37  ;;  %6067 = vmatpush3.msra.mxu0 %v7758_v23  ;;  %v7881_v37 = vsub.f32 %v367_v0, %v7868_v12  ;;  %v1827_v55 = vsub.f32 %v7861_v49, %v9874_v11  ;;  %v1715_v0 = vsub.f32 %v7864_v19, %v9875_v17  ;;  %v7914_v11 = vand.u32 4294901760, %v365_v14  ;;  %v380_v17 = vld [vmem:[%s9849_s5 + $0xa0] sm:$0xff] }
  0xf8   : > { %6068 = vmatprep.subr.mxu0 %v7850_v57  ;;  %10078 = vst [vmem:[#allocation26_spill] sm:$0xff] %v7878_v28  ;;  %10081 = vst [vmem:[#allocation29_spill] sm:$0xff] %v7910_v13  ;;  %v10082_v26 = vand.u32 4294901760, %v7878_v28  ;;  %v7942_v58 = vand.u32 4294901760, %v380_v17  ;;  %v10089_v61 = vand.u32 4294901760, %v7910_v13 }
  0xf9   : > { %6069 = vmatpush3.msra.mxu0 %v7852_v45  ;;  %10079 = vst [vmem:[#allocation27_spill] sm:$0xff] %v7881_v37  ;;  %v1828_v1 = vand.u32 4294901760, %v1827_v55  ;;  %v1716_v4 = vand.u32 4294901760, %v1715_v0  ;;  %v10083_v43 = vand.u32 4294901760, %v7881_v37  ;;  %v7933_v55 = vsub.f32 %v381_v7, %v7912_v29  ;;  %v363_v7 = vld [vmem:[%s9849_s5 + $0x18] sm:$0xff] }
  0xfa   : > { %6070 = vmatprep.subr.mxu0 %v7866_v46  ;;  %v1834_v9 = vsub.f32 %v7878_v28, %v10082_v26  ;;  %v7936_v0 = vsub.f32 %v365_v14, %v7914_v11  ;;  %v379_v26 = vld [vmem:[%s9849_s5 + $0x98] sm:$0xff]  ;;  %10086 = vst [vmem:[#allocation32_spill] sm:$0xff] %v7942_v58  ;;  %v10088_v14 = vand.u32 4294901760, %v7907_v50  ;;  %v7959_v62 = vsub.f32 %v380_v17, %v7942_v58 }
  0xfb   : > { %6071 = vmatpush3.msra.mxu0 %v7868_v12  ;;  %v1722_v38 = vsub.f32 %v7881_v37, %v10083_v43  ;;  %10084 = vst [vmem:[#allocation30_spill] sm:$0xff] %v7933_v55  ;;  %6106 = vmatprep.subr.mxu1 %v1828_v1  ;;  %v1729_v1 = vsub.f32 %v7910_v13, %v10089_v61  ;;  %v7966_v28 = vand.u32 4294901760, %v363_v7  ;;  %v362_v61 = vld [vmem:[%s9849_s5 + $0x10] sm:$0xff] }
  0xfc   : > { %6072 = vmatprep.subr.mxu0 %v7887_v41  ;;  %10085 = vst [vmem:[#allocation31_spill] sm:$0xff] %v7936_v0  ;;  %v1835_v43 = vand.u32 4294901760, %v1834_v9  ;;  %6107 = vmatpush3.msra.mxu1 %v1716_v4  ;;  %v1841_v32 = vsub.f32 %v7907_v50, %v10088_v14  ;;  %v9901_v9 = vand.u32 4294901760, %v7933_v55  ;;  %10090 = vst [vmem:[#allocation34_spill] sm:$0xff] %v7959_v62  ;;  %v7964_v4 = vand.u32 4294901760, %v379_v26  ;;  %v378_v14 = vld [vmem:[%s9849_s5 + $0x90] sm:$0xff] }
  0xfd   : > { %6073 = vmatpush3.msra.mxu0 %v7889_v56  ;;  %v1723_v24 = vand.u32 4294901760, %v1722_v38  ;;  %v9900_v38 = vand.u32 4294901760, %v7936_v0  ;;  %v7962_v37 = vsub.f32 %v364_v27, %v7944_v63  ;;  %10093 = vst [vmem:[#allocation37_spill] sm:$0xff] %v7966_v28  ;;  %v9910_v50 = vand.u32 4294901760, %v7959_v62 }
  0xfe   : > { %6074 = vmatprep.subr.mxu0 %v7912_v29  ;;  %6108 = vmatprep.subr.mxu1 %v1835_v43  ;;  %10092 = vst [vmem:[#allocation36_spill] sm:$0xff] %v7964_v4  ;;  %v1842_v17 = vand.u32 4294901760, %v1841_v32  ;;  %v1730_v43 = vand.u32 4294901760, %v1729_v1  ;;  %v1848_v27 = vsub.f32 %v7933_v55, %v9901_v9  ;;  %v7985_v49 = vsub.f32 %v379_v26, %v7964_v4  ;;  %v377_v32 = vld [vmem:[%s9849_s5 + $0x88] sm:$0xff] }
  0xff   : > { %6075 = vmatpush3.msra.mxu0 %v7914_v11  ;;  %10091 = vst [vmem:[#allocation35_spill] sm:$0xff] %v7962_v37  ;;  %6109 = vmatpush3.msra.mxu1 %v1723_v24  ;;  %v1736_v13 = vsub.f32 %v7936_v0, %v9900_v38  ;;  %v7988_v24 = vsub.f32 %v363_v7, %v7966_v28  ;;  %v361_v1 = vld [vmem:[%s9849_s5 + $0x8] sm:$0xff]  ;;  %v7997_v19 = vand.u32 4294901760, %v378_v14  ;;  %v7999_v26 = vand.u32 4294901760, %v362_v61 }
 0x100   : > { %6076 = vmatprep.subr.mxu0 %v7942_v58  ;;  %10094 = vst [vmem:[#allocation38_spill] sm:$0xff] %v7985_v49  ;;  %6110 = vmatprep.subr.mxu1 %v1842_v17  ;;  %v1849_v38 = vand.u32 4294901760, %v1848_v27  ;;  %v1855_v7 = vsub.f32 %v7959_v62, %v9910_v50  ;;  %v10096_v0 = vand.u32 4294901760, %v7962_v37  ;;  %v376_v50 = vld [vmem:[%s9849_s5 + $0x80] sm:$0xff] }
 0x101   : > { %6077 = vmatpush3.msra.mxu0 %v7944_v63  ;;  %10095 = vst [vmem:[#allocation39_spill] sm:$0xff] %v7988_v24  ;;  %v1737_v9 = vand.u32 4294901760, %v1736_v13  ;;  %6111 = vmatpush3.msra.mxu1 %v1730_v43  ;;  %v9920_v17 = vand.u32 4294901760, %v7988_v24  ;;  %v8011_v13 = vsub.f32 %v378_v14, %v7997_v19  ;;  %v8014_v27 = vsub.f32 %v362_v61, %v7999_v26 }
 0x102   : > { %6078 = vmatprep.subr.mxu0 %v7964_v4  ;;  %v1743_v55 = vsub.f32 %v7962_v37, %v10096_v0  ;;  %v9919_v4 = vand.u32 4294901760, %v7985_v49  ;;  %6112 = vmatprep.subr.mxu1 %v1849_v38  ;;  %v8016_v43 = vand.u32 4294901760, %v377_v32  ;;  %v360_v0 = vld [vmem:[%s9849_s5] sm:$0xff]  ;;  %v1856_v38 = vand.u32 4294901760, %v1855_v7 }
 0x103   : > { %6079 = vmatpush3.msra.mxu0 %v7966_v28  ;;  %10097 = vst [vmem:[#allocation40_spill] sm:$0xff] %v8011_v13  ;;  %10098 = vst [vmem:[#allocation41_spill] sm:$0xff] %v8014_v27  ;;  %v8018_v28 = vand.u32 4294901760, %v361_v1  ;;  %6113 = vmatpush3.msra.mxu1 %v1737_v9  ;;  %v1750_v37 = vsub.f32 %v7988_v24, %v9920_v17  ;;  %v9923_v62 = vand.u32 4294901760, %v8011_v13  ;;  %v9924_v63 = vand.u32 4294901760, %v8014_v27 }
 0x104   : > { %6080 = vmatprep.subr.mxu0 %v7997_v19  ;;  %v1744_v14 = vand.u32 4294901760, %v1743_v55  ;;  %v1862_v61 = vsub.f32 %v7985_v49, %v9919_v4  ;;  %v8037_v58 = vsub.f32 %v377_v32, %v8016_v43  ;;  %6114 = vmatprep.subr.mxu1 %v1856_v38  ;;  %v8043_v4 = vand.u32 4294901760, %v376_v50 }
 0x105   : > { %10099 = vst [vmem:[#allocation42_spill] sm:$0xff] %v8018_v28  ;;  %6081 = vmatpush3.msra.mxu0 %v7999_v26  ;;  %v8040_v9 = vsub.f32 %v361_v1, %v8018_v28  ;;  %v1751_v7 = vand.u32 4294901760, %v1750_v37  ;;  %v8045_v17 = vand.u32 4294901760, %v360_v0  ;;  %v1869_v32 = vsub.f32 %v8011_v13, %v9923_v62 }
 0x106   : > { %10100 = vst [vmem:[#allocation43_spill] sm:$0xff] %v8037_v58  ;;  %6082 = vmatprep.subr.mxu0 %v8016_v43  ;;  %v1863_v55 = vand.u32 4294901760, %v1862_v61  ;;  %10102 = vst [vmem:[#allocation45_spill] sm:$0xff] %v8043_v4  ;;  %6115 = vmatpush3.msra.mxu1 %v1744_v14  ;;  %v1757_v1 = vsub.f32 %v8014_v27, %v9924_v63  ;;  %v9928_v24 = vand.u32 4294901760, %v8037_v58 }
 0x107   : > { %10101 = vst [vmem:[#allocation44_spill] sm:$0xff] %v8040_v9  ;;  %10103 = vst [vmem:[#allocation46_spill] sm:$0xff] %v8045_v17  ;;  %6083 = vmatpush3.msra.mxu0 %v8018_v28  ;;  %v9927_v38 = vand.u32 4294901760, %v8040_v9  ;;  %v8057_v37 = vsub.f32 %v376_v50, %v8043_v4  ;;  %v8060_v61 = vsub.f32 %v360_v0, %v8045_v17  ;;  %v1870_v14 = vand.u32 4294901760, %v1869_v32 }
 0x108   : > { %6116 = vmatprep.subr.mxu1 %v1863_v55  ;;  %6084 = vmatprep.subr.mxu0 %v8043_v4  ;;  %v1758_v62 = vand.u32 4294901760, %v1757_v1  ;;  %v1876_v63 = vsub.f32 %v8037_v58, %v9928_v24 }
 0x109   : > { %10104 = vst [vmem:[#allocation47_spill] sm:$0xff] %v8057_v37  ;;  %10105 = vst [vmem:[#allocation48_spill] sm:$0xff] %v8060_v61  ;;  %6117 = vmatpush3.msra.mxu1 %v1751_v7  ;;  %v1764_v27 = vsub.f32 %v8040_v9, %v9927_v38  ;;  %6085 = vmatpush3.msra.mxu0 %v8045_v17  ;;  %v9934_v50 = vand.u32 4294901760, %v8057_v37  ;;  %v9941_v0 = vand.u32 4294901760, %v8060_v61 }
 0x10a   : > { %6130 = vmatprep.subr.mxu0 %v7655_v30  ;;  %6118 = vmatprep.subr.mxu1 %v1870_v14  ;;  %v1877_v55 = vand.u32 4294901760, %v1876_v63 }
 0x10b   : > { %v1765_v7 = vand.u32 4294901760, %v1764_v27  ;;  %6119 = vmatpush3.msra.mxu1 %v1758_v62  ;;  %v1883_v32 = vsub.f32 %v8057_v37, %v9934_v50  ;;  %v1771_v1 = vsub.f32 %v8060_v61, %v9941_v0 }
 0x10c   : > { %6120 = vmatprep.subr.mxu1 %v1877_v55 }
 0x10d   : > { %6121 = vmatpush3.msra.mxu1 %v1765_v7  ;;  %v1884_v38 = vand.u32 4294901760, %v1883_v32  ;;  %v1772_v24 = vand.u32 4294901760, %v1771_v1 }
 0x10f   : > { %6122 = vmatprep.subr.mxu1 %v1884_v38 }
 0x110   : > { %6123 = vmatpush3.msra.mxu1 %v1772_v24 }
 0x111   : > { %6168 = vmatprep.subr.mxu1 %v7625_v18 }
 0x188   : > { %v6780_v14 = vpop.f32.mrf.mxu0 }
 0x18a   : > { %v592_v63 = vpop.f32.mrf.mxu0 }
 0x18c   : > { %v6794_v27 = vpop.f32.mrf.mxu0 }
 0x18e   : > { %v765_v58 = vpop.f32.mrf.mxu0 }
 0x190   : > { %v6787_v62 = vpop.f32.mrf.mxu1 }
 0x191   : > { %v690_v30 = vadd.f32 %v6787_v62, %v6780_v14  ;;  %v6808_v0 = vpop.f32.mrf.mxu0  ;;  %v10117_v62 = vld [vmem:[#allocation29_spill] sm:$0xff] }
 0x192   : > { %v683_v9 = vpop.f32.mrf.mxu1 }
 0x193   : > { %v773_v50 = vadd.f32 %v6794_v27, %v690_v30  ;;  %v684_v37 = vadd.f32 %v683_v9, %v592_v63  ;;  %v932_v38 = vpop.f32.mrf.mxu0  ;;  %v10110_v9 = vld [vmem:[#allocation25_spill] sm:$0xff]  ;;  %v10116_v27 = vld [vmem:[#allocation28_spill] sm:$0xff] }
 0x194   : > { %v10115_v63 = vld [vmem:[#allocation37_spill] sm:$0xff] }
 0x195   : > { %v766_v13 = vadd.f32 %v765_v58, %v684_v37  ;;  %v10111_v37 = vld [vmem:[#allocation33_spill] sm:$0xff] }
 0x196   : > { %v6801_v49 = vpop.f32.mrf.mxu1 }
 0x197   : > { %v856_v55 = vadd.f32 %v6801_v49, %v773_v50  ;;  %v10113_v50 = vld [vmem:[#allocation36_spill] sm:$0xff] }
 0x198   : > { %v847_v7 = vpop.f32.mrf.mxu1 }
 0x199   : > { %v939_v32 = vadd.f32 %v6808_v0, %v856_v55  ;;  %v848_v1 = vadd.f32 %v847_v7, %v766_v13  ;;  %v10114_v0 = vld [vmem:[#allocation27_spill] sm:$0xff]  ;;  %v10118_v55 = vld [vmem:[#allocation30_spill] sm:$0xff] }
 0x19a   : > { %v10119_v7 = vld [vmem:[#allocation31_spill] sm:$0xff] }
 0x19b   : > { %v933_v24 = vadd.f32 %v932_v38, %v848_v1  ;;  %v10121_v1 = vld [vmem:[#allocation34_spill] sm:$0xff]  ;;  %v10122_v38 = vld [vmem:[#allocation45_spill] sm:$0xff] }
 0x19c   : > { %v6815_v61 = vpop.f32.mrf.mxu1 }
 0x19d   : > { %v1018_v18 = vadd.f32 %v6815_v61, %v939_v32  ;;  %v10112_v61 = vld [vmem:[#allocation26_spill] sm:$0xff] }
 0x19e   : > { %v1011_v17 = vpop.f32.mrf.mxu1  ;;  %v10120_v32 = vld [vmem:[#allocation42_spill] sm:$0xff] }
 0x19f   : > { %v8080_v4 = vand.u32 4294901760, %v1018_v18  ;;  %v1012_v28 = vadd.f32 %v1011_v17, %v933_v24  ;;  %v10123_v24 = vld [vmem:[#allocation35_spill] sm:$0xff] }
 0x1a1   : > { %10106 = vst [vmem:[#allocation49_spill] sm:$0xff] %v8080_v4  ;;  %v8082_v14 = vand.u32 4294901760, %v1012_v28  ;;  %v8085_v30 = vsub.f32 %v1018_v18, %v8080_v4 }
 0x1a3   : > { %10107 = vst [vmem:[#allocation50_spill] sm:$0xff] %v8082_v14  ;;  %v8088_v58 = vsub.f32 %v1012_v28, %v8082_v14  ;;  %1889 = vmatmul.mubr.f32.vlgmr.msra.gmra.mxu1 %v8082_v14  ;;  %v9951_v17 = vand.u32 4294901760, %v8085_v30  ;;  %v10131_v14 = vld [vmem:[#allocation43_spill] sm:$0xff] }
 0x1a4   : > { %6169 = vmatpush3.msra.mxu1 %v7632_v20  ;;  %1894 = vmatprep.mubr.f32.mxu1 %v7529_v54  ;;  %v10130_v54 = vld [vmem:[#allocation41_spill] sm:$0xff] }
 0x1a5   : > { %v1639_v49 = vand.u32 4294901760, %v8088_v58  ;;  %6170 = vmatprep.subr.mxu1 %v7639_v22  ;;  %v1655_v13 = vsub.f32 %v8085_v30, %v9951_v17  ;;  %v10128_v17 = vld [vmem:[#allocation15_spill] sm:$0xff] }
 0x1a6   : > { %6171 = vmatpush3.msra.mxu1 %v7646_v25 }
 0x1a7   : > { %v1640_v18 = vsub.f32 %v8088_v58, %v1639_v49  ;;  %6172 = vmatprep.subr.mxu1 %v7657_v31  ;;  %1896 = vmatmul.mubr.f32.gmra.mxu1 %v8080_v4  ;;  %v10129_v4 = vld [vmem:[#allocation40_spill] sm:$0xff] }
 0x1a8   : > { %6173 = vmatpush3.msra.mxu1 %v7667_v35  ;;  %2147 = vmatprep.mubr.f32.mxu1 %v7565_v6  ;;  %v1656_v6 = vand.u32 4294901760, %v1655_v13  ;;  %v10126_v13 = vld [vmem:[#allocation22_spill] sm:$0xff] }
 0x1a9   : > { %6174 = vmatprep.subr.mxu1 %v7678_v40  ;;  %v1641_v28 = vand.u32 4294901760, %v1640_v18  ;;  %v10124_v18 = vld [vmem:[#allocation46_spill] sm:$0xff] }
 0x1aa   : > { %6175 = vmatpush3.msra.mxu1 %v7688_v44 }
 0x1ab   : > { %6176 = vmatprep.subr.mxu1 %v7699_v48  ;;  %1642 = vmatmul.mubr.f32.vlgmr.msra.gmra.mxu0 %v1641_v28  ;;  %v10125_v28 = vld [vmem:[#allocation38_spill] sm:$0xff] }
 0x1ac   : > { %6131 = vmatpush3.msra.mxu0 %v7665_v34  ;;  %6177 = vmatpush3.msra.mxu1 %v7710_v53 }
 0x1ad   : > { %1651 = vmatprep.mubr.f32.mxu0 %v7562_v5  ;;  %6132 = vmatprep.subr.mxu0 %v7676_v39  ;;  %v10109_v5 = vld [vmem:[#allocation32_spill] sm:$0xff] }
 0x1ae   : > { %6178 = vmatprep.subr.mxu1 %v7722_v60  ;;  %6133 = vmatpush3.msra.mxu0 %v7686_v42 }
 0x1af   : > { %6179 = vmatpush3.msra.mxu1 %v7734_v8  ;;  %6134 = vmatprep.subr.mxu0 %v7697_v47 }
 0x1b0   : > { %6180 = vmatprep.subr.mxu1 %v7746_v16  ;;  %1657 = vmatmul.mubr.f32.gmra.mxu0 %v1656_v6  ;;  %v10127_v6 = vld [vmem:[#allocation39_spill] sm:$0xff] }
 0x1b1   : > { %6135 = vmatpush3.msra.mxu0 %v7708_v52  ;;  %6181 = vmatpush3.msra.mxu1 %v7758_v23 }
 0x1b2   : > { %6136 = vmatprep.subr.mxu0 %v7720_v59  ;;  %2031 = vmatprep.mubr.f32.mxu0 %v7552_v2  ;;  %v10108_v2 = vld [vmem:[#allocation24_spill] sm:$0xff] }
 0x1b3   : > { %6182 = vmatprep.subr.mxu1 %v7850_v57  ;;  %6137 = vmatpush3.msra.mxu0 %v7732_v3 }
 0x1b4   : > { %6183 = vmatpush3.msra.mxu1 %v7852_v45  ;;  %6138 = vmatprep.subr.mxu0 %v7744_v15 }
 0x1b5   : > { %6184 = vmatprep.subr.mxu1 %v7866_v46  ;;  %6139 = vmatpush3.msra.mxu0 %v7756_v21 }
 0x1b6   : > { %6185 = vmatpush3.msra.mxu1 %v7868_v12  ;;  %6140 = vmatprep.subr.mxu0 %v7767_v36 }
 0x1b7   : > { %6186 = vmatprep.subr.mxu1 %v7887_v41  ;;  %6141 = vmatpush3.msra.mxu0 %v7776_v51 }
 0x1b8   : > { %6187 = vmatpush3.msra.mxu1 %v7889_v56  ;;  %6142 = vmatprep.subr.mxu0 %v7785_v33 }
 0x1b9   : > { %6188 = vmatprep.subr.mxu1 %v7912_v29  ;;  %6143 = vmatpush3.msra.mxu0 %v7795_v10 }
 0x1ba   : > { %6189 = vmatpush3.msra.mxu1 %v7914_v11  ;;  %6144 = vmatprep.subr.mxu0 %v10108_v2 }
 0x1bb   : > { %6190 = vmatprep.subr.mxu1 %v10109_v5  ;;  %6145 = vmatpush3.msra.mxu0 %v10110_v9 }
 0x1bc   : > { %6191 = vmatpush3.msra.mxu1 %v10111_v37  ;;  %6146 = vmatprep.subr.mxu0 %v10112_v61 }
 0x1bd   : > { %6192 = vmatprep.subr.mxu1 %v10113_v50  ;;  %6147 = vmatpush3.msra.mxu0 %v10114_v0 }
 0x1be   : > { %6193 = vmatpush3.msra.mxu1 %v10115_v63  ;;  %6148 = vmatprep.subr.mxu0 %v10116_v27 }
 0x1bf   : > { %6194 = vmatprep.subr.mxu1 %v7997_v19  ;;  %6149 = vmatpush3.msra.mxu0 %v10117_v62 }
 0x1c0   : > { %6195 = vmatpush3.msra.mxu1 %v7999_v26  ;;  %6150 = vmatprep.subr.mxu0 %v10118_v55 }
 0x1c1   : > { %6196 = vmatprep.subr.mxu1 %v8016_v43  ;;  %6151 = vmatpush3.msra.mxu0 %v10119_v7 }
 0x1c2   : > { %6197 = vmatpush3.msra.mxu1 %v10120_v32  ;;  %6152 = vmatprep.subr.mxu0 %v10121_v1 }
 0x1c3   : > { %6198 = vmatprep.subr.mxu1 %v10122_v38  ;;  %6153 = vmatpush3.msra.mxu0 %v10123_v24 }
 0x1c4   : > { %6199 = vmatpush3.msra.mxu1 %v10124_v18  ;;  %6154 = vmatprep.subr.mxu0 %v10125_v28 }
 0x1c5   : > { %2151 = vmatmul.mubr.f32.vlgmr.msra.gmra.mxu1 %v1639_v49  ;;  %6244 = vmatprep.subr.mxu1 %v10126_v13  ;;  %v10132_v49 = vand.u32 4294901760, %v8085_v30  ;;  %v10133_v13 = vld [vmem:[#allocation44_spill] sm:$0xff] }
 0x1c6   : > { %6155 = vmatpush3.msra.mxu0 %v10127_v6  ;;  %2158 = vmatprep.mubr.f32.mxu1 %v10128_v17  ;;  %v10135_v17 = vld [vmem:[#allocation47_spill] sm:$0xff] }
 0x1c7   : > { %6245 = vmatpush3.msra.mxu1 %v7632_v20  ;;  %6156 = vmatprep.subr.mxu0 %v10129_v4  ;;  %v10134_v20 = vld [vmem:[#allocation13_spill] sm:$0xff] }
 0x1c8   : > { %6246 = vmatprep.subr.mxu1 %v7639_v22  ;;  %6157 = vmatpush3.msra.mxu0 %v10130_v54  ;;  %v10136_v22 = vld [vmem:[#allocation48_spill] sm:$0xff] }
 0x1c9   : > { %6247 = vmatpush3.msra.mxu1 %v7646_v25  ;;  %6158 = vmatprep.subr.mxu0 %v10131_v14  ;;  %v10137_v25 = vld [vmem:[#allocation23_spill] sm:$0xff] }
 0x1ca   : > { %2162 = vmatmul.mubr.f32.gmra.mxu1 %v10132_v49  ;;  %6248 = vmatprep.subr.mxu1 %v7657_v31  ;;  %v10138_v49 = vand.u32 4294901760, %v10137_v25  ;;  %v10139_v31 = vld [vmem:[#allocation12_spill] sm:$0xff] }
 0x1cb   : > { %6159 = vmatpush3.msra.mxu0 %v10133_v13  ;;  %6249 = vmatpush3.msra.mxu1 %v7667_v35  ;;  %v10140_v35 = vand.u32 4294901760, %v7665_v34  ;;  %v10143_v34 = vand.u32 4294901760, %v7697_v47  ;;  %v10146_v47 = vand.u32 4294901760, %v7732_v3  ;;  %v404_v3 = vld [vmem:[%s9849_s5 + $0x160] sm:$0xff] }
 0x1cc   : > { %2439 = vmatprep.mubr.f32.mxu1 %v10134_v20  ;;  %6160 = vmatprep.subr.mxu0 %v10135_v17 }
 0x1cd   : > { %6250 = vmatprep.subr.mxu1 %v7678_v40  ;;  %6161 = vmatpush3.msra.mxu0 %v10136_v22  ;;  %v10141_v40 = vand.u32 4294901760, %v7676_v39  ;;  %v10144_v39 = vand.u32 4294901760, %v7708_v52  ;;  %v405_v52 = vld [vmem:[%s9849_s5 + $0x168] sm:$0xff] }
 0x1ce   : > { %6251 = vmatpush3.msra.mxu1 %v7688_v44  ;;  %2034 = vmatmul.mubr.f32.vlgmr.msra.gmra.mxu0 %v8088_v58  ;;  %v10142_v44 = vand.u32 4294901760, %v7686_v42  ;;  %v407_v58 = vld [vmem:[%s9849_s5 + $0x178] sm:$0xff] }
 0x1cf   : > { %6206 = vmatprep.subr.mxu0 %v10138_v49  ;;  %6252 = vmatprep.subr.mxu1 %v7699_v48  ;;  %v8204_v42 = vand.u32 4294901760, %v407_v58  ;;  %v406_v48 = vld [vmem:[%s9849_s5 + $0x170] sm:$0xff] }
 0x1d0   : > { %2040 = vmatprep.mubr.f32.mxu0 %v10139_v31  ;;  %6207 = vmatpush3.msra.mxu0 %v10140_v35 }
 0x1d1   : > { %6253 = vmatpush3.msra.mxu1 %v7710_v53  ;;  %6208 = vmatprep.subr.mxu0 %v10141_v40  ;;  %v10145_v53 = vand.u32 4294901760, %v7720_v59  ;;  %v10148_v59 = vand.u32 4294901760, %v7756_v21  ;;  %v10150_v21 = vand.u32 4294901760, %v7776_v51  ;;  %v10157_v40 = vand.u32 4294901760, %v10116_v27 }
 0x1d2   : > { %6254 = vmatprep.subr.mxu1 %v7722_v60  ;;  %6209 = vmatpush3.msra.mxu0 %v10142_v44  ;;  %v10147_v60 = vand.u32 4294901760, %v7744_v15  ;;  %v10149_v15 = vand.u32 4294901760, %v7767_v36  ;;  %v403_v36 = vld [vmem:[%s9849_s5 + $0x158] sm:$0xff] }
 0x1d3   : > { %6255 = vmatpush3.msra.mxu1 %v7734_v8  ;;  %2043 = vmatmul.mubr.f32.gmra.mxu0 %v8085_v30  ;;  %v8221_v8 = vand.u32 4294901760, %v406_v48  ;;  %v8248_v30 = vand.u32 4294901760, %v404_v3  ;;  %v8273_v25 = vand.u32 4294901760, %v403_v36 }
 0x1d4   : > { %6210 = vmatprep.subr.mxu0 %v10143_v34  ;;  %6256 = vmatprep.subr.mxu1 %v7746_v16  ;;  %v8227_v16 = vsub.f32 %v407_v58, %v8204_v42 }
 0x1d5   : > { %6211 = vmatpush3.msra.mxu0 %v10144_v39  ;;  %2328 = vmatprep.mubr.f32.mxu0 %v10134_v20  ;;  %v8282_v49 = vsub.f32 %v404_v3, %v8248_v30  ;;  %v8309_v58 = vsub.f32 %v403_v36, %v8273_v25 }
 0x1d6   : > { %6257 = vmatpush3.msra.mxu1 %v7758_v23  ;;  %6212 = vmatprep.subr.mxu0 %v10145_v53  ;;  %v8232_v23 = vpop.f32.mrf.mxu0  ;;  %v8257_v51 = vand.u32 4294901760, %v8227_v16 }
 0x1d7   : > { %6258 = vmatprep.subr.mxu1 %v7850_v57  ;;  %6213 = vmatpush3.msra.mxu0 %v10146_v47  ;;  %v8237_v57 = vand.u32 4294901760, %v405_v52  ;;  %v8319_v39 = vand.u32 4294901760, %v8282_v49 }
 0x1d8   : > { %6259 = vmatpush3.msra.mxu1 %v7852_v45  ;;  %6214 = vmatprep.subr.mxu0 %v10147_v60  ;;  %v10151_v45 = vand.u32 4294901760, %v7785_v33  ;;  %v8259_v33 = vpop.f32.mrf.mxu1  ;;  %v10161_v60 = vand.u32 4294901760, %v10121_v1  ;;  %v10163_v1 = vand.u32 4294901760, %v10125_v28  ;;  %v10165_v28 = vand.u32 4294901760, %v10127_v6  ;;  %v396_v6 = vld [vmem:[%s9849_s5 + $0x120] sm:$0xff] }
 0x1d9   : > { %6260 = vmatprep.subr.mxu1 %v7866_v46  ;;  %6215 = vmatpush3.msra.mxu0 %v10148_v59  ;;  %v8246_v46 = vsub.f32 %v406_v48, %v8221_v8  ;;  %v8265_v20 = vsub.f32 %v405_v52, %v8237_v57  ;;  %v10160_v48 = vand.u32 4294901760, %v10119_v7  ;;  %v10162_v7 = vand.u32 4294901760, %v10123_v24 }
 0x1da   : > { %6261 = vmatpush3.msra.mxu1 %v7868_v12  ;;  %6216 = vmatprep.subr.mxu0 %v10149_v15  ;;  %v10152_v12 = vand.u32 4294901760, %v7795_v10  ;;  %v10154_v10 = vand.u32 4294901760, %v10110_v9  ;;  %v10156_v9 = vand.u32 4294901760, %v10114_v0  ;;  %v1191_v31 = vpop.f32.mrf.mxu1  ;;  %v10158_v0 = vand.u32 4294901760, %v10117_v62  ;;  %v399_v62 = vld [vmem:[%s9849_s5 + $0x138] sm:$0xff] }
 0x1db   : > { %6262 = vmatprep.subr.mxu1 %v7887_v41  ;;  %6217 = vmatpush3.msra.mxu0 %v10150_v21  ;;  %v10153_v41 = vand.u32 4294901760, %v10108_v2  ;;  %v8279_v2 = vand.u32 4294901760, %v8246_v46  ;;  %v8300_v44 = vand.u32 4294901760, %v8265_v20  ;;  %v8343_v59 = vand.u32 4294901760, %v8309_v58 }
 0x1dc   : > { %6263 = vmatpush3.msra.mxu1 %v7889_v56  ;;  %6218 = vmatprep.subr.mxu0 %v10151_v45  ;;  %v1100_v56 = vpop.f32.mrf.mxu0  ;;  %v8330_v47 = vpop.f32.mrf.mxu1  ;;  %v8348_v15 = vand.u32 4294901760, %v399_v62  ;;  %v2579_v24 = vsub.f32 %v8282_v49, %v8319_v39  ;;  %v10164_v45 = vld [vmem:[#allocation50_spill] sm:$0xff] }
 0x1dd   : > { %6264 = vmatprep.subr.mxu1 %v7912_v29  ;;  %6219 = vmatpush3.msra.mxu0 %v10152_v12  ;;  %v402_v29 = vld [vmem:[%s9849_s5 + $0x150] sm:$0xff]  ;;  %v2565_v27 = vsub.f32 %v8246_v46, %v8279_v2 }
 0x1de   : > { %6265 = vmatpush3.msra.mxu1 %v7914_v11  ;;  %6220 = vmatprep.subr.mxu0 %v10153_v41  ;;  %v10155_v11 = vand.u32 4294901760, %v10112_v61  ;;  %v8292_v61 = vand.u32 4294901760, %v402_v29  ;;  %v8294_v35 = vpop.f32.mrf.mxu0 }
 0x1df   : > { %6266 = vmatprep.subr.mxu1 %v10109_v5  ;;  %6221 = vmatpush3.msra.mxu0 %v10154_v10  ;;  %v401_v5 = vld [vmem:[%s9849_s5 + $0x148] sm:$0xff] }
 0x1e0   : > { %6267 = vmatpush3.msra.mxu1 %v10111_v37  ;;  %6222 = vmatprep.subr.mxu0 %v10155_v11  ;;  %v2558_v37 = vsub.f32 %v8227_v16, %v8257_v51  ;;  %v8311_v34 = vand.u32 4294901760, %v401_v5  ;;  %v1273_v53 = vpop.f32.mrf.mxu0 }
 0x1e1   : > { %6268 = vmatprep.subr.mxu1 %v10113_v50  ;;  %6223 = vmatpush3.msra.mxu0 %v10156_v9  ;;  %v400_v50 = vld [vmem:[%s9849_s5 + $0x140] sm:$0xff]  ;;  %v2586_v9 = vsub.f32 %v8309_v58, %v8343_v59 }
 0x1e2   : > { %6269 = vmatpush3.msra.mxu1 %v10115_v63  ;;  %6224 = vmatprep.subr.mxu0 %v10157_v40  ;;  %v10159_v63 = vand.u32 4294901760, %v10118_v55  ;;  %v8328_v55 = vsub.f32 %v402_v29, %v8292_v61  ;;  %v8332_v52 = vand.u32 4294901760, %v400_v50  ;;  %v8346_v3 = vsub.f32 %v401_v5, %v8311_v34  ;;  %v8365_v41 = vpop.f32.mrf.mxu0  ;;  %v10166_v29 = vld [vmem:[#allocation11_spill] sm:$0xff] }
 0x1e3   : > { %6270 = vmatprep.subr.mxu1 %v7997_v19  ;;  %6225 = vmatpush3.msra.mxu0 %v10158_v0  ;;  %v1192_v19 = vadd.f32 %v1191_v31, %v1100_v56  ;;  %v1355_v56 = vpop.f32.mrf.mxu1  ;;  %v10167_v5 = vand.u32 4294901760, %v10129_v4  ;;  %v8383_v31 = vsub.f32 %v399_v62, %v8348_v15  ;;  %v10168_v40 = vand.u32 4294901760, %v10130_v54  ;;  %v395_v54 = vld [vmem:[%s9849_s5 + $0x118] sm:$0xff] }
 0x1e4   : > { %6271 = vmatpush3.msra.mxu1 %v7999_v26  ;;  %6226 = vmatprep.subr.mxu0 %v10159_v63  ;;  %v2559_v26 = vand.u32 4294901760, %v2558_v37  ;;  %v8360_v36 = vand.u32 4294901760, %v8328_v55  ;;  %v8363_v12 = vsub.f32 %v400_v50, %v8332_v52  ;;  %v8380_v37 = vand.u32 4294901760, %v8346_v3  ;;  %v1440_v62 = vpop.f32.mrf.mxu0 }
 0x1e5   : > { %6272 = vmatprep.subr.mxu1 %v8016_v43  ;;  %6227 = vmatpush3.msra.mxu0 %v10160_v48  ;;  %v2572_v43 = vsub.f32 %v8265_v20, %v8300_v44  ;;  %v1274_v21 = vadd.f32 %v1273_v53, %v1192_v19  ;;  %v2580_v50 = vand.u32 4294901760, %v2579_v24  ;;  %v10169_v63 = vand.u32 4294901760, %v10131_v14  ;;  %v8399_v48 = vpop.f32.mrf.mxu1 }
 0x1e6   : > { %6273 = vmatpush3.msra.mxu1 %v10120_v32  ;;  %6228 = vmatprep.subr.mxu0 %v10161_v60  ;;  %v398_v32 = vld [vmem:[%s9849_s5 + $0x130] sm:$0xff]  ;;  %v8397_v19 = vand.u32 4294901760, %v8363_v12  ;;  %v8408_v14 = vand.u32 4294901760, %v396_v6  ;;  %v10171_v60 = vand.u32 4294901760, %v10133_v13  ;;  %v10172_v24 = vand.u32 4294901760, %v10135_v17  ;;  %v393_v17 = vld [vmem:[%s9849_s5 + $0x108] sm:$0xff] }
 0x1e7   : > { %6274 = vmatprep.subr.mxu1 %v10122_v38  ;;  %6229 = vmatpush3.msra.mxu0 %v10162_v7  ;;  %v2566_v38 = vand.u32 4294901760, %v2565_v27  ;;  %v2573_v10 = vand.u32 4294901760, %v2572_v43  ;;  %v8373_v11 = vand.u32 4294901760, %v398_v32  ;;  %v1356_v4 = vadd.f32 %v1355_v56, %v1274_v21 }
 0x1e8   : > { %6275 = vmatpush3.msra.mxu1 %v10124_v18  ;;  %6230 = vmatprep.subr.mxu0 %v10163_v1  ;;  %v397_v18 = vld [vmem:[%s9849_s5 + $0x128] sm:$0xff]  ;;  %v2593_v27 = vsub.f32 %v8328_v55, %v8360_v36  ;;  %v2587_v43 = vand.u32 4294901760, %v2586_v9  ;;  %v1198_v7 = vadd.f32 %v8259_v33, %v8232_v23  ;;  %v2600_v1 = vsub.f32 %v8346_v3, %v8380_v37 }
 0x1e9   : > { %2441 = vmatmul.mubr.f32.vlgmr.msra.gmra.mxu1 %v10164_v45  ;;  %6893 = vmatprep.subr.mxu1 %v2559_v26  ;;  %v8390_v0 = vand.u32 4294901760, %v397_v18  ;;  %v8406_v53 = vsub.f32 %v398_v32, %v8373_v11  ;;  %v394_v32 = vld [vmem:[%s9849_s5 + $0x110] sm:$0xff]  ;;  %v1441_v13 = vadd.f32 %v1440_v62, %v1356_v4  ;;  %v8427_v56 = vand.u32 4294901760, %v395_v54 }
 0x1ea   : > { %6231 = vmatpush3.msra.mxu0 %v10165_v28  ;;  %2446 = vmatprep.mubr.f32.mxu1 %v10166_v29  ;;  %v10173_v23 = vand.u32 4294901760, %v10136_v22  ;;  %v2594_v33 = vand.u32 4294901760, %v2593_v27  ;;  %v2607_v28 = vsub.f32 %v8363_v12, %v8397_v19  ;;  %v8442_v22 = vsub.f32 %v396_v6, %v8408_v14 }
 0x1eb   : > { %6894 = vmatpush3.msra.mxu1 %v2559_v26  ;;  %6232 = vmatprep.subr.mxu0 %v10167_v5  ;;  %v10170_v26 = vld [vmem:[#allocation49_spill] sm:$0xff]  ;;  %v8425_v21 = vsub.f32 %v397_v18, %v8390_v0  ;;  %v8439_v18 = vand.u32 4294901760, %v8406_v53  ;;  %v8444_v5 = vand.u32 4294901760, %v394_v32  ;;  %v1281_v9 = vadd.f32 %v8294_v35, %v1198_v7 }
 0x1ec   : > { %6895 = vmatprep.subr.mxu1 %v2566_v38  ;;  %6233 = vmatpush3.msra.mxu0 %v10168_v40  ;;  %v2601_v40 = vand.u32 4294901760, %v2600_v1  ;;  %v2608_v35 = vand.u32 4294901760, %v2607_v28  ;;  %v8467_v62 = vand.u32 4294901760, %v8442_v22 }
 0x1ed   : > { %6896 = vmatpush3.msra.mxu1 %v2566_v38  ;;  %6234 = vmatprep.subr.mxu0 %v10169_v63  ;;  %v8417_v38 = vand.u32 4294901760, %v8383_v31  ;;  %v8455_v4 = vand.u32 4294901760, %v8425_v21  ;;  %v8458_v63 = vsub.f32 %v395_v54, %v8427_v56  ;;  %v2621_v27 = vsub.f32 %v8406_v53, %v8439_v18 }
 0x1ee   : > { %2448 = vmatmul.mubr.f32.gmra.mxu1 %v10170_v26  ;;  %6897 = vmatprep.subr.mxu1 %v2573_v10 }
 0x1ef   : > { %6235 = vmatpush3.msra.mxu0 %v10171_v60  ;;  %6898 = vmatpush3.msra.mxu1 %v2573_v10  ;;  %v1519_v10 = vpop.f32.mrf.mxu1  ;;  %v8470_v60 = vsub.f32 %v394_v32, %v8444_v5  ;;  %v8483_v32 = vand.u32 4294901760, %v8458_v63 }
 0x1f0   : > { %6236 = vmatprep.subr.mxu0 %v10172_v24  ;;  %6899 = vmatprep.subr.mxu1 %v2580_v50  ;;  %v1520_v6 = vadd.f32 %v1519_v10, %v1441_v13  ;;  %v2628_v24 = vsub.f32 %v8425_v21, %v8455_v4 }
 0x1f1   : > { %6237 = vmatpush3.msra.mxu0 %v10173_v23  ;;  %6900 = vmatpush3.msra.mxu1 %v2580_v50  ;;  %v2614_v50 = vsub.f32 %v8383_v31, %v8417_v38  ;;  %v8493_v23 = vand.u32 4294901760, %v8470_v60 }
 0x1f2   : > { %2330 = vmatmul.mubr.f32.vlgmr.msra.gmra.mxu0 %v10164_v45  ;;  %6858 = vmatprep.subr.mxu0 %v8204_v42  ;;  %v392_v45 = vld [vmem:[%s9849_s5 + $0x100] sm:$0xff]  ;;  %v8478_v1 = vand.u32 4294901760, %v1520_v6 }
 0x1f3   : > { %6901 = vmatprep.subr.mxu1 %v2587_v43  ;;  %2335 = vmatprep.mubr.f32.mxu0 %v10166_v29  ;;  %v8460_v29 = vand.u32 4294901760, %v393_v17  ;;  %v8472_v54 = vand.u32 4294901760, %v392_v45  ;;  %v2615_v7 = vand.u32 4294901760, %v2614_v50  ;;  %v2649_v50 = vsub.f32 %v8470_v60, %v8493_v23 }
 0x1f4   : > { %6859 = vmatpush3.msra.mxu0 %v8204_v42  ;;  %6902 = vmatpush3.msra.mxu1 %v2587_v43  ;;  %v1364_v43 = vadd.f32 %v8330_v47, %v1281_v9  ;;  %v2622_v47 = vand.u32 4294901760, %v2621_v27  ;;  %v8502_v10 = vsub.f32 %v1520_v6, %v8478_v1  ;;  %v2642_v9 = vsub.f32 %v8458_v63, %v8483_v32 }
 0x1f5   : > { %6860 = vmatprep.subr.mxu0 %v8221_v8  ;;  %6903 = vmatprep.subr.mxu1 %v2594_v33  ;;  %v8486_v13 = vsub.f32 %v393_v17, %v8460_v29  ;;  %v2629_v17 = vand.u32 4294901760, %v2628_v24 }
 0x1f6   : > { %6861 = vmatpush3.msra.mxu0 %v8221_v8  ;;  %6904 = vmatpush3.msra.mxu1 %v2594_v33  ;;  %v8496_v33 = vsub.f32 %v392_v45, %v8472_v54  ;;  %v1447_v28 = vadd.f32 %v8365_v41, %v1364_v43  ;;  %v2536_v43 = vand.u32 4294901760, %v8502_v10 }
 0x1f7   : > { %2337 = vmatmul.mubr.f32.gmra.mxu0 %v10170_v26  ;;  %6862 = vmatprep.subr.mxu0 %v8237_v57  ;;  %v2635_v26 = vsub.f32 %v8442_v22, %v8467_v62 }
 0x1f8   : > { %6905 = vmatprep.subr.mxu1 %v2601_v40  ;;  %6863 = vmatpush3.msra.mxu0 %v8237_v57  ;;  %v8514_v45 = vand.u32 4294901760, %v8496_v33  ;;  %v1526_v6 = vadd.f32 %v8399_v48, %v1447_v28 }
 0x1f9   : > { %6906 = vmatpush3.msra.mxu1 %v2601_v40  ;;  %6864 = vmatprep.subr.mxu0 %v8248_v30  ;;  %v8507_v40 = vand.u32 4294901760, %v8486_v13  ;;  %v2636_v41 = vand.u32 4294901760, %v2635_v26  ;;  %v2537_v26 = vsub.f32 %v8502_v10, %v2536_v43 }
 0x1fa   : > { %6907 = vmatprep.subr.mxu1 %v2608_v35  ;;  %6865 = vmatpush3.msra.mxu0 %v8248_v30  ;;  %v2663_v48 = vsub.f32 %v8496_v33, %v8514_v45  ;;  %v8526_v24 = vand.u32 4294901760, %v1526_v6 }
 0x1fb   : > { %6908 = vmatpush3.msra.mxu1 %v2608_v35  ;;  %6866 = vmatprep.subr.mxu0 %v8273_v25  ;;  %v2643_v35 = vand.u32 4294901760, %v2642_v9  ;;  %v2656_v27 = vsub.f32 %v8486_v13, %v8507_v40  ;;  %v2538_v9 = vand.u32 4294901760, %v2537_v26 }
 0x1fc   : > { %6909 = vmatprep.subr.mxu1 %v2615_v7  ;;  %6867 = vmatpush3.msra.mxu0 %v8273_v25  ;;  %v2664_v28 = vand.u32 4294901760, %v2663_v48 }
 0x1fd   : > { %6910 = vmatpush3.msra.mxu1 %v2615_v7  ;;  %6868 = vmatprep.subr.mxu0 %v8292_v61  ;;  %v2650_v7 = vand.u32 4294901760, %v2649_v50 }
 0x1fe   : > { %6911 = vmatprep.subr.mxu1 %v2622_v47  ;;  %6869 = vmatpush3.msra.mxu0 %v8292_v61 }
 0x1ff   : > { %6912 = vmatpush3.msra.mxu1 %v2622_v47  ;;  %6870 = vmatprep.subr.mxu0 %v8311_v34  ;;  %v2657_v47 = vand.u32 4294901760, %v2656_v27 }
 0x200   : > { %6913 = vmatprep.subr.mxu1 %v2629_v17  ;;  %6871 = vmatpush3.msra.mxu0 %v8311_v34 }
 0x201   : > { %6914 = vmatpush3.msra.mxu1 %v2629_v17  ;;  %6872 = vmatprep.subr.mxu0 %v8332_v52  ;;  %v8534_v17 = vsub.f32 %v1526_v6, %v8526_v24 }
 0x202   : > { %6915 = vmatprep.subr.mxu1 %v2636_v41  ;;  %6873 = vmatpush3.msra.mxu0 %v8332_v52 }
 0x203   : > { %6916 = vmatpush3.msra.mxu1 %v2636_v41  ;;  %6874 = vmatprep.subr.mxu0 %v8348_v15  ;;  %v2546_v41 = vand.u32 4294901760, %v8534_v17 }
 0x204   : > { %6917 = vmatprep.subr.mxu1 %v2643_v35  ;;  %6875 = vmatpush3.msra.mxu0 %v8348_v15 }
 0x205   : > { %6918 = vmatpush3.msra.mxu1 %v2643_v35  ;;  %6876 = vmatprep.subr.mxu0 %v8373_v11  ;;  %v2547_v50 = vsub.f32 %v8534_v17, %v2546_v41 }
 0x206   : > { %6919 = vmatprep.subr.mxu1 %v2650_v7  ;;  %6877 = vmatpush3.msra.mxu0 %v8373_v11 }
 0x207   : > { %6920 = vmatpush3.msra.mxu1 %v2650_v7  ;;  %6878 = vmatprep.subr.mxu0 %v8390_v0  ;;  %v2548_v6 = vand.u32 4294901760, %v2547_v50 }
 0x208   : > { %6921 = vmatprep.subr.mxu1 %v2657_v47  ;;  %6925 = vmatprep.mubr.f32.mxu1 %v8478_v1 }
 0x209   : > { %6879 = vmatpush3.msra.mxu0 %v8390_v0  ;;  %6922 = vmatpush3.msra.mxu1 %v2657_v47 }
 0x20a   : > { %6880 = vmatprep.subr.mxu0 %v8408_v14  ;;  %6923 = vmatprep.subr.mxu1 %v2664_v28 }
 0x20b   : > { %6881 = vmatpush3.msra.mxu0 %v8408_v14  ;;  %6924 = vmatpush3.msra.mxu1 %v2664_v28 }
 0x20c   : > { %6882 = vmatprep.subr.mxu0 %v8427_v56  ;;  %6890 = vmatprep.mubr.f32.mxu0 %v2538_v9 }
 0x20d   : > { %6926 = vmatmul.mubr.f32.vlgmr.msra.gmra.mxu1 %v8526_v24  ;;  %6963 = vmatprep.subr.mxu1 %v8204_v42 }
 0x20e   : > { %6883 = vmatpush3.msra.mxu0 %v8427_v56  ;;  %6964 = vmatpush3.msra.mxu1 %v8204_v42 }
 0x20f   : > { %6995 = vmatprep.mubr.f32.mxu1 %v2536_v43  ;;  %6884 = vmatprep.subr.mxu0 %v8444_v5 }
 0x210   : > { %6965 = vmatprep.subr.mxu1 %v8221_v8  ;;  %6885 = vmatpush3.msra.mxu0 %v8444_v5 }
 0x211   : > { %6966 = vmatpush3.msra.mxu1 %v8221_v8  ;;  %6886 = vmatprep.subr.mxu0 %v8460_v29 }
 0x212   : > { %6967 = vmatprep.subr.mxu1 %v8237_v57  ;;  %6887 = vmatpush3.msra.mxu0 %v8460_v29 }
 0x213   : > { %6968 = vmatpush3.msra.mxu1 %v8237_v57  ;;  %6888 = vmatprep.subr.mxu0 %v8472_v54 }
 0x214   : > { %6969 = vmatprep.subr.mxu1 %v8248_v30  ;;  %6889 = vmatpush3.msra.mxu0 %v8472_v54 }
 0x215   : > { %6970 = vmatpush3.msra.mxu1 %v8248_v30  ;;  %6891 = vmatmul.mubr.f32.vlgmr.msra.gmra.mxu0 %v2548_v6 }
 0x216   : > { %6928 = vmatprep.subr.mxu0 %v8227_v16  ;;  %6971 = vmatprep.subr.mxu1 %v8273_v25 }
 0x217   : > { %6929 = vmatpush3.msra.mxu0 %v8227_v16  ;;  %6960 = vmatprep.mubr.f32.mxu0 %v8502_v10 }
 0x218   : > { %6972 = vmatpush3.msra.mxu1 %v8273_v25  ;;  %6930 = vmatprep.subr.mxu0 %v8246_v46 }
 0x219   : > { %6973 = vmatprep.subr.mxu1 %v8292_v61  ;;  %6931 = vmatpush3.msra.mxu0 %v8246_v46 }
 0x21a   : > { %6974 = vmatpush3.msra.mxu1 %v8292_v61  ;;  %6932 = vmatprep.subr.mxu0 %v8265_v20 }
 0x21b   : > { %6975 = vmatprep.subr.mxu1 %v8311_v34  ;;  %6933 = vmatpush3.msra.mxu0 %v8265_v20 }
 0x21c   : > { %6976 = vmatpush3.msra.mxu1 %v8311_v34  ;;  %6934 = vmatprep.subr.mxu0 %v8282_v49 }
 0x21d   : > { %6977 = vmatprep.subr.mxu1 %v8332_v52  ;;  %6935 = vmatpush3.msra.mxu0 %v8282_v49 }
 0x21e   : > { %6978 = vmatpush3.msra.mxu1 %v8332_v52  ;;  %6936 = vmatprep.subr.mxu0 %v8309_v58 }
 0x21f   : > { %6979 = vmatprep.subr.mxu1 %v8348_v15  ;;  %6937 = vmatpush3.msra.mxu0 %v8309_v58 }
 0x220   : > { %6980 = vmatpush3.msra.mxu1 %v8348_v15  ;;  %6938 = vmatprep.subr.mxu0 %v8328_v55 }
 0x221   : > { %6981 = vmatprep.subr.mxu1 %v8373_v11  ;;  %6939 = vmatpush3.msra.mxu0 %v8328_v55 }
 0x222   : > { %6982 = vmatpush3.msra.mxu1 %v8373_v11  ;;  %6940 = vmatprep.subr.mxu0 %v8346_v3 }
 0x223   : > { %6983 = vmatprep.subr.mxu1 %v8390_v0  ;;  %6941 = vmatpush3.msra.mxu0 %v8346_v3 }
 0x224   : > { %6984 = vmatpush3.msra.mxu1 %v8390_v0  ;;  %6942 = vmatprep.subr.mxu0 %v8363_v12 }
 0x225   : > { %6985 = vmatprep.subr.mxu1 %v8408_v14  ;;  %6943 = vmatpush3.msra.mxu0 %v8363_v12  ;;  %v5988_v12 = vld [vmem:[%s9851_s7] ss:$0 sm:$0xff] }
 0x226   : > { %6986 = vmatpush3.msra.mxu1 %v8408_v14  ;;  %6944 = vmatprep.subr.mxu0 %v8383_v31 }
 0x227   : > { %6987 = vmatprep.subr.mxu1 %v8427_v56  ;;  %6945 = vmatpush3.msra.mxu0 %v8383_v31 }
 0x228   : > { %6988 = vmatpush3.msra.mxu1 %v8427_v56  ;;  %6946 = vmatprep.subr.mxu0 %v8406_v53 }
 0x229   : > { %6989 = vmatprep.subr.mxu1 %v8444_v5  ;;  %6947 = vmatpush3.msra.mxu0 %v8406_v53 }
 0x22a   : > { %6990 = vmatpush3.msra.mxu1 %v8444_v5  ;;  %6948 = vmatprep.subr.mxu0 %v8425_v21 }
 0x22b   : > { %6991 = vmatprep.subr.mxu1 %v8460_v29  ;;  %6949 = vmatpush3.msra.mxu0 %v8425_v21 }
 0x22c   : > { %6992 = vmatpush3.msra.mxu1 %v8460_v29  ;;  %6950 = vmatprep.subr.mxu0 %v8442_v22 }
 0x22d   : > { %6993 = vmatprep.subr.mxu1 %v8472_v54  ;;  %6951 = vmatpush3.msra.mxu0 %v8442_v22 }
 0x22e   : > { %6994 = vmatpush3.msra.mxu1 %v8472_v54  ;;  %6952 = vmatprep.subr.mxu0 %v8458_v63 }
 0x22f   : > { %6996 = vmatmul.mubr.f32.vlgmr.msra.gmra.mxu1 %v2546_v41  ;;  %7033 = vmatprep.subr.mxu1 %v8204_v42 }
 0x230   : > { %6953 = vmatpush3.msra.mxu0 %v8458_v63  ;;  %7034 = vmatpush3.msra.mxu1 %v8204_v42  ;;  %v10174_v42 = vld [vmem:[#allocation2_spill] sm:$0xff] }
 0x231   : > { %7065 = vmatprep.mubr.f32.mxu1 %v8478_v1  ;;  %6954 = vmatprep.subr.mxu0 %v8470_v60 }
 0x232   : > { %7035 = vmatprep.subr.mxu1 %v8221_v8  ;;  %6955 = vmatpush3.msra.mxu0 %v8470_v60 }
 0x233   : > { %7036 = vmatpush3.msra.mxu1 %v8221_v8  ;;  %6956 = vmatprep.subr.mxu0 %v8486_v13  ;;  %v10175_v8 = vld [vmem:[#allocation6_spill] sm:$0xff] }
 0x234   : > { %7037 = vmatprep.subr.mxu1 %v8237_v57  ;;  %6957 = vmatpush3.msra.mxu0 %v8486_v13 }
 0x235   : > { %7038 = vmatpush3.msra.mxu1 %v8237_v57  ;;  %6958 = vmatprep.subr.mxu0 %v8496_v33 }
 0x236   : > { %7039 = vmatprep.subr.mxu1 %v8248_v30  ;;  %6959 = vmatpush3.msra.mxu0 %v8496_v33 }
 0x237   : > { %7040 = vmatpush3.msra.mxu1 %v8248_v30  ;;  %6961 = vmatmul.mubr.f32.vlgmr.msra.gmra.mxu0 %v8534_v17 }
 0x238   : > { %6998 = vmatprep.subr.mxu0 %v8257_v51  ;;  %7041 = vmatprep.subr.mxu1 %v8273_v25 }
 0x239   : > { %6999 = vmatpush3.msra.mxu0 %v8257_v51  ;;  %7030 = vmatprep.mubr.f32.mxu0 %v8478_v1 }
 0x23a   : > { %7042 = vmatpush3.msra.mxu1 %v8273_v25  ;;  %7000 = vmatprep.subr.mxu0 %v8279_v2 }
 0x23b   : > { %7043 = vmatprep.subr.mxu1 %v8292_v61  ;;  %7001 = vmatpush3.msra.mxu0 %v8279_v2 }
 0x23c   : > { %7044 = vmatpush3.msra.mxu1 %v8292_v61  ;;  %7002 = vmatprep.subr.mxu0 %v8300_v44 }
 0x23d   : > { %7045 = vmatprep.subr.mxu1 %v8311_v34  ;;  %7003 = vmatpush3.msra.mxu0 %v8300_v44 }
 0x23e   : > { %7046 = vmatpush3.msra.mxu1 %v8311_v34  ;;  %7004 = vmatprep.subr.mxu0 %v8319_v39 }
 0x23f   : > { %7047 = vmatprep.subr.mxu1 %v8332_v52  ;;  %7005 = vmatpush3.msra.mxu0 %v8319_v39 }
 0x240   : > { %7048 = vmatpush3.msra.mxu1 %v8332_v52  ;;  %7006 = vmatprep.subr.mxu0 %v8343_v59 }
 0x241   : > { %7049 = vmatprep.subr.mxu1 %v8348_v15  ;;  %7007 = vmatpush3.msra.mxu0 %v8343_v59 }
 0x242   : > { %7050 = vmatpush3.msra.mxu1 %v8348_v15  ;;  %7008 = vmatprep.subr.mxu0 %v8360_v36 }
 0x243   : > { %7051 = vmatprep.subr.mxu1 %v8373_v11  ;;  %7009 = vmatpush3.msra.mxu0 %v8360_v36 }
 0x244   : > { %7052 = vmatpush3.msra.mxu1 %v8373_v11  ;;  %7010 = vmatprep.subr.mxu0 %v8380_v37 }
 0x245   : > { %7053 = vmatprep.subr.mxu1 %v8390_v0  ;;  %7011 = vmatpush3.msra.mxu0 %v8380_v37 }
 0x246   : > { %7054 = vmatpush3.msra.mxu1 %v8390_v0  ;;  %7012 = vmatprep.subr.mxu0 %v8397_v19 }
 0x247   : > { %7055 = vmatprep.subr.mxu1 %v8408_v14  ;;  %7013 = vmatpush3.msra.mxu0 %v8397_v19 }
 0x248   : > { %7056 = vmatpush3.msra.mxu1 %v8408_v14  ;;  %7014 = vmatprep.subr.mxu0 %v8417_v38 }
 0x249   : > { %7057 = vmatprep.subr.mxu1 %v8427_v56  ;;  %7015 = vmatpush3.msra.mxu0 %v8417_v38 }
 0x24a   : > { %7058 = vmatpush3.msra.mxu1 %v8427_v56  ;;  %7016 = vmatprep.subr.mxu0 %v8439_v18 }
 0x24b   : > { %7059 = vmatprep.subr.mxu1 %v8444_v5  ;;  %7017 = vmatpush3.msra.mxu0 %v8439_v18 }
 0x24c   : > { %7060 = vmatpush3.msra.mxu1 %v8444_v5  ;;  %7018 = vmatprep.subr.mxu0 %v8455_v4 }
 0x24d   : > { %7061 = vmatprep.subr.mxu1 %v8460_v29  ;;  %7019 = vmatpush3.msra.mxu0 %v8455_v4 }
 0x24e   : > { %7062 = vmatpush3.msra.mxu1 %v8460_v29  ;;  %7020 = vmatprep.subr.mxu0 %v8467_v62 }
 0x24f   : > { %7063 = vmatprep.subr.mxu1 %v8472_v54  ;;  %7021 = vmatpush3.msra.mxu0 %v8467_v62 }
 0x250   : > { %7064 = vmatpush3.msra.mxu1 %v8472_v54  ;;  %7022 = vmatprep.subr.mxu0 %v8483_v32 }
 0x251   : > { %7066 = vmatmul.mubr.f32.vlgmr.msra.gmra.mxu1 %v8526_v24  ;;  %7023 = vmatpush3.msra.mxu0 %v8483_v32 }
 0x252   : > { %7024 = vmatprep.subr.mxu0 %v8493_v23  ;;  %7079 = vmatprep.mubr.msk.f32.mxu1 %vm512_vm1, %v10174_v42 }
 0x253   : > { %7025 = vmatpush3.msra.mxu0 %v8493_v23 }
 0x254   : > { %7026 = vmatprep.subr.mxu0 %v8507_v40 }
 0x255   : > { %7027 = vmatpush3.msra.mxu0 %v8507_v40 }
 0x256   : > { %7028 = vmatprep.subr.mxu0 %v8514_v45 }
 0x257   : > { %7029 = vmatpush3.msra.mxu0 %v8514_v45 }
 0x258   : > { %7031 = vmatmul.mubr.f32.vlgmr.msra.gmra.mxu0 %v8526_v24 }
 0x259   : > { %7072 = vmatprep.mubr.f32.mxu0 %v10175_v8 }
 0x263   : > { %v6124_v46 = vpop.f32.mrf.mxu1 }
 0x265   : > { %v6125_v51 = vpop.f32.mrf.mxu1 }
 0x266   : > { %v6126_v38 = vadd.f32 %v6125_v51, %v6124_v46 }
 0x267   : > { %v6127_v25 = vpop.f32.mrf.mxu1 }
 0x269   : > { %v6128_v49 = vpop.f32.mrf.mxu1 }
 0x26a   : > { %v6129_v0 = vadd.f32 %v6128_v49, %v6127_v25 }
 0x26b   : > { %v6086_v16 = vpop.f32.mrf.mxu0 }
 0x26d   : > { %v6087_v57 = vpop.f32.mrf.mxu0 }
 0x26e   : > { %v6088_v36 = vadd.f32 %v6087_v57, %v6086_v16 }
 0x270   : > { %v6089_v30 = vpop.f32.mrf.mxu0  ;;  %v1644_v19 = vadd.f32 %v6088_v36, %v5988_v12 }
 0x272   : > { %v6090_v20 = vpop.f32.mrf.mxu0  ;;  %v1891_v22 = vadd.f32 %v6126_v38, %v1644_v19 }
 0x273   : > { %v6091_v59 = vadd.f32 %v6090_v20, %v6089_v30 }
 0x275   : > { %v1659_v37 = vadd.f32 %v6091_v59, %v5988_v12 }
 0x277   : > { %v1898_v56 = vadd.f32 %v6129_v0, %v1659_v37 }
 0x285   : > { %v6200_v44 = vpop.f32.mrf.mxu1 }
 0x287   : > { %v6201_v34 = vpop.f32.mrf.mxu1 }
 0x288   : > { %v6202_v60 = vadd.f32 %v6201_v34, %v6200_v44 }
 0x28a   : > { %v6203_v55 = vpop.f32.mrf.mxu1 }
 0x28c   : > { %v6204_v3 = vpop.f32.mrf.mxu1 }
 0x28d   : > { %v6205_v63 = vadd.f32 %v6204_v3, %v6203_v55 }
 0x28e   : > { %v6162_v2 = vpop.f32.mrf.mxu0 }
 0x290   : > { %v6163_v61 = vpop.f32.mrf.mxu0 }
 0x291   : > { %v6164_v21 = vadd.f32 %v6163_v61, %v6162_v2 }
 0x293   : > { %v6165_v58 = vpop.f32.mrf.mxu0  ;;  %v2036_v29 = vadd.f32 %v6164_v21, %v1891_v22  ;;  %v3222_v22 = vpop.permute.xlu0 %3221 }
 0x295   : > { %v6166_v39 = vpop.f32.mrf.mxu0  ;;  %v2153_v13 = vadd.f32 %v6202_v60, %v2036_v29 }
 0x296   : > { %v6167_v53 = vadd.f32 %v6166_v39, %v6165_v58 }
 0x298   : > { %v2045_v5 = vadd.f32 %v6167_v53, %v1898_v56 }
 0x29a   : > { %v2164_v1 = vadd.f32 %v6205_v63, %v2045_v5 }
 0x2a9   : > { %v6276_v11 = vpop.f32.mrf.mxu1 }
 0x2ab   : > { %v6277_v14 = vpop.f32.mrf.mxu1 }
 0x2ac   : > { %v6278_v45 = vadd.f32 %v6277_v14, %v6276_v11 }
 0x2ae   : > { %v6279_v4 = vpop.f32.mrf.mxu1 }
 0x2b0   : > { %v6280_v32 = vpop.f32.mrf.mxu1 }
 0x2b1   : > { %v6281_v10 = vadd.f32 %v6280_v32, %v6279_v4 }
 0x2b2   : > { %v6238_v52 = vpop.f32.mrf.mxu0 }
 0x2b4   : > { %v6239_v15 = vpop.f32.mrf.mxu0 }
 0x2b5   : > { %v6240_v54 = vadd.f32 %v6239_v15, %v6238_v52 }
 0x2b7   : > { %v6241_v31 = vpop.f32.mrf.mxu0  ;;  %v2332_v40 = vadd.f32 %v6240_v54, %v2153_v13  ;;  %v3234_v54 = vpop.permute.xlu0 %3233 }
 0x2b9   : > { %v6242_v18 = vpop.f32.mrf.mxu0  ;;  %v2443_v48 = vadd.f32 %v6278_v45, %v2332_v40 }
 0x2ba   : > { %v6243_v62 = vadd.f32 %v6242_v18, %v6241_v31  ;;  %v3217_v18 = vpop.permute.xlu1 %3216 }
 0x2bc   : > { %v2339_v23 = vadd.f32 %v6243_v62, %v2164_v1 }
 0x2be   : > { %v2450_v35 = vadd.f32 %v6281_v10, %v2339_v23  ;;  %v3229_v60 = vpop.permute.xlu1 %3228 }
 0x2cd   : > { %v6927_v27 = vpop.f32.mrf.mxu1 }
 0x2cf   : > { %v2701_v26 = vpop.f32.mrf.mxu1 }
 0x2d5   : > { %v6892_v33 = vpop.f32.mrf.mxu0 }
 0x2d6   : > { %v2551_v7 = vadd.f32 %v6892_v33, %v2450_v35 }
 0x2d7   : > { %v2540_v43 = vpop.f32.mrf.mxu0 }
 0x2d8   : > { %v2541_v47 = vadd.f32 %v2540_v43, %v2443_v48  ;;  %v2708_v28 = vadd.f32 %v6927_v27, %v2551_v7 }
 0x2da   : > { %v2702_v50 = vadd.f32 %v2701_v26, %v2541_v47 }
 0x2ef   : > { %v6997_v17 = vpop.f32.mrf.mxu1 }
 0x2f1   : > { %v2907_v8 = vpop.f32.mrf.mxu1 }
 0x2f7   : > { %v6962_v24 = vpop.f32.mrf.mxu0 }
 0x2f8   : > { %v2819_v41 = vadd.f32 %v6962_v24, %v2708_v28 }
 0x2f9   : > { %v2811_v9 = vpop.f32.mrf.mxu0 }
 0x2fa   : > { %v2812_v6 = vadd.f32 %v2811_v9, %v2702_v50  ;;  %v2916_v16 = vadd.f32 %v6997_v17, %v2819_v41 }
 0x2fc   : > { %v2908_v51 = vadd.f32 %v2907_v8, %v2812_v6 }
 0x311   : > { %v7067_v57 = vpop.f32.mrf.mxu1 }
 0x313   : > { %v3127_v2 = vpop.f32.mrf.mxu1 }
 0x318   : > { %v7032_v46 = vpop.f32.mrf.mxu0 }
 0x319   : > { %v3041_v30 = vadd.f32 %v7032_v46, %v2916_v16 }
 0x31a   : > { %v3034_v20 = vpop.f32.mrf.mxu0 }
 0x31b   : > { %v3035_v25 = vadd.f32 %v3034_v20, %v2908_v51  ;;  %v3134_v49 = vadd.f32 %v7067_v57, %v3041_v30 }
 0x31d   : > { %v3128_v61 = vadd.f32 %v3127_v2, %v3035_v25 }
 0x31f   : > { %v3190_v44 = vadd.f32 %v3134_v49, %v3128_v61 }
 0x321   : > { %v3191_v58 = vrot.slane %v3190_v44, 4 }
 0x323   : > { %v3192_v34 = vadd.f32 %v3191_v58, %v3190_v44 }
 0x325   : > { %v3193_v39 = vrot.slane %v3192_v34, 2 }
 0x327   : > { %v3194_v55 = vadd.f32 %v3193_v39, %v3192_v34 }
 0x329   : > { %v3195_v52 = vrot.slane %v3194_v55, 1 }
 0x32b   : > { %v3196_v59 = vadd.f32 %v3195_v52, %v3194_v55 }
 0x32d   : > { %v3197_v3 = vmul.f32 0.0625, %v3196_v59 }
 0x32f   : > { %v3198_v15 = vsub.f32 %v3128_v61, %v3197_v3  ;;  %v3199_v36 = vsub.f32 %v3134_v49, %v3197_v3 }
 0x331   : > { %v3200_v12 = vmul.f32 %v3198_v15, %v3198_v15  ;;  %v3201_v11 = vmul.f32 %v3199_v36, %v3199_v36 }
 0x333   : > { %v3202_v37 = vadd.f32 %v3201_v11, %v3200_v12 }
 0x335   : > { %v3203_v31 = vrot.slane %v3202_v37, 4 }
 0x337   : > { %v3204_v0 = vadd.f32 %v3203_v31, %v3202_v37 }
 0x339   : > { %v3205_v19 = vrot.slane %v3204_v0, 2 }
 0x33b   : > { %v3206_v53 = vadd.f32 %v3205_v19, %v3204_v0 }
 0x33d   : > { %v3207_v14 = vrot.slane %v3206_v53, 1 }
 0x33f   : > { %v3208_v38 = vadd.f32 %v3207_v14, %v3206_v53 }
 0x341   : > { %v3209_v21 = vmul.f32 0.0625, %v3208_v38 }
 0x343   : > { %v3210_v56 = vadd.f32 1e-05, %v3209_v21 }
 0x345   : > { %7384 = vrsqrt.f32 %v3210_v56 }
 0x352   : > { %v7385_v5 = vpop.eup %7384 }
 0x353   : > { %v3212_v4 = vmul.f32 %v7385_v5, %v3198_v15  ;;  %v3213_v63 = vmul.f32 %v7385_v5, %v3199_v36 }
 0x355   : > { %v3224_v29 = vmul.f32 %v3217_v18, %v3212_v4  ;;  %v3225_v62 = vmul.f32 %v3222_v22, %v3213_v63  ;;  %v10180_v63 = vld [vmem:[#allocation14_spill] sm:$0xff] }
 0x357   : > { %v3236_v1 = vadd.f32 %v3229_v60, %v3224_v29  ;;  %v3237_v32 = vadd.f32 %v3234_v54, %v3225_v62  ;;  %v10181_v60 = vld [vmem:[#allocation4_spill] sm:$0xff] }
 0x359   : > { %v3238_v13 = vmul.f32 0.70710677, %v3236_v1  ;;  %v3239_v23 = vmul.f32 0.70710677, %v3237_v32  ;;  %v3286_v31 = vmul.f32 0.5, %v3236_v1  ;;  %v3287_v19 = vmul.f32 0.5, %v3237_v32 }
 0x35a   : > { %v10182_v1 = vld [vmem:[#allocation9_spill] sm:$0xff] }
 0x35b   : > { %v3240_v33 = vand.u32 2147483647, %v3238_v13  ;;  %v3241_v10 = vand.u32 2147483647, %v3239_v23  ;;  %vm3280_vm7 = vcmp.lt.f32.partialorder %v3238_v13, 0.0  ;;  %vm3281_vm8 = vcmp.lt.f32.partialorder %v3239_v23, 0.0 }
 0x35c   : > { %v10183_v13 = vld [vmem:[#allocation3_spill] sm:$0xff]  ;;  %v3172_v23 = vld [vmem:[%s9850_s6 + $0xf8] sm:$0xff] }
 0x35d   : > { %v3242_v40 = vmul.f32 0.3275911, %v3240_v33  ;;  %v3243_v45 = vmul.f32 0.3275911, %v3241_v10  ;;  %v3268_v43 = vsub.f32 0.0, %v3240_v33  ;;  %v3269_v7 = vsub.f32 0.0, %v3241_v10 }
 0x35f   : > { %v3244_v35 = vadd.f32 1.0, %v3242_v40  ;;  %v3245_v27 = vadd.f32 1.0, %v3243_v45  ;;  %v3270_v48 = vmul.f32 %v3268_v43, %v3240_v33  ;;  %v3271_v24 = vmul.f32 %v3269_v7, %v3241_v10  ;;  %v10184_v33 = vld [vmem:[#allocation5_spill] sm:$0xff]  ;;  %v10185_v40 = vld [vmem:[#allocation20_spill] sm:$0xff] }
 0x360   : > { %v3156_v10 = vld [vmem:[%s9850_s6 + $0x78] sm:$0xff]  ;;  %v3171_v45 = vld [vmem:[%s9850_s6 + $0xf0] sm:$0xff] }
 0x361   : > { %7386 = vrcp.f32 %v3244_v35  ;;  %v3272_v17 = vmul.f32 1.442695, %v3270_v48  ;;  %v3274_v41 = vmul.f32 1.442695, %v3271_v24  ;;  %v10186_v35 = vld [vmem:[#allocation10_spill] sm:$0xff]  ;;  %v3155_v43 = vld [vmem:[%s9850_s6 + $0x70] sm:$0xff] }
 0x362   : > { %7388 = vrcp.f32 %v3245_v27  ;;  %v8766_v27 = vand.u32 4294901760, %v3172_v23  ;;  %v10188_v7 = vld [vmem:[#allocation21_spill] sm:$0xff]  ;;  %v8773_v48 = vand.u32 4294901760, %v3156_v10  ;;  %v3170_v24 = vld [vmem:[%s9850_s6 + $0xe8] sm:$0xff] }
 0x363   : > { %7390 = vpow2.f32 %v3272_v17  ;;  %v3169_v17 = vld [vmem:[%s9850_s6 + $0xe0] sm:$0xff] }
 0x364   : > { %7392 = vpow2.f32 %v3274_v41  ;;  %10187 = vst [vmem:[#allocation26_spill] sm:$0xff] %v8766_v27  ;;  %v8798_v41 = vand.u32 4294901760, %v3170_v24 }
 0x36e   : > { %v7387_v47 = vpop.eup %7386 }
 0x36f   : > { %v7389_v26 = vpop.eup %7388  ;;  %v3250_v28 = vmul.f32 1.0614054, %v7387_v47 }
 0x370   : > { %v3251_v9 = vmul.f32 1.0614054, %v7389_v26  ;;  %v7391_v34 = vpop.eup %7390 }
 0x371   : > { %v3252_v50 = vadd.f32 -1.4531521, %v3250_v28  ;;  %v7393_v55 = vpop.eup %7392  ;;  %v8787_v28 = vand.u32 4294901760, %v3155_v43 }
 0x372   : > { %v3253_v6 = vadd.f32 -1.4531521, %v3251_v9  ;;  %v8796_v9 = vsub.f32 %v3172_v23, %v8766_v27 }
 0x373   : > { %v3254_v8 = vmul.f32 %v7387_v47, %v3252_v50  ;;  %v3153_v50 = vld [vmem:[%s9850_s6 + $0x60] sm:$0xff] }
 0x374   : > { %v3255_v16 = vmul.f32 %v7389_v26, %v3253_v6  ;;  %10189 = vst [vmem:[#allocation36_spill] sm:$0xff] %v8796_v9  ;;  %v10190_v6 = vld [vmem:[#allocation16_spill] sm:$0xff] }
 0x375   : > { %v3256_v57 = vadd.f32 1.4214138, %v3254_v8  ;;  %v8806_v8 = vsub.f32 %v3156_v10, %v8773_v48 }
 0x376   : > { %v3257_v46 = vadd.f32 1.4214138, %v3255_v16 }
 0x377   : > { %v3258_v30 = vmul.f32 %v7387_v47, %v3256_v57 }
 0x378   : > { %v3259_v51 = vmul.f32 %v7389_v26, %v3257_v46  ;;  %v8819_v46 = vand.u32 4294901760, %v3169_v17 }
 0x379   : > { %v3260_v20 = vadd.f32 -0.28449672, %v3258_v30  ;;  %v3152_v30 = vld [vmem:[%s9850_s6 + $0x58] sm:$0xff] }
 0x37a   : > { %v3261_v25 = vadd.f32 -0.28449672, %v3259_v51  ;;  %v10191_v51 = vld [vmem:[#allocation17_spill] sm:$0xff] }
 0x37b   : > { %v3262_v2 = vmul.f32 %v7387_v47, %v3260_v20  ;;  %v8827_v20 = vsub.f32 %v3155_v43, %v8787_v28  ;;  %v10195_v43 = vld [vmem:[#allocation19_spill] sm:$0xff] }
 0x37c   : > { %v3263_v49 = vmul.f32 %v7389_v26, %v3261_v25  ;;  %v8829_v25 = vand.u32 4294901760, %v3153_v50 }
 0x37d   : > { %v3264_v61 = vadd.f32 0.2548296, %v3262_v2  ;;  %v3167_v2 = vld [vmem:[%s9850_s6 + $0xd0] sm:$0xff] }
 0x37e   : > { %v3265_v44 = vadd.f32 0.2548296, %v3263_v49  ;;  %v9975_v49 = vand.u32 4294901760, %v8796_v9 }
 0x37f   : > { %v3266_v58 = vmul.f32 %v7387_v47, %v3264_v61  ;;  %v8780_v47 = vand.u32 4294901760, %v3171_v45  ;;  %v8838_v61 = vsub.f32 %v3170_v24, %v8798_v41 }
 0x380   : > { %v3267_v39 = vmul.f32 %v7389_v26, %v3265_v44  ;;  %v3154_v26 = vld [vmem:[%s9850_s6 + $0x68] sm:$0xff] }
 0x381   : > { %v3276_v52 = vmul.f32 %v7391_v34, %v3266_v58  ;;  %v8808_v16 = vand.u32 4294901760, %v3154_v26  ;;  %v8817_v57 = vsub.f32 %v3171_v45, %v8780_v47  ;;  %v3151_v58 = vld [vmem:[%s9850_s6 + $0x50] sm:$0xff]  ;;  %v9974_v34 = vand.u32 4294901760, %v8806_v8 }
 0x382   : > { %v3277_v59 = vmul.f32 %v7393_v55, %v3267_v39  ;;  %v8851_v55 = vand.u32 4294901760, %v3152_v30 }
 0x383   : > { %v3278_v3 = vsub.f32 1.0, %v3276_v52  ;;  %v8849_v39 = vsub.f32 %v3154_v26, %v8808_v16  ;;  %v3166_v52 = vld [vmem:[%s9850_s6 + $0xc8] sm:$0xff] }
 0x384   : > { %v3279_v15 = vsub.f32 1.0, %v3277_v59  ;;  %v10192_v59 = vld [vmem:[#allocation7_spill] sm:$0xff] }
 0x385   : > { %v3282_v36 = vsub.f32 0.0, %v3278_v3 }
 0x386   : > { %v3283_v12 = vsub.f32 0.0, %v3279_v15 }
 0x387   : > { %v3284_v11 = vsel %vm3280_vm7, %v3282_v36, %v3278_v3  ;;  %v9973_v3 = vand.u32 4294901760, %v8817_v57  ;;  %v8863_v36 = vand.u32 4294901760, %v3167_v2 }
 0x388   : > { %v3285_v37 = vsel %vm3281_vm8, %v3283_v12, %v3279_v15  ;;  %v3288_v0 = vadd.f32 1.0, %v3284_v11  ;;  %v8861_v15 = vsub.f32 %v3169_v17, %v8819_v46  ;;  %v3150_v12 = vld [vmem:[%s9850_s6 + $0x48] sm:$0xff]  ;;  %v9972_v11 = vand.u32 4294901760, %v8827_v20 }
 0x389   : > { %v3289_v53 = vadd.f32 1.0, %v3285_v37  ;;  %v8873_v37 = vsub.f32 %v3153_v50, %v8829_v25 }
 0x38a   : > { %v3290_v14 = vmul.f32 %v3288_v0, %v3286_v31  ;;  %v8875_v31 = vand.u32 4294901760, %v3151_v58  ;;  %v3165_v0 = vld [vmem:[%s9850_s6 + $0xc0] sm:$0xff]  ;;  %v9968_v23 = vand.u32 4294901760, %v8861_v15 }
 0x38b   : > { %v3291_v38 = vmul.f32 %v3289_v53, %v3287_v19  ;;  %v10193_v19 = vld [vmem:[#allocation8_spill] sm:$0xff]  ;;  %v4545_v53 = vsub.f32 %v8796_v9, %v9975_v49  ;;  %v8913_v10 = vand.u32 4294901760, %v3165_v0  ;;  %v9967_v45 = vand.u32 4294901760, %v8873_v37 }
 0x38c   : > { %v8696_v21 = vand.u32 4294901760, %v3290_v14 }
 0x38d   : > { %v8698_v56 = vand.u32 4294901760, %v3291_v38 }
 0x38e   : > { %10176 = vst [vmem:[#allocation24_spill] sm:$0xff] %v8696_v21  ;;  %v8701_v18 = vsub.f32 %v3290_v14, %v8696_v21  ;;  %v9970_v14 = vand.u32 4294901760, %v8838_v61 }
 0x38f   : > { %10177 = vst [vmem:[#allocation32_spill] sm:$0xff] %v8698_v56  ;;  %v8704_v22 = vsub.f32 %v3291_v38, %v8698_v56  ;;  %7068 = vmatprep.subr.mxu0 %v8698_v56 }
 0x390   : > { %7069 = vmatpush3.msra.mxu0 %v8698_v56  ;;  %v8709_v5 = vand.u32 4294901760, %v8701_v18  ;;  %v4559_v24 = vsub.f32 %v8838_v61, %v9970_v14 }
 0x391   : > { %10178 = vst [vmem:[#allocation25_spill] sm:$0xff] %v8704_v22  ;;  %7070 = vmatprep.subr.mxu0 %v8696_v21  ;;  %v8713_v4 = vand.u32 4294901760, %v8704_v22 }
 0x392   : > { %7071 = vmatpush3.msra.mxu0 %v8696_v21  ;;  %v3418_v62 = vsub.f32 %v8701_v18, %v8709_v5 }
 0x393   : > { %10179 = vst [vmem:[#allocation33_spill] sm:$0xff] %v8713_v4  ;;  %7073 = vmatmul.mubr.f32.vlgmr.msra.gmra.mxu0 %v10180_v63  ;;  %7082 = vmatprep.subr.mxu0 %v8704_v22  ;;  %v3411_v29 = vsub.f32 %v8704_v22, %v8713_v4  ;;  %v8890_v63 = vand.u32 4294901760, %v3166_v52 }
 0x394   : > { %7083 = vmatpush3.msra.mxu0 %v8704_v22  ;;  %7086 = vmatprep.mubr.f32.mxu0 %v10181_v60  ;;  %v8730_v32 = vand.u32 4294901760, %v3418_v62  ;;  %v9969_v62 = vand.u32 4294901760, %v8849_v39  ;;  %v8900_v60 = vsub.f32 %v3152_v30, %v8851_v55 }
 0x395   : > { %7084 = vmatprep.subr.mxu0 %v8701_v18  ;;  %v8725_v54 = vand.u32 4294901760, %v3411_v29  ;;  %v4433_v29 = vsub.f32 %v8806_v8, %v9974_v34  ;;  %v8931_v17 = vsub.f32 %v3166_v52, %v8890_v63  ;;  %v8950_v52 = vsub.f32 %v3165_v0, %v8913_v10 }
 0x396   : > { %7085 = vmatpush3.msra.mxu0 %v8701_v18 }
 0x397   : > { %7075 = vmatprep.subr.mxu1 %v8725_v54  ;;  %7087 = vmatmul.mubr.f32.vlgmr.msra.gmra.mxu0 %v10182_v1  ;;  %v8902_v1 = vand.u32 4294901760, %v3150_v12  ;;  %v4434_v50 = vand.u32 4294901760, %v4433_v29  ;;  %v4560_v29 = vand.u32 4294901760, %v4559_v24  ;;  %v9959_v24 = vand.u32 4294901760, %v8950_v52 }
 0x398   : > { %7096 = vmatprep.subr.mxu0 %v8713_v4  ;;  %7076 = vmatpush3.msra.mxu1 %v8725_v54 }
 0x399   : > { %7097 = vmatpush3.msra.mxu0 %v8713_v4  ;;  %7077 = vmatprep.subr.mxu1 %v8730_v32  ;;  %v8941_v30 = vsub.f32 %v3150_v12, %v8902_v1  ;;  %v4454_v12 = vsub.f32 %v8873_v37, %v9967_v45 }
 0x39a   : > { %7098 = vmatprep.subr.mxu0 %v8709_v5  ;;  %7078 = vmatpush3.msra.mxu1 %v8730_v32 }
 0x39b   : > { %7099 = vmatpush3.msra.mxu0 %v8709_v5  ;;  %7100 = vmatprep.mubr.msk.f32.mxu0 %vm512_vm1, %v10174_v42 }
 0x39c   : > { %7080 = vmatmul.mubr.msk.f32.vlgmr.msra.gmra.mxu1 %vm512_vm1, %v10183_v13  ;;  %7089 = vmatprep.subr.mxu1 %v8698_v56 }
 0x39d   : > { %7101 = vmatmul.mubr.msk.f32.vlgmr.msra.gmra.mxu0 %vm512_vm1, %v10183_v13  ;;  %7110 = vmatprep.subr.mxu0 %v8698_v56 }
 0x39e   : > { %7090 = vmatpush3.msra.mxu1 %v8698_v56  ;;  %7111 = vmatpush3.msra.mxu0 %v8698_v56 }
 0x39f   : > { %7091 = vmatprep.subr.mxu1 %v8696_v21  ;;  %7112 = vmatprep.subr.mxu0 %v8696_v21 }
 0x3a0   : > { %7092 = vmatpush3.msra.mxu1 %v8696_v21  ;;  %7093 = vmatprep.mubr.f32.mxu1 %v10184_v33  ;;  %v8911_v33 = vsub.f32 %v3167_v2, %v8863_v36  ;;  %v4566_v2 = vsub.f32 %v8861_v15, %v9968_v23 }
 0x3a1   : > { %7113 = vmatpush3.msra.mxu0 %v8696_v21  ;;  %7114 = vmatprep.mubr.f32.mxu0 %v10185_v40  ;;  %v10194_v40 = vld [vmem:[#allocation18_spill] sm:$0xff] }
 0x3a2   : > { %7094 = vmatmul.mubr.f32.vlgmr.msra.gmra.mxu1 %v10186_v35  ;;  %7103 = vmatprep.subr.mxu1 %v8698_v56  ;;  %v8922_v35 = vsub.f32 %v3151_v58, %v8875_v31  ;;  %v9963_v58 = vand.u32 4294901760, %v8911_v33 }
 0x3a3   : > { %7115 = vmatmul.mubr.f32.vlgmr.msra.gmra.mxu0 %v10188_v7  ;;  %7124 = vmatprep.subr.mxu0 %v8704_v22  ;;  %v4546_v7 = vand.u32 4294901760, %v4545_v53 }
 0x3a4   : > { %7104 = vmatpush3.msra.mxu1 %v8698_v56  ;;  %7125 = vmatpush3.msra.mxu0 %v8704_v22  ;;  %v9962_v53 = vand.u32 4294901760, %v8922_v35 }
 0x3a5   : > { %7105 = vmatprep.subr.mxu1 %v8696_v21  ;;  %7126 = vmatprep.subr.mxu0 %v8701_v18 }
 0x3a6   : > { %7106 = vmatpush3.msra.mxu1 %v8696_v21  ;;  %7107 = vmatprep.mubr.msk.f32.mxu1 %vm512_vm1, %v10174_v42  ;;  %v3168_v42 = vld [vmem:[%s9850_s6 + $0xd8] sm:$0xff] }
 0x3a7   : > { %7127 = vmatpush3.msra.mxu0 %v8701_v18  ;;  %7128 = vmatprep.mubr.f32.mxu0 %v10190_v6  ;;  %v8840_v44 = vand.u32 4294901760, %v3168_v42  ;;  %v4447_v6 = vsub.f32 %v8849_v39, %v9969_v62 }
 0x3a8   : > { %7108 = vmatmul.mubr.msk.f32.vlgmr.msra.gmra.mxu1 %vm512_vm1, %v10183_v13  ;;  %7117 = vmatprep.subr.mxu1 %v8725_v54  ;;  %v4552_v13 = vsub.f32 %v8817_v57, %v9973_v3 }
 0x3a9   : > { %7129 = vmatmul.mubr.f32.vlgmr.msra.gmra.mxu0 %v10191_v51  ;;  %7138 = vmatprep.subr.mxu0 %v8713_v4  ;;  %v8888_v38 = vsub.f32 %v3168_v42, %v8840_v44  ;;  %v9966_v42 = vand.u32 4294901760, %v8900_v60 }
 0x3aa   : > { %7118 = vmatpush3.msra.mxu1 %v8725_v54  ;;  %7139 = vmatpush3.msra.mxu0 %v8713_v4  ;;  %v4553_v51 = vand.u32 4294901760, %v4552_v13  ;;  %v9961_v13 = vand.u32 4294901760, %v8931_v17 }
 0x3ab   : > { %7119 = vmatprep.subr.mxu1 %v8730_v32  ;;  %7140 = vmatprep.subr.mxu0 %v8709_v5  ;;  %v9958_v26 = vand.u32 4294901760, %v8888_v38 }
 0x3ac   : > { %7120 = vmatpush3.msra.mxu1 %v8730_v32  ;;  %7121 = vmatprep.mubr.msk.f32.mxu1 %vm512_vm1, %v10192_v59 }
 0x3ad   : > { %7141 = vmatpush3.msra.mxu0 %v8709_v5  ;;  %7142 = vmatprep.mubr.msk.f32.mxu0 %vm512_vm1, %v10192_v59  ;;  %v4573_v0 = vsub.f32 %v8888_v38, %v9958_v26  ;;  %v4455_v26 = vand.u32 4294901760, %v4454_v12 }
 0x3ae   : > { %7122 = vmatmul.mubr.msk.f32.vlgmr.msra.gmra.mxu1 %vm512_vm1, %v10193_v19  ;;  %7131 = vmatprep.subr.mxu1 %v8698_v56 }
 0x3af   : > { %7143 = vmatmul.mubr.msk.f32.vlgmr.msra.gmra.mxu0 %vm512_vm1, %v10193_v19  ;;  %7132 = vmatpush3.msra.mxu1 %v8698_v56 }
 0x3b0   : > { %4403 = vmatprep.mubr.f32.mxu0 %v8730_v32  ;;  %7133 = vmatprep.subr.mxu1 %v8696_v21  ;;  %v4440_v32 = vsub.f32 %v8827_v20, %v9972_v11 }
 0x3b1   : > { %7134 = vmatpush3.msra.mxu1 %v8696_v21  ;;  %7135 = vmatprep.mubr.f32.mxu1 %v10194_v40  ;;  %v4448_v40 = vand.u32 4294901760, %v4447_v6  ;;  %v4574_v6 = vand.u32 4294901760, %v4573_v0 }
 0x3b2   : > { %7136 = vmatmul.mubr.f32.vlgmr.msra.gmra.mxu1 %v10195_v43  ;;  %7145 = vmatprep.subr.mxu1 %v8698_v56  ;;  %v9960_v43 = vand.u32 4294901760, %v8941_v30 }
 0x3b3   : > { %7146 = vmatpush3.msra.mxu1 %v8698_v56  ;;  %7149 = vmatprep.mubr.msk.f32.mxu1 %vm512_vm1, %v10192_v59  ;;  %v4441_v59 = vand.u32 4294901760, %v4440_v32  ;;  %v4461_v32 = vsub.f32 %v8900_v60, %v9966_v42 }
 0x3b4   : > { %7147 = vmatprep.subr.mxu1 %v8696_v21  ;;  %6438 = vmatprep.subr.mxu0 %v8766_v27 }
 0x3b5   : > { %7148 = vmatpush3.msra.mxu1 %v8696_v21  ;;  %6439 = vmatpush3.msra.mxu0 %v8773_v48 }
 0x3b6   : > { %7150 = vmatmul.mubr.msk.f32.vlgmr.msra.gmra.mxu1 %vm512_vm1, %v10193_v19  ;;  %6476 = vmatprep.subr.mxu1 %v4546_v7  ;;  %v4567_v19 = vand.u32 4294901760, %v4566_v2  ;;  %v4580_v7 = vsub.f32 %v8911_v33, %v9963_v58  ;;  %v4462_v2 = vand.u32 4294901760, %v4461_v32 }
 0x3b7   : > { %4654 = vmatprep.mubr.f32.mxu1 %v8696_v21  ;;  %6477 = vmatpush3.msra.mxu1 %v4434_v50  ;;  %v4468_v50 = vsub.f32 %v8922_v35, %v9962_v53 }
 0x3b8   : > { %6478 = vmatprep.subr.mxu1 %v4553_v51  ;;  %6440 = vmatprep.subr.mxu0 %v8780_v47  ;;  %v4587_v51 = vsub.f32 %v8931_v17, %v9961_v13  ;;  %v4581_v12 = vand.u32 4294901760, %v4580_v7  ;;  %v3164_v7 = vld [vmem:[%s9850_s6 + $0xb8] sm:$0xff]  ;;  %v3162_v13 = vld [vmem:[%s9850_s6 + $0xa8] sm:$0xff] }
 0x3b9   : > { %6479 = vmatpush3.msra.mxu1 %v4441_v59  ;;  %6441 = vmatpush3.msra.mxu0 %v8787_v28  ;;  %v4475_v59 = vsub.f32 %v8941_v30, %v9960_v43  ;;  %v4469_v0 = vand.u32 4294901760, %v4468_v50  ;;  %v9050_v58 = vand.u32 4294901760, %v3162_v13 }
 0x3ba   : > { %6480 = vmatprep.subr.mxu1 %v4560_v29  ;;  %6442 = vmatprep.subr.mxu0 %v8798_v41  ;;  %v4594_v29 = vsub.f32 %v8950_v52, %v9959_v24 }
 0x3bb   : > { %6481 = vmatpush3.msra.mxu1 %v4448_v40  ;;  %6443 = vmatpush3.msra.mxu0 %v8808_v16  ;;  %v4588_v40 = vand.u32 4294901760, %v4587_v51  ;;  %v4476_v32 = vand.u32 4294901760, %v4475_v59  ;;  %v3148_v51 = vld [vmem:[%s9850_s6 + $0x38] sm:$0xff]  ;;  %v9068_v14 = vsub.f32 %v3162_v13, %v9050_v58 }
 0x3bc   : > { %6482 = vmatprep.subr.mxu1 %v4567_v19  ;;  %6444 = vmatprep.subr.mxu0 %v8819_v46  ;;  %v4595_v19 = vand.u32 4294901760, %v4594_v29  ;;  %v3160_v13 = vld [vmem:[%s9850_s6 + $0x98] sm:$0xff] }
 0x3bd   : > { %6483 = vmatpush3.msra.mxu1 %v4455_v26  ;;  %6445 = vmatpush3.msra.mxu0 %v8829_v25  ;;  %v3149_v26 = vld [vmem:[%s9850_s6 + $0x40] sm:$0xff]  ;;  %10201 = vst [vmem:[#allocation31_spill] sm:$0xff] %v9068_v14  ;;  %v9104_v49 = vand.u32 4294901760, %v3160_v13 }
 0x3be   : > { %6484 = vmatprep.subr.mxu1 %v4574_v6  ;;  %6446 = vmatprep.subr.mxu0 %v8840_v44  ;;  %v9004_v50 = vand.u32 4294901760, %v3149_v26  ;;  %v9006_v6 = vand.u32 4294901760, %v3164_v7 }
 0x3bf   : > { %6485 = vmatpush3.msra.mxu1 %v4462_v2  ;;  %6447 = vmatpush3.msra.mxu0 %v8851_v55  ;;  %10206 = vst [vmem:[#allocation46_spill] sm:$0xff] %v9104_v49 }
 0x3c0   : > { %6486 = vmatprep.subr.mxu1 %v4581_v12  ;;  %6448 = vmatprep.subr.mxu0 %v8863_v36  ;;  %v9012_v2 = vsub.f32 %v3149_v26, %v9004_v50  ;;  %v9015_v59 = vsub.f32 %v3164_v7, %v9006_v6  ;;  %v9017_v12 = vand.u32 4294901760, %v3148_v51  ;;  %v3147_v26 = vld [vmem:[%s9850_s6 + $0x30] sm:$0xff] }
 0x3c1   : > { %6487 = vmatpush3.msra.mxu1 %v4469_v0  ;;  %6449 = vmatpush3.msra.mxu0 %v8875_v31  ;;  %v9042_v43 = vand.u32 4294901760, %v3147_v26 }
 0x3c2   : > { %6488 = vmatprep.subr.mxu1 %v4588_v40  ;;  %6450 = vmatprep.subr.mxu0 %v8890_v63  ;;  %10196 = vst [vmem:[#allocation27_spill] sm:$0xff] %v9012_v2  ;;  %10197 = vst [vmem:[#allocation37_spill] sm:$0xff] %v9015_v59  ;;  %v9964_v29 = vand.u32 4294901760, %v9012_v2  ;;  %v9965_v0 = vand.u32 4294901760, %v9015_v59  ;;  %v9024_v40 = vsub.f32 %v3148_v51, %v9017_v12 }
 0x3c3   : > { %6489 = vmatpush3.msra.mxu1 %v4476_v32  ;;  %6451 = vmatpush3.msra.mxu0 %v8902_v1  ;;  %v3163_v32 = vld [vmem:[%s9850_s6 + $0xb0] sm:$0xff]  ;;  %v9060_v23 = vsub.f32 %v3147_v26, %v9042_v43  ;;  %v3145_v26 = vld [vmem:[%s9850_s6 + $0x20] sm:$0xff] }
 0x3c4   : > { %6490 = vmatprep.subr.mxu1 %v4595_v19  ;;  %6452 = vmatprep.subr.mxu0 %v8913_v10  ;;  %10198 = vst [vmem:[#allocation28_spill] sm:$0xff] %v9024_v40  ;;  %v9030_v19 = vand.u32 4294901760, %v3163_v32  ;;  %v4482_v7 = vsub.f32 %v9012_v2, %v9964_v29  ;;  %v4601_v51 = vsub.f32 %v9015_v59, %v9965_v0  ;;  %v9971_v24 = vand.u32 4294901760, %v9024_v40  ;;  %v3146_v29 = vld [vmem:[%s9850_s6 + $0x28] sm:$0xff] }
 0x3c5   : > { %6453 = vmatpush3.msra.mxu0 %v9004_v50  ;;  %10200 = vst [vmem:[#allocation30_spill] sm:$0xff] %v9060_v23  ;;  %v9981_v11 = vand.u32 4294901760, %v9060_v23  ;;  %v9079_v3 = vand.u32 4294901760, %v3145_v26  ;;  %v9123_v59 = vsub.f32 %v3160_v13, %v9104_v49 }
 0x3c6   : > { %6454 = vmatprep.subr.mxu0 %v9006_v6  ;;  %v9048_v53 = vsub.f32 %v3163_v32, %v9030_v19  ;;  %v4483_v0 = vand.u32 4294901760, %v4482_v7  ;;  %v4602_v42 = vand.u32 4294901760, %v4601_v51  ;;  %v4489_v45 = vsub.f32 %v9024_v40, %v9971_v24  ;;  %v3161_v32 = vld [vmem:[%s9850_s6 + $0xa0] sm:$0xff] }
 0x3c7   : > { %6455 = vmatpush3.msra.mxu0 %v9017_v12  ;;  %v9070_v7 = vand.u32 4294901760, %v3146_v29  ;;  %v9072_v51 = vand.u32 4294901760, %v3161_v32  ;;  %10202 = vst [vmem:[#allocation42_spill] sm:$0xff] %v9079_v3  ;;  %10209 = vst [vmem:[#allocation22_spill] sm:$0xff] %v9123_v59 }
 0x3c8   : > { %10199 = vst [vmem:[#allocation29_spill] sm:$0xff] %v9048_v53  ;;  %6456 = vmatprep.subr.mxu0 %v9030_v19  ;;  %v9977_v62 = vand.u32 4294901760, %v9048_v53  ;;  %6491 = vmatpush3.msra.mxu1 %v4483_v0  ;;  %v4490_v24 = vand.u32 4294901760, %v4489_v45  ;;  %v3144_v0 = vld [vmem:[%s9850_s6 + $0x18] sm:$0xff] }
 0x3c9   : > { %6457 = vmatpush3.msra.mxu0 %v9042_v43  ;;  %6492 = vmatprep.subr.mxu1 %v4602_v42  ;;  %v9089_v22 = vsub.f32 %v3146_v29, %v9070_v7  ;;  %v9092_v45 = vsub.f32 %v3161_v32, %v9072_v51  ;;  %v4496_v42 = vsub.f32 %v9060_v23, %v9981_v11  ;;  %v9106_v29 = vand.u32 4294901760, %v3144_v0  ;;  %v3159_v32 = vld [vmem:[%s9850_s6 + $0x90] sm:$0xff] }
 0x3ca   : > { %6458 = vmatprep.subr.mxu0 %v9050_v58  ;;  %v4608_v34 = vsub.f32 %v9048_v53, %v9977_v62  ;;  %6493 = vmatpush3.msra.mxu1 %v4490_v24  ;;  %v9102_v62 = vsub.f32 %v3145_v26, %v9079_v3  ;;  %v10208_v24 = vand.u32 4294901760, %v9068_v14  ;;  %v3143_v23 = vld [vmem:[%s9850_s6 + $0x10] sm:$0xff] }
 0x3cb   : > { %10203 = vst [vmem:[#allocation34_spill] sm:$0xff] %v9089_v22  ;;  %10204 = vst [vmem:[#allocation45_spill] sm:$0xff] %v9092_v45  ;;  %6459 = vmatpush3.msra.mxu0 %v9070_v7  ;;  %v9996_v11 = vand.u32 4294901760, %v9089_v22  ;;  %v4497_v53 = vand.u32 4294901760, %v4496_v42  ;;  %v10211_v40 = vand.u32 4294901760, %v9092_v45 }
 0x3cc   : > { %10205 = vst [vmem:[#allocation35_spill] sm:$0xff] %v9102_v62  ;;  %10207 = vst [vmem:[#allocation38_spill] sm:$0xff] %v9106_v29  ;;  %6460 = vmatprep.subr.mxu0 %v9072_v51  ;;  %v4609_v21 = vand.u32 4294901760, %v4608_v34  ;;  %v4615_v4 = vsub.f32 %v9068_v14, %v10208_v24  ;;  %v9126_v34 = vsub.f32 %v3144_v0, %v9106_v29  ;;  %v3158_v24 = vld [vmem:[%s9850_s6 + $0x88] sm:$0xff]  ;;  %v9138_v14 = vand.u32 4294901760, %v3159_v32 }
 0x3cd   : > { %6461 = vmatpush3.msra.mxu0 %v9079_v3  ;;  %v4503_v42 = vsub.f32 %v9089_v22, %v9996_v11  ;;  %v4622_v13 = vsub.f32 %v9092_v45, %v10211_v40  ;;  %v10213_v0 = vand.u32 4294901760, %v9102_v62  ;;  %v3142_v11 = vld [vmem:[%s9850_s6 + $0x8] sm:$0xff]  ;;  %v3157_v40 = vld [vmem:[%s9850_s6 + $0x80] sm:$0xff] }
 0x3ce   : > { %10210 = vst [vmem:[#allocation39_spill] sm:$0xff] %v9126_v34  ;;  %6462 = vmatprep.subr.mxu0 %v9104_v49  ;;  %6494 = vmatprep.subr.mxu1 %v4609_v21  ;;  %v4616_v26 = vand.u32 4294901760, %v4615_v4  ;;  %10212 = vst [vmem:[#allocation15_spill] sm:$0xff] %v9138_v14  ;;  %v9146_v49 = vand.u32 4294901760, %v3143_v23  ;;  %v9155_v22 = vsub.f32 %v3159_v32, %v9138_v14  ;;  %v3141_v4 = vld [vmem:[%s9850_s6] sm:$0xff] }
 0x3cf   : > { %6463 = vmatpush3.msra.mxu0 %v9106_v29  ;;  %6495 = vmatpush3.msra.mxu1 %v4497_v53  ;;  %v4510_v3 = vsub.f32 %v9102_v62, %v10213_v0  ;;  %v4504_v53 = vand.u32 4294901760, %v4503_v42  ;;  %v4623_v45 = vand.u32 4294901760, %v4622_v13  ;;  %v9157_v0 = vand.u32 4294901760, %v3158_v24 }
 0x3d0   : > { %10214 = vst [vmem:[#allocation40_spill] sm:$0xff] %v9146_v49  ;;  %6496 = vmatprep.subr.mxu1 %v4616_v26  ;;  %10215 = vst [vmem:[#allocation41_spill] sm:$0xff] %v9155_v22  ;;  %6464 = vmatprep.subr.mxu0 %v9138_v14  ;;  %v10216_v62 = vand.u32 4294901760, %v9123_v59  ;;  %v10217_v26 = vand.u32 4294901760, %v9126_v34  ;;  %v9170_v32 = vsub.f32 %v3143_v23, %v9146_v49  ;;  %v10017_v13 = vand.u32 4294901760, %v9155_v22 }
 0x3d1   : > { %v4511_v21 = vand.u32 4294901760, %v4510_v3  ;;  %6465 = vmatpush3.msra.mxu0 %v9146_v49  ;;  %6497 = vmatpush3.msra.mxu1 %v4504_v53  ;;  %v9175_v2 = vsub.f32 %v3158_v24, %v9157_v0  ;;  %v9177_v3 = vand.u32 4294901760, %v3142_v11  ;;  %v9179_v14 = vand.u32 4294901760, %v3157_v40 }
 0x3d2   : > { %v4629_v29 = vsub.f32 %v9123_v59, %v10216_v62  ;;  %v4517_v42 = vsub.f32 %v9126_v34, %v10217_v26  ;;  %10218 = vst [vmem:[#allocation43_spill] sm:$0xff] %v9170_v32  ;;  %6466 = vmatprep.subr.mxu0 %v9157_v0  ;;  %6498 = vmatprep.subr.mxu1 %v4623_v45  ;;  %v10015_v23 = vand.u32 4294901760, %v9170_v32  ;;  %v9183_v34 = vand.u32 4294901760, %v3141_v4 }
 0x3d3   : > { %10219 = vst [vmem:[#allocation44_spill] sm:$0xff] %v9175_v2  ;;  %10220 = vst [vmem:[#allocation13_spill] sm:$0xff] %v9177_v3  ;;  %6499 = vmatpush3.msra.mxu1 %v4511_v21  ;;  %v4636_v53 = vsub.f32 %v9155_v22, %v10017_v13  ;;  %v10016_v24 = vand.u32 4294901760, %v9175_v2  ;;  %v9190_v59 = vsub.f32 %v3142_v11, %v9177_v3  ;;  %6467 = vmatpush3.msra.mxu0 %v9177_v3 }
 0x3d4   : > { %10221 = vst [vmem:[#allocation47_spill] sm:$0xff] %v9179_v14  ;;  %v4630_v62 = vand.u32 4294901760, %v4629_v29  ;;  %v4518_v26 = vand.u32 4294901760, %v4517_v42  ;;  %10222 = vst [vmem:[#allocation48_spill] sm:$0xff] %v9183_v34  ;;  %v9193_v49 = vsub.f32 %v3157_v40, %v9179_v14  ;;  %v4524_v45 = vsub.f32 %v9170_v32, %v10015_v23  ;;  %6468 = vmatprep.subr.mxu0 %v9179_v14 }
 0x3d5   : > { %10223 = vst [vmem:[#allocation23_spill] sm:$0xff] %v9190_v59  ;;  %v9200_v29 = vsub.f32 %v3141_v4, %v9183_v34  ;;  %v4637_v21 = vand.u32 4294901760, %v4636_v53  ;;  %v4643_v11 = vsub.f32 %v9175_v2, %v10016_v24  ;;  %v10020_v40 = vand.u32 4294901760, %v9190_v59  ;;  %6469 = vmatpush3.msra.mxu0 %v9183_v34 }
 0x3d6   : > { %10224 = vst [vmem:[#allocation12_spill] sm:$0xff] %v9193_v49  ;;  %6500 = vmatprep.subr.mxu1 %v4630_v62  ;;  %v10024_v42 = vand.u32 4294901760, %v9193_v49  ;;  %v4525_v62 = vand.u32 4294901760, %v4524_v45  ;;  %6514 = vmatprep.subr.mxu0 %v8796_v9 }
 0x3d7   : > { %10225 = vst [vmem:[#allocation50_spill] sm:$0xff] %v9200_v29  ;;  %6501 = vmatpush3.msra.mxu1 %v4518_v26  ;;  %v10031_v23 = vand.u32 4294901760, %v9200_v29  ;;  %v4644_v4 = vand.u32 4294901760, %v4643_v11  ;;  %v4531_v26 = vsub.f32 %v9190_v59, %v10020_v40 }
 0x3d8   : > { %6502 = vmatprep.subr.mxu1 %v4637_v21  ;;  %v4650_v53 = vsub.f32 %v9193_v49, %v10024_v42 }
 0x3d9   : > { %6503 = vmatpush3.msra.mxu1 %v4525_v62  ;;  %v4538_v24 = vsub.f32 %v9200_v29, %v10031_v23  ;;  %v4532_v45 = vand.u32 4294901760, %v4531_v26 }
 0x3da   : > { %6504 = vmatprep.subr.mxu1 %v4644_v4  ;;  %v4651_v13 = vand.u32 4294901760, %v4650_v53 }
 0x3db   : > { %v4539_v2 = vand.u32 4294901760, %v4538_v24  ;;  %6505 = vmatpush3.msra.mxu1 %v4532_v45 }
 0x3dc   : > { %6506 = vmatprep.subr.mxu1 %v4651_v13 }
 0x3dd   : > { %6507 = vmatpush3.msra.mxu1 %v4539_v2 }
 0x3de   : > { %6552 = vmatprep.subr.mxu1 %v8766_v27 }
 0x453   : > { %v7074_v21 = vpop.f32.mrf.mxu0 }
 0x455   : > { %v3365_v11 = vpop.f32.mrf.mxu0 }
 0x457   : > { %v7088_v40 = vpop.f32.mrf.mxu0 }
 0x459   : > { %v3538_v62 = vpop.f32.mrf.mxu0 }
 0x45c   : > { %v7081_v9 = vpop.f32.mrf.mxu1 }
 0x45d   : > { %v3463_v59 = vadd.f32 %v7081_v9, %v7074_v21  ;;  %v7102_v4 = vpop.f32.mrf.mxu0  ;;  %v10234_v21 = vld [vmem:[#allocation29_spill] sm:$0xff] }
 0x45e   : > { %v3456_v42 = vpop.f32.mrf.mxu1 }
 0x45f   : > { %v3546_v49 = vadd.f32 %v7088_v40, %v3463_v59  ;;  %v3457_v32 = vadd.f32 %v3456_v42, %v3365_v11  ;;  %v3705_v13 = vpop.f32.mrf.mxu0  ;;  %v10232_v40 = vld [vmem:[#allocation28_spill] sm:$0xff]  ;;  %v10233_v42 = vld [vmem:[#allocation38_spill] sm:$0xff]  ;;  %v10235_v11 = vld [vmem:[#allocation15_spill] sm:$0xff] }
 0x461   : > { %v3539_v22 = vadd.f32 %v3538_v62, %v3457_v32  ;;  %v10236_v62 = vld [vmem:[#allocation30_spill] sm:$0xff] }
 0x462   : > { %v7095_v23 = vpop.f32.mrf.mxu1 }
 0x463   : > { %v3629_v26 = vadd.f32 %v7095_v23, %v3546_v49  ;;  %v10230_v23 = vld [vmem:[#allocation37_spill] sm:$0xff] }
 0x464   : > { %v3620_v53 = vpop.f32.mrf.mxu1 }
 0x465   : > { %v3712_v24 = vadd.f32 %v7102_v4, %v3629_v26  ;;  %v3621_v45 = vadd.f32 %v3620_v53, %v3539_v22  ;;  %v10237_v4 = vld [vmem:[#allocation40_spill] sm:$0xff]  ;;  %v10238_v26 = vld [vmem:[#allocation31_spill] sm:$0xff]  ;;  %v10239_v53 = vld [vmem:[#allocation34_spill] sm:$0xff] }
 0x467   : > { %v3706_v2 = vadd.f32 %v3705_v13, %v3621_v45  ;;  %v10241_v45 = vld [vmem:[#allocation45_spill] sm:$0xff]  ;;  %v10242_v13 = vld [vmem:[#allocation47_spill] sm:$0xff] }
 0x468   : > { %v7109_v29 = vpop.f32.mrf.mxu1 }
 0x469   : > { %v3791_v27 = vadd.f32 %v7109_v29, %v3712_v24  ;;  %v10231_v29 = vld [vmem:[#allocation46_spill] sm:$0xff]  ;;  %v10240_v24 = vld [vmem:[#allocation13_spill] sm:$0xff] }
 0x46a   : > { %v3784_v34 = vpop.f32.mrf.mxu1 }
 0x46b   : > { %v9221_v14 = vand.u32 4294901760, %v3791_v27  ;;  %v3785_v3 = vadd.f32 %v3784_v34, %v3706_v2  ;;  %v10243_v2 = vld [vmem:[#allocation35_spill] sm:$0xff] }
 0x46d   : > { %10226 = vst [vmem:[#allocation11_spill] sm:$0xff] %v9221_v14  ;;  %v9223_v9 = vand.u32 4294901760, %v3785_v3  ;;  %v9226_v59 = vsub.f32 %v3791_v27, %v9221_v14 }
 0x46f   : > { %10227 = vst [vmem:[#allocation49_spill] sm:$0xff] %v9223_v9  ;;  %v9229_v32 = vsub.f32 %v3785_v3, %v9223_v9  ;;  %4656 = vmatmul.mubr.f32.vlgmr.msra.gmra.mxu1 %v9223_v9  ;;  %v10041_v49 = vand.u32 4294901760, %v9226_v59  ;;  %v10251_v9 = vld [vmem:[#allocation44_spill] sm:$0xff] }
 0x470   : > { %6553 = vmatpush3.msra.mxu1 %v8773_v48  ;;  %4661 = vmatprep.mubr.f32.mxu1 %v8698_v56  ;;  %v10250_v56 = vld [vmem:[#allocation43_spill] sm:$0xff] }
 0x471   : > { %v4406_v22 = vand.u32 4294901760, %v9229_v32  ;;  %6554 = vmatprep.subr.mxu1 %v8780_v47  ;;  %v4422_v3 = vsub.f32 %v9226_v59, %v10041_v49  ;;  %v10248_v49 = vld [vmem:[#allocation33_spill] sm:$0xff] }
 0x472   : > { %6555 = vmatpush3.msra.mxu1 %v8787_v28 }
 0x473   : > { %v4407_v27 = vsub.f32 %v9229_v32, %v4406_v22  ;;  %6556 = vmatprep.subr.mxu1 %v8798_v41  ;;  %4663 = vmatmul.mubr.f32.gmra.mxu1 %v9221_v14  ;;  %v10249_v14 = vld [vmem:[#allocation41_spill] sm:$0xff] }
 0x474   : > { %6557 = vmatpush3.msra.mxu1 %v8808_v16  ;;  %4914 = vmatprep.mubr.f32.mxu1 %v8709_v5  ;;  %v4423_v5 = vand.u32 4294901760, %v4422_v3  ;;  %v10246_v3 = vld [vmem:[#allocation26_spill] sm:$0xff] }
 0x475   : > { %6558 = vmatprep.subr.mxu1 %v8819_v46  ;;  %v4408_v34 = vand.u32 4294901760, %v4407_v27  ;;  %v10244_v27 = vld [vmem:[#allocation48_spill] sm:$0xff] }
 0x476   : > { %6559 = vmatpush3.msra.mxu1 %v8829_v25 }
 0x477   : > { %6560 = vmatprep.subr.mxu1 %v8840_v44  ;;  %4409 = vmatmul.mubr.f32.vlgmr.msra.gmra.mxu0 %v4408_v34  ;;  %v10245_v34 = vld [vmem:[#allocation22_spill] sm:$0xff] }
 0x478   : > { %6515 = vmatpush3.msra.mxu0 %v8806_v8  ;;  %6561 = vmatpush3.msra.mxu1 %v8851_v55 }
 0x479   : > { %4418 = vmatprep.mubr.f32.mxu0 %v8725_v54  ;;  %6516 = vmatprep.subr.mxu0 %v8817_v57  ;;  %v10229_v54 = vld [vmem:[#allocation42_spill] sm:$0xff] }
 0x47a   : > { %6562 = vmatprep.subr.mxu1 %v8863_v36  ;;  %6517 = vmatpush3.msra.mxu0 %v8827_v20 }
 0x47b   : > { %6563 = vmatpush3.msra.mxu1 %v8875_v31  ;;  %6518 = vmatprep.subr.mxu0 %v8838_v61 }
 0x47c   : > { %6564 = vmatprep.subr.mxu1 %v8890_v63  ;;  %4424 = vmatmul.mubr.f32.gmra.mxu0 %v4423_v5  ;;  %v10247_v5 = vld [vmem:[#allocation39_spill] sm:$0xff] }
 0x47d   : > { %6519 = vmatpush3.msra.mxu0 %v8849_v39  ;;  %6565 = vmatpush3.msra.mxu1 %v8902_v1 }
 0x47e   : > { %6520 = vmatprep.subr.mxu0 %v8861_v15  ;;  %4798 = vmatprep.mubr.f32.mxu0 %v8701_v18  ;;  %v10228_v18 = vld [vmem:[#allocation27_spill] sm:$0xff] }
 0x47f   : > { %6566 = vmatprep.subr.mxu1 %v8913_v10  ;;  %6521 = vmatpush3.msra.mxu0 %v8873_v37 }
 0x480   : > { %6567 = vmatpush3.msra.mxu1 %v9004_v50  ;;  %6522 = vmatprep.subr.mxu0 %v8888_v38 }
 0x481   : > { %6568 = vmatprep.subr.mxu1 %v9006_v6  ;;  %6523 = vmatpush3.msra.mxu0 %v8900_v60 }
 0x482   : > { %6569 = vmatpush3.msra.mxu1 %v9017_v12  ;;  %6524 = vmatprep.subr.mxu0 %v8911_v33 }
 0x483   : > { %6570 = vmatprep.subr.mxu1 %v9030_v19  ;;  %6525 = vmatpush3.msra.mxu0 %v8922_v35 }
 0x484   : > { %6571 = vmatpush3.msra.mxu1 %v9042_v43  ;;  %6526 = vmatprep.subr.mxu0 %v8931_v17 }
 0x485   : > { %6572 = vmatprep.subr.mxu1 %v9050_v58  ;;  %6527 = vmatpush3.msra.mxu0 %v8941_v30 }
 0x486   : > { %6573 = vmatpush3.msra.mxu1 %v9070_v7  ;;  %6528 = vmatprep.subr.mxu0 %v8950_v52 }
 0x487   : > { %6574 = vmatprep.subr.mxu1 %v9072_v51  ;;  %6529 = vmatpush3.msra.mxu0 %v10228_v18 }
 0x488   : > { %6575 = vmatpush3.msra.mxu1 %v10229_v54  ;;  %6530 = vmatprep.subr.mxu0 %v10230_v23 }
 0x489   : > { %6576 = vmatprep.subr.mxu1 %v10231_v29  ;;  %6531 = vmatpush3.msra.mxu0 %v10232_v40 }
 0x48a   : > { %6577 = vmatpush3.msra.mxu1 %v10233_v42  ;;  %6532 = vmatprep.subr.mxu0 %v10234_v21 }
 0x48b   : > { %6578 = vmatprep.subr.mxu1 %v10235_v11  ;;  %6533 = vmatpush3.msra.mxu0 %v10236_v62 }
 0x48c   : > { %6579 = vmatpush3.msra.mxu1 %v10237_v4  ;;  %6534 = vmatprep.subr.mxu0 %v10238_v26 }
 0x48d   : > { %6580 = vmatprep.subr.mxu1 %v9157_v0  ;;  %6535 = vmatpush3.msra.mxu0 %v10239_v53 }
 0x48e   : > { %6581 = vmatpush3.msra.mxu1 %v10240_v24  ;;  %6536 = vmatprep.subr.mxu0 %v10241_v45 }
 0x48f   : > { %6582 = vmatprep.subr.mxu1 %v10242_v13  ;;  %6537 = vmatpush3.msra.mxu0 %v10243_v2 }
 0x490   : > { %6583 = vmatpush3.msra.mxu1 %v10244_v27  ;;  %6538 = vmatprep.subr.mxu0 %v10245_v34 }
 0x491   : > { %4918 = vmatmul.mubr.f32.vlgmr.msra.gmra.mxu1 %v4406_v22  ;;  %6628 = vmatprep.subr.mxu1 %v10246_v3  ;;  %v10252_v22 = vand.u32 4294901760, %v9226_v59  ;;  %v10253_v3 = vld [vmem:[#allocation23_spill] sm:$0xff] }
 0x492   : > { %6539 = vmatpush3.msra.mxu0 %v10247_v5  ;;  %4925 = vmatprep.mubr.f32.mxu1 %v10248_v49  ;;  %v10255_v49 = vld [vmem:[#allocation12_spill] sm:$0xff] }
 0x493   : > { %6629 = vmatpush3.msra.mxu1 %v8773_v48  ;;  %6540 = vmatprep.subr.mxu0 %v10249_v14  ;;  %v10254_v48 = vld [vmem:[#allocation24_spill] sm:$0xff] }
 0x494   : > { %6630 = vmatprep.subr.mxu1 %v8780_v47  ;;  %6541 = vmatpush3.msra.mxu0 %v10250_v56  ;;  %v10256_v47 = vld [vmem:[#allocation50_spill] sm:$0xff] }
 0x495   : > { %6631 = vmatpush3.msra.mxu1 %v8787_v28  ;;  %6542 = vmatprep.subr.mxu0 %v10251_v9  ;;  %v10257_v28 = vld [vmem:[#allocation36_spill] sm:$0xff] }
 0x496   : > { %4929 = vmatmul.mubr.f32.gmra.mxu1 %v10252_v22  ;;  %6632 = vmatprep.subr.mxu1 %v8798_v41  ;;  %v10258_v22 = vand.u32 4294901760, %v10257_v28  ;;  %v10259_v41 = vld [vmem:[#allocation25_spill] sm:$0xff]  ;;  %v9414_v28 = vpop.f32.mrf.mxu1 }
 0x497   : > { %6543 = vmatpush3.msra.mxu0 %v10253_v3  ;;  %6633 = vmatpush3.msra.mxu1 %v8808_v16  ;;  %v10260_v16 = vand.u32 4294901760, %v8806_v8  ;;  %v10263_v8 = vand.u32 4294901760, %v8838_v61  ;;  %v10266_v61 = vand.u32 4294901760, %v8873_v37  ;;  %v3185_v37 = vld [vmem:[%s9850_s6 + $0x160] sm:$0xff] }
 0x498   : > { %5206 = vmatprep.mubr.f32.mxu1 %v10254_v48  ;;  %6544 = vmatprep.subr.mxu0 %v10255_v49 }
 0x499   : > { %6634 = vmatprep.subr.mxu1 %v8819_v46  ;;  %6545 = vmatpush3.msra.mxu0 %v10256_v47  ;;  %v10261_v46 = vand.u32 4294901760, %v8817_v57  ;;  %v10264_v57 = vand.u32 4294901760, %v8849_v39  ;;  %v3186_v39 = vld [vmem:[%s9850_s6 + $0x168] sm:$0xff] }
 0x49a   : > { %6635 = vmatpush3.msra.mxu1 %v8829_v25  ;;  %4801 = vmatmul.mubr.f32.vlgmr.msra.gmra.mxu0 %v9229_v32  ;;  %v10262_v25 = vand.u32 4294901760, %v8827_v20  ;;  %v3188_v32 = vld [vmem:[%s9850_s6 + $0x178] sm:$0xff] }
 0x49b   : > { %6590 = vmatprep.subr.mxu0 %v10258_v22  ;;  %6636 = vmatprep.subr.mxu1 %v8840_v44  ;;  %v9345_v20 = vand.u32 4294901760, %v3188_v32  ;;  %v3187_v44 = vld [vmem:[%s9850_s6 + $0x170] sm:$0xff] }
 0x49c   : > { %4807 = vmatprep.mubr.f32.mxu0 %v10259_v41  ;;  %6591 = vmatpush3.msra.mxu0 %v10260_v16  ;;  %v10277_v41 = vand.u32 4294901760, %v10234_v21 }
 0x49d   : > { %6637 = vmatpush3.msra.mxu1 %v8851_v55  ;;  %6592 = vmatprep.subr.mxu0 %v10261_v46  ;;  %v10265_v55 = vand.u32 4294901760, %v8861_v15  ;;  %v10268_v15 = vand.u32 4294901760, %v8900_v60  ;;  %v9381_v60 = vpop.f32.mrf.mxu0 }
 0x49e   : > { %6638 = vmatprep.subr.mxu1 %v8863_v36  ;;  %6593 = vmatpush3.msra.mxu0 %v10262_v25  ;;  %v10267_v36 = vand.u32 4294901760, %v8888_v38  ;;  %v9376_v38 = vand.u32 4294901760, %v3186_v39  ;;  %v3958_v25 = vpop.f32.mrf.mxu1 }
 0x49f   : > { %6639 = vmatpush3.msra.mxu1 %v8875_v31  ;;  %4810 = vmatmul.mubr.f32.gmra.mxu0 %v9226_v59  ;;  %v9362_v31 = vand.u32 4294901760, %v3187_v44  ;;  %v3183_v59 = vld [vmem:[%s9850_s6 + $0x150] sm:$0xff] }
 0x4a0   : > { %6594 = vmatprep.subr.mxu0 %v10263_v8  ;;  %6640 = vmatprep.subr.mxu1 %v8890_v63  ;;  %v9368_v63 = vsub.f32 %v3188_v32, %v9345_v20  ;;  %v10279_v32 = vand.u32 4294901760, %v10238_v26  ;;  %v10281_v26 = vand.u32 4294901760, %v10241_v45 }
 0x4a1   : > { %6595 = vmatpush3.msra.mxu0 %v10264_v57  ;;  %5095 = vmatprep.mubr.f32.mxu0 %v10254_v48  ;;  %v3867_v48 = vpop.f32.mrf.mxu0 }
 0x4a2   : > { %6641 = vmatpush3.msra.mxu1 %v8902_v1  ;;  %6596 = vmatprep.subr.mxu0 %v10265_v55  ;;  %v10269_v1 = vand.u32 4294901760, %v8911_v33  ;;  %v3184_v33 = vld [vmem:[%s9850_s6 + $0x158] sm:$0xff] }
 0x4a3   : > { %6642 = vmatprep.subr.mxu1 %v8913_v10  ;;  %6597 = vmatpush3.msra.mxu0 %v10266_v61  ;;  %v10270_v10 = vand.u32 4294901760, %v8922_v35  ;;  %v10272_v35 = vand.u32 4294901760, %v8941_v30  ;;  %v10274_v30 = vand.u32 4294901760, %v10228_v18  ;;  %v10276_v18 = vand.u32 4294901760, %v10232_v40  ;;  %v3179_v61 = vld [vmem:[%s9850_s6 + $0x130] sm:$0xff] }
 0x4a4   : > { %6643 = vmatpush3.msra.mxu1 %v9004_v50  ;;  %6598 = vmatprep.subr.mxu0 %v10267_v36  ;;  %v10271_v50 = vand.u32 4294901760, %v8931_v17  ;;  %v10273_v17 = vand.u32 4294901760, %v8950_v52  ;;  %v10275_v52 = vand.u32 4294901760, %v10230_v23  ;;  %v9433_v23 = vand.u32 4294901760, %v3183_v59 }
 0x4a5   : > { %6644 = vmatprep.subr.mxu1 %v9006_v6  ;;  %6599 = vmatpush3.msra.mxu0 %v10268_v15  ;;  %v9387_v6 = vsub.f32 %v3187_v44, %v9362_v31  ;;  %v10278_v40 = vand.u32 4294901760, %v10236_v62  ;;  %v10280_v62 = vand.u32 4294901760, %v10239_v53  ;;  %v3959_v53 = vadd.f32 %v3958_v25, %v3867_v48  ;;  %v9490_v15 = vpop.f32.mrf.mxu1 }
 0x4a6   : > { %6645 = vmatpush3.msra.mxu1 %v9017_v12  ;;  %6600 = vmatprep.subr.mxu0 %v10269_v1  ;;  %v9389_v12 = vand.u32 4294901760, %v3185_v37  ;;  %v9466_v44 = vsub.f32 %v3183_v59, %v9433_v23  ;;  %v10287_v48 = vand.u32 4294901760, %v10249_v14  ;;  %v10289_v25 = vand.u32 4294901760, %v10251_v9 }
 0x4a7   : > { %6646 = vmatprep.subr.mxu1 %v9030_v19  ;;  %6601 = vmatpush3.msra.mxu0 %v10270_v10  ;;  %v9398_v19 = vand.u32 4294901760, %v9368_v63  ;;  %v10284_v10 = vld [vmem:[#allocation49_spill] sm:$0xff]  ;;  %v10291_v9 = vand.u32 4294901760, %v10253_v3 }
 0x4a8   : > { %6647 = vmatpush3.msra.mxu1 %v9042_v43  ;;  %6602 = vmatprep.subr.mxu0 %v10271_v50  ;;  %v9404_v43 = vsub.f32 %v3186_v39, %v9376_v38  ;;  %v9423_v22 = vsub.f32 %v3185_v37, %v9389_v12  ;;  %v10282_v39 = vand.u32 4294901760, %v10243_v2  ;;  %v10283_v37 = vand.u32 4294901760, %v10245_v34 }
 0x4a9   : > { %6648 = vmatprep.subr.mxu1 %v9050_v58  ;;  %6603 = vmatpush3.msra.mxu0 %v10272_v35  ;;  %v9412_v58 = vand.u32 4294901760, %v3184_v33  ;;  %v9501_v50 = vand.u32 4294901760, %v9466_v44  ;;  %v9506_v35 = vand.u32 4294901760, %v3179_v61  ;;  %v10285_v34 = vand.u32 4294901760, %v10247_v5  ;;  %v3177_v5 = vld [vmem:[%s9850_s6 + $0x120] sm:$0xff] }
 0x4aa   : > { %6649 = vmatpush3.msra.mxu1 %v9070_v7  ;;  %6604 = vmatprep.subr.mxu0 %v10273_v17  ;;  %v9420_v7 = vand.u32 4294901760, %v9387_v6  ;;  %v9439_v16 = vand.u32 4294901760, %v9404_v43  ;;  %v10286_v17 = vld [vmem:[#allocation32_spill] sm:$0xff] }
 0x4ab   : > { %6650 = vmatprep.subr.mxu1 %v9072_v51  ;;  %6605 = vmatpush3.msra.mxu0 %v10274_v30  ;;  %v3182_v51 = vld [vmem:[%s9850_s6 + $0x148] sm:$0xff]  ;;  %v9448_v46 = vsub.f32 %v3184_v33, %v9412_v58 }
 0x4ac   : > { %6651 = vmatpush3.msra.mxu1 %v10229_v54  ;;  %6606 = vmatprep.subr.mxu0 %v10275_v52  ;;  %v5325_v54 = vsub.f32 %v9368_v63, %v9398_v19  ;;  %v9452_v21 = vand.u32 4294901760, %v3182_v51  ;;  %v5332_v8 = vsub.f32 %v9387_v6, %v9420_v7 }
 0x4ad   : > { %6652 = vmatprep.subr.mxu1 %v10231_v29  ;;  %6607 = vmatpush3.msra.mxu0 %v10276_v18  ;;  %v3181_v29 = vld [vmem:[%s9850_s6 + $0x140] sm:$0xff]  ;;  %v9485_v36 = vand.u32 4294901760, %v9448_v46  ;;  %v4122_v18 = vpop.f32.mrf.mxu1 }
 0x4ae   : > { %6653 = vmatpush3.msra.mxu1 %v10233_v42  ;;  %6608 = vmatprep.subr.mxu0 %v10277_v41  ;;  %v9450_v42 = vpop.f32.mrf.mxu0  ;;  %v5326_v57 = vand.u32 4294901760, %v5325_v54  ;;  %v9468_v55 = vand.u32 4294901760, %v3181_v29  ;;  %v5333_v1 = vand.u32 4294901760, %v5332_v8  ;;  %v10288_v41 = vand.u32 4294901760, %v10250_v56  ;;  %v3176_v56 = vld [vmem:[%s9850_s6 + $0x118] sm:$0xff] }
 0x4af   : > { %6654 = vmatprep.subr.mxu1 %v10235_v11  ;;  %6609 = vmatpush3.msra.mxu0 %v10278_v40  ;;  %v9460_v11 = vand.u32 4294901760, %v9423_v22  ;;  %v5353_v52 = vsub.f32 %v9448_v46, %v9485_v36 }
 0x4b0   : > { %6655 = vmatpush3.msra.mxu1 %v10237_v4  ;;  %6610 = vmatprep.subr.mxu0 %v10279_v32  ;;  %v3180_v4 = vld [vmem:[%s9850_s6 + $0x138] sm:$0xff]  ;;  %v4040_v45 = vpop.f32.mrf.mxu0  ;;  %v9504_v33 = vsub.f32 %v3181_v29, %v9468_v55  ;;  %v5360_v32 = vsub.f32 %v9466_v44, %v9501_v50 }
 0x4b1   : > { %6656 = vmatprep.subr.mxu1 %v9157_v0  ;;  %6611 = vmatpush3.msra.mxu0 %v10280_v62  ;;  %v5339_v0 = vsub.f32 %v9404_v43, %v9439_v16  ;;  %v9497_v2 = vand.u32 4294901760, %v3180_v4  ;;  %v4041_v30 = vadd.f32 %v4040_v45, %v3959_v53  ;;  %v9541_v62 = vsub.f32 %v3179_v61, %v9506_v35  ;;  %v9555_v45 = vpop.f32.mrf.mxu1 }
 0x4b2   : > { %6657 = vmatpush3.msra.mxu1 %v10240_v24  ;;  %6612 = vmatprep.subr.mxu0 %v10281_v26  ;;  %v9488_v24 = vsub.f32 %v3182_v51, %v9452_v21  ;;  %v9521_v54 = vpop.f32.mrf.mxu0  ;;  %v9538_v8 = vand.u32 4294901760, %v9504_v33  ;;  %v9547_v26 = vand.u32 4294901760, %v3177_v5  ;;  %v3965_v53 = vadd.f32 %v9414_v28, %v9381_v60 }
 0x4b3   : > { %6658 = vmatprep.subr.mxu1 %v10242_v13  ;;  %6613 = vmatpush3.msra.mxu0 %v10282_v39  ;;  %v5346_v13 = vsub.f32 %v9423_v22, %v9460_v11  ;;  %v5340_v59 = vand.u32 4294901760, %v5339_v0  ;;  %v9529_v14 = vsub.f32 %v3180_v4, %v9497_v2  ;;  %v4123_v4 = vadd.f32 %v4122_v18, %v4041_v30  ;;  %v3174_v30 = vld [vmem:[%s9850_s6 + $0x108] sm:$0xff] }
 0x4b4   : > { %6659 = vmatpush3.msra.mxu1 %v10244_v27  ;;  %6614 = vmatprep.subr.mxu0 %v10283_v37  ;;  %v3178_v27 = vld [vmem:[%s9850_s6 + $0x128] sm:$0xff]  ;;  %v9519_v51 = vand.u32 4294901760, %v9488_v24  ;;  %v5354_v0 = vand.u32 4294901760, %v5353_v52  ;;  %v4207_v39 = vpop.f32.mrf.mxu0  ;;  %v3175_v37 = vld [vmem:[%s9850_s6 + $0x110] sm:$0xff]  ;;  %v9568_v60 = vand.u32 4294901760, %v3176_v56  ;;  %v10293_v28 = vand.u32 4294901760, %v10256_v47 }
 0x4b5   : > { %5208 = vmatmul.mubr.f32.vlgmr.msra.gmra.mxu1 %v10284_v10  ;;  %7187 = vmatprep.subr.mxu1 %v5326_v57  ;;  %v5347_v29 = vand.u32 4294901760, %v5346_v13  ;;  %v9531_v40 = vand.u32 4294901760, %v3178_v27  ;;  %v9563_v3 = vand.u32 4294901760, %v9529_v14  ;;  %v9583_v47 = vsub.f32 %v3177_v5, %v9547_v26 }
 0x4b6   : > { %6615 = vmatpush3.msra.mxu0 %v10285_v34  ;;  %5213 = vmatprep.mubr.f32.mxu1 %v10286_v17  ;;  %v5367_v61 = vsub.f32 %v9488_v24, %v9519_v51  ;;  %v5361_v34 = vand.u32 4294901760, %v5360_v32  ;;  %v4048_v52 = vadd.f32 %v9450_v42, %v3965_v53 }
 0x4b7   : > { %7188 = vmatpush3.msra.mxu1 %v5326_v57  ;;  %6616 = vmatprep.subr.mxu0 %v10287_v48  ;;  %v10290_v57 = vld [vmem:[#allocation11_spill] sm:$0xff]  ;;  %v9566_v13 = vsub.f32 %v3178_v27, %v9531_v40  ;;  %v4208_v27 = vadd.f32 %v4207_v39, %v4123_v4  ;;  %v9585_v48 = vand.u32 4294901760, %v3175_v37 }
 0x4b8   : > { %7189 = vmatprep.subr.mxu1 %v5333_v1  ;;  %6617 = vmatpush3.msra.mxu0 %v10288_v41  ;;  %v5368_v18 = vand.u32 4294901760, %v5367_v61  ;;  %v4286_v41 = vpop.f32.mrf.mxu1  ;;  %v4131_v53 = vadd.f32 %v9490_v15, %v4048_v52 }
 0x4b9   : > { %7190 = vmatpush3.msra.mxu1 %v5333_v1  ;;  %6618 = vmatprep.subr.mxu0 %v10289_v25  ;;  %v10292_v1 = vand.u32 4294901760, %v10255_v49  ;;  %v9575_v49 = vand.u32 4294901760, %v9541_v62  ;;  %v9596_v5 = vand.u32 4294901760, %v9566_v13  ;;  %v9599_v25 = vsub.f32 %v3176_v56, %v9568_v60 }
 0x4ba   : > { %5215 = vmatmul.mubr.f32.gmra.mxu1 %v10290_v57  ;;  %7191 = vmatprep.subr.mxu1 %v5340_v59  ;;  %v4287_v4 = vadd.f32 %v4286_v41, %v4208_v27 }
 0x4bb   : > { %6619 = vmatpush3.msra.mxu0 %v10291_v9  ;;  %7192 = vmatpush3.msra.mxu1 %v5340_v59  ;;  %v5374_v59 = vsub.f32 %v9504_v33, %v9538_v8  ;;  %v5388_v32 = vsub.f32 %v9541_v62, %v9575_v49  ;;  %v9608_v9 = vand.u32 4294901760, %v9583_v47  ;;  %v5395_v39 = vsub.f32 %v9566_v13, %v9596_v5 }
 0x4bc   : > { %6620 = vmatprep.subr.mxu0 %v10292_v1  ;;  %7193 = vmatprep.subr.mxu1 %v5347_v29  ;;  %v9622_v1 = vand.u32 4294901760, %v9599_v25  ;;  %v9629_v15 = vand.u32 4294901760, %v4287_v4 }
 0x4bd   : > { %6621 = vmatpush3.msra.mxu0 %v10293_v28  ;;  %7194 = vmatpush3.msra.mxu1 %v5347_v29  ;;  %v3173_v29 = vld [vmem:[%s9850_s6 + $0x100] sm:$0xff]  ;;  %v5375_v42 = vand.u32 4294901760, %v5374_v59  ;;  %v5402_v28 = vsub.f32 %v9583_v47, %v9608_v9  ;;  %v5396_v27 = vand.u32 4294901760, %v5395_v39 }
 0x4be   : > { %5097 = vmatmul.mubr.f32.vlgmr.msra.gmra.mxu0 %v10284_v10  ;;  %7152 = vmatprep.subr.mxu0 %v9345_v20  ;;  %v5381_v10 = vsub.f32 %v9529_v14, %v9563_v3  ;;  %v9613_v56 = vand.u32 4294901760, %v3173_v29  ;;  %v5409_v52 = vsub.f32 %v9599_v25, %v9622_v1 }
 0x4bf   : > { %7195 = vmatprep.subr.mxu1 %v5354_v0  ;;  %5102 = vmatprep.mubr.f32.mxu0 %v10286_v17  ;;  %v9601_v17 = vand.u32 4294901760, %v3174_v30  ;;  %v5403_v41 = vand.u32 4294901760, %v5402_v28 }
 0x4c0   : > { %7153 = vmatpush3.msra.mxu0 %v9345_v20  ;;  %7196 = vmatpush3.msra.mxu1 %v5354_v0  ;;  %v9611_v0 = vsub.f32 %v3175_v37, %v9585_v48  ;;  %v5382_v61 = vand.u32 4294901760, %v5381_v10  ;;  %v9637_v59 = vsub.f32 %v3173_v29, %v9613_v56 }
 0x4c1   : > { %7154 = vmatprep.subr.mxu0 %v9362_v31  ;;  %7197 = vmatprep.subr.mxu1 %v5361_v34  ;;  %v9625_v37 = vsub.f32 %v3174_v30, %v9601_v17  ;;  %v4214_v30 = vadd.f32 %v9521_v54, %v4131_v53  ;;  %v9650_v54 = vsub.f32 %v4287_v4, %v9629_v15 }
 0x4c2   : > { %7155 = vmatpush3.msra.mxu0 %v9362_v31  ;;  %7198 = vmatpush3.msra.mxu1 %v5361_v34  ;;  %v9634_v34 = vand.u32 4294901760, %v9611_v0  ;;  %v9655_v10 = vand.u32 4294901760, %v9637_v59 }
 0x4c3   : > { %5104 = vmatmul.mubr.f32.gmra.mxu0 %v10290_v57  ;;  %7156 = vmatprep.subr.mxu0 %v9376_v38  ;;  %v5389_v57 = vand.u32 4294901760, %v5388_v32  ;;  %v5410_v32 = vand.u32 4294901760, %v5409_v52 }
 0x4c4   : > { %7199 = vmatprep.subr.mxu1 %v5368_v18  ;;  %7157 = vmatpush3.msra.mxu0 %v9376_v38  ;;  %v5416_v29 = vsub.f32 %v9611_v0, %v9634_v34 }
 0x4c5   : > { %7200 = vmatpush3.msra.mxu1 %v5368_v18  ;;  %7158 = vmatprep.subr.mxu0 %v9389_v12  ;;  %v9645_v18 = vand.u32 4294901760, %v9625_v37 }
 0x4c6   : > { %7201 = vmatprep.subr.mxu1 %v5375_v42  ;;  %7159 = vmatpush3.msra.mxu0 %v9389_v12  ;;  %v5417_v53 = vand.u32 4294901760, %v5416_v29 }
 0x4c7   : > { %7202 = vmatpush3.msra.mxu1 %v5375_v42  ;;  %7160 = vmatprep.subr.mxu0 %v9412_v58  ;;  %v4293_v42 = vadd.f32 %v9555_v45, %v4214_v30  ;;  %v5423_v4 = vsub.f32 %v9625_v37, %v9645_v18  ;;  %v5430_v45 = vsub.f32 %v9637_v59, %v9655_v10 }
 0x4c8   : > { %7203 = vmatprep.subr.mxu1 %v5382_v61  ;;  %7161 = vmatpush3.msra.mxu0 %v9412_v58 }
 0x4c9   : > { %7204 = vmatpush3.msra.mxu1 %v5382_v61  ;;  %7162 = vmatprep.subr.mxu0 %v9433_v23  ;;  %v5303_v61 = vand.u32 4294901760, %v9650_v54  ;;  %v9667_v39 = vand.u32 4294901760, %v4293_v42  ;;  %v5431_v28 = vand.u32 4294901760, %v5430_v45 }
 0x4ca   : > { %7205 = vmatprep.subr.mxu1 %v5389_v57  ;;  %7163 = vmatpush3.msra.mxu0 %v9433_v23 }
 0x4cb   : > { %7206 = vmatpush3.msra.mxu1 %v5389_v57  ;;  %7164 = vmatprep.subr.mxu0 %v9452_v21  ;;  %v5424_v57 = vand.u32 4294901760, %v5423_v4  ;;  %v5304_v30 = vsub.f32 %v9650_v54, %v5303_v61 }
 0x4cc   : > { %7207 = vmatprep.subr.mxu1 %v5396_v27  ;;  %7165 = vmatpush3.msra.mxu0 %v9452_v21 }
 0x4cd   : > { %7208 = vmatpush3.msra.mxu1 %v5396_v27  ;;  %7166 = vmatprep.subr.mxu0 %v9468_v55  ;;  %v9675_v27 = vsub.f32 %v4293_v42, %v9667_v39  ;;  %v5305_v52 = vand.u32 4294901760, %v5304_v30 }
 0x4ce   : > { %7209 = vmatprep.subr.mxu1 %v5403_v41  ;;  %7167 = vmatpush3.msra.mxu0 %v9468_v55 }
 0x4cf   : > { %7210 = vmatpush3.msra.mxu1 %v5403_v41  ;;  %7168 = vmatprep.subr.mxu0 %v9497_v2  ;;  %v5313_v41 = vand.u32 4294901760, %v9675_v27 }
 0x4d0   : > { %7211 = vmatprep.subr.mxu1 %v5410_v32  ;;  %7169 = vmatpush3.msra.mxu0 %v9497_v2 }
 0x4d1   : > { %7212 = vmatpush3.msra.mxu1 %v5410_v32  ;;  %7170 = vmatprep.subr.mxu0 %v9506_v35  ;;  %v5314_v29 = vsub.f32 %v9675_v27, %v5313_v41 }
 0x4d2   : > { %7213 = vmatprep.subr.mxu1 %v5417_v53  ;;  %7171 = vmatpush3.msra.mxu0 %v9506_v35 }
 0x4d3   : > { %7214 = vmatpush3.msra.mxu1 %v5417_v53  ;;  %7172 = vmatprep.subr.mxu0 %v9531_v40  ;;  %v5315_v42 = vand.u32 4294901760, %v5314_v29 }
 0x4d4   : > { %7215 = vmatprep.subr.mxu1 %v5424_v57  ;;  %7173 = vmatpush3.msra.mxu0 %v9531_v40 }
 0x4d5   : > { %7216 = vmatpush3.msra.mxu1 %v5424_v57  ;;  %7219 = vmatprep.mubr.f32.mxu1 %v9629_v15 }
 0x4d6   : > { %7174 = vmatprep.subr.mxu0 %v9547_v26  ;;  %7217 = vmatprep.subr.mxu1 %v5431_v28 }
 0x4d7   : > { %7175 = vmatpush3.msra.mxu0 %v9547_v26  ;;  %7218 = vmatpush3.msra.mxu1 %v5431_v28 }
 0x4d8   : > { %7176 = vmatprep.subr.mxu0 %v9568_v60  ;;  %7220 = vmatmul.mubr.f32.vlgmr.msra.gmra.mxu1 %v9667_v39 }
 0x4d9   : > { %7257 = vmatprep.subr.mxu1 %v9345_v20  ;;  %7177 = vmatpush3.msra.mxu0 %v9568_v60 }
 0x4da   : > { %7184 = vmatprep.mubr.f32.mxu0 %v5305_v52  ;;  %7258 = vmatpush3.msra.mxu1 %v9345_v20 }
 0x4db   : > { %7289 = vmatprep.mubr.f32.mxu1 %v5303_v61  ;;  %7178 = vmatprep.subr.mxu0 %v9585_v48 }
 0x4dc   : > { %7259 = vmatprep.subr.mxu1 %v9362_v31  ;;  %7179 = vmatpush3.msra.mxu0 %v9585_v48 }
 0x4dd   : > { %7260 = vmatpush3.msra.mxu1 %v9362_v31  ;;  %7180 = vmatprep.subr.mxu0 %v9601_v17 }
 0x4de   : > { %7261 = vmatprep.subr.mxu1 %v9376_v38  ;;  %7181 = vmatpush3.msra.mxu0 %v9601_v17 }
 0x4df   : > { %7262 = vmatpush3.msra.mxu1 %v9376_v38  ;;  %7182 = vmatprep.subr.mxu0 %v9613_v56 }
 0x4e0   : > { %7263 = vmatprep.subr.mxu1 %v9389_v12  ;;  %7183 = vmatpush3.msra.mxu0 %v9613_v56 }
 0x4e1   : > { %7264 = vmatpush3.msra.mxu1 %v9389_v12  ;;  %7185 = vmatmul.mubr.f32.vlgmr.msra.gmra.mxu0 %v5315_v42 }
 0x4e2   : > { %7222 = vmatprep.subr.mxu0 %v9368_v63  ;;  %7265 = vmatprep.subr.mxu1 %v9412_v58 }
 0x4e3   : > { %7223 = vmatpush3.msra.mxu0 %v9368_v63  ;;  %7254 = vmatprep.mubr.f32.mxu0 %v9650_v54 }
 0x4e4   : > { %7266 = vmatpush3.msra.mxu1 %v9412_v58  ;;  %7224 = vmatprep.subr.mxu0 %v9387_v6 }
 0x4e5   : > { %7267 = vmatprep.subr.mxu1 %v9433_v23  ;;  %7225 = vmatpush3.msra.mxu0 %v9387_v6 }
 0x4e6   : > { %7268 = vmatpush3.msra.mxu1 %v9433_v23  ;;  %7226 = vmatprep.subr.mxu0 %v9404_v43 }
 0x4e7   : > { %7269 = vmatprep.subr.mxu1 %v9452_v21  ;;  %7227 = vmatpush3.msra.mxu0 %v9404_v43 }
 0x4e8   : > { %7270 = vmatpush3.msra.mxu1 %v9452_v21  ;;  %7228 = vmatprep.subr.mxu0 %v9423_v22 }
 0x4e9   : > { %7271 = vmatprep.subr.mxu1 %v9468_v55  ;;  %7229 = vmatpush3.msra.mxu0 %v9423_v22 }
 0x4ea   : > { %7272 = vmatpush3.msra.mxu1 %v9468_v55  ;;  %7230 = vmatprep.subr.mxu0 %v9448_v46 }
 0x4eb   : > { %7273 = vmatprep.subr.mxu1 %v9497_v2  ;;  %7231 = vmatpush3.msra.mxu0 %v9448_v46 }
 0x4ec   : > { %7274 = vmatpush3.msra.mxu1 %v9497_v2  ;;  %7232 = vmatprep.subr.mxu0 %v9466_v44 }
 0x4ed   : > { %7275 = vmatprep.subr.mxu1 %v9506_v35  ;;  %7233 = vmatpush3.msra.mxu0 %v9466_v44 }
 0x4ee   : > { %7276 = vmatpush3.msra.mxu1 %v9506_v35  ;;  %7234 = vmatprep.subr.mxu0 %v9488_v24 }
 0x4ef   : > { %7277 = vmatprep.subr.mxu1 %v9531_v40  ;;  %7235 = vmatpush3.msra.mxu0 %v9488_v24 }
 0x4f0   : > { %7278 = vmatpush3.msra.mxu1 %v9531_v40  ;;  %7236 = vmatprep.subr.mxu0 %v9504_v33 }
 0x4f1   : > { %7279 = vmatprep.subr.mxu1 %v9547_v26  ;;  %7237 = vmatpush3.msra.mxu0 %v9504_v33 }
 0x4f2   : > { %7280 = vmatpush3.msra.mxu1 %v9547_v26  ;;  %7238 = vmatprep.subr.mxu0 %v9529_v14 }
 0x4f3   : > { %7281 = vmatprep.subr.mxu1 %v9568_v60  ;;  %7239 = vmatpush3.msra.mxu0 %v9529_v14 }
 0x4f4   : > { %7282 = vmatpush3.msra.mxu1 %v9568_v60  ;;  %7240 = vmatprep.subr.mxu0 %v9541_v62 }
 0x4f5   : > { %7283 = vmatprep.subr.mxu1 %v9585_v48  ;;  %7241 = vmatpush3.msra.mxu0 %v9541_v62 }
 0x4f6   : > { %7284 = vmatpush3.msra.mxu1 %v9585_v48  ;;  %7242 = vmatprep.subr.mxu0 %v9566_v13 }
 0x4f7   : > { %7285 = vmatprep.subr.mxu1 %v9601_v17  ;;  %7243 = vmatpush3.msra.mxu0 %v9566_v13 }
 0x4f8   : > { %7286 = vmatpush3.msra.mxu1 %v9601_v17  ;;  %7244 = vmatprep.subr.mxu0 %v9583_v47 }
 0x4f9   : > { %7287 = vmatprep.subr.mxu1 %v9613_v56  ;;  %7245 = vmatpush3.msra.mxu0 %v9583_v47 }
 0x4fa   : > { %7288 = vmatpush3.msra.mxu1 %v9613_v56  ;;  %7246 = vmatprep.subr.mxu0 %v9599_v25 }
 0x4fb   : > { %7290 = vmatmul.mubr.f32.vlgmr.msra.gmra.mxu1 %v5313_v41  ;;  %7327 = vmatprep.subr.mxu1 %v9345_v20 }
 0x4fc   : > { %7247 = vmatpush3.msra.mxu0 %v9599_v25  ;;  %7328 = vmatpush3.msra.mxu1 %v9345_v20 }
 0x4fd   : > { %7359 = vmatprep.mubr.f32.mxu1 %v9629_v15  ;;  %7248 = vmatprep.subr.mxu0 %v9611_v0 }
 0x4fe   : > { %7329 = vmatprep.subr.mxu1 %v9362_v31  ;;  %7249 = vmatpush3.msra.mxu0 %v9611_v0 }
 0x4ff   : > { %7330 = vmatpush3.msra.mxu1 %v9362_v31  ;;  %7250 = vmatprep.subr.mxu0 %v9625_v37 }
 0x500   : > { %7331 = vmatprep.subr.mxu1 %v9376_v38  ;;  %7251 = vmatpush3.msra.mxu0 %v9625_v37 }
 0x501   : > { %7332 = vmatpush3.msra.mxu1 %v9376_v38  ;;  %7252 = vmatprep.subr.mxu0 %v9637_v59 }
 0x502   : > { %7333 = vmatprep.subr.mxu1 %v9389_v12  ;;  %7253 = vmatpush3.msra.mxu0 %v9637_v59 }
 0x503   : > { %7334 = vmatpush3.msra.mxu1 %v9389_v12  ;;  %7255 = vmatmul.mubr.f32.vlgmr.msra.gmra.mxu0 %v9675_v27 }
 0x504   : > { %7292 = vmatprep.subr.mxu0 %v9398_v19  ;;  %7335 = vmatprep.subr.mxu1 %v9412_v58 }
 0x505   : > { %7293 = vmatpush3.msra.mxu0 %v9398_v19  ;;  %7324 = vmatprep.mubr.f32.mxu0 %v9629_v15 }
 0x506   : > { %7336 = vmatpush3.msra.mxu1 %v9412_v58  ;;  %7294 = vmatprep.subr.mxu0 %v9420_v7 }
 0x507   : > { %7337 = vmatprep.subr.mxu1 %v9433_v23  ;;  %7295 = vmatpush3.msra.mxu0 %v9420_v7 }
 0x508   : > { %7338 = vmatpush3.msra.mxu1 %v9433_v23  ;;  %7296 = vmatprep.subr.mxu0 %v9439_v16 }
 0x509   : > { %7339 = vmatprep.subr.mxu1 %v9452_v21  ;;  %7297 = vmatpush3.msra.mxu0 %v9439_v16 }
 0x50a   : > { %7340 = vmatpush3.msra.mxu1 %v9452_v21  ;;  %7298 = vmatprep.subr.mxu0 %v9460_v11 }
 0x50b   : > { %7341 = vmatprep.subr.mxu1 %v9468_v55  ;;  %7299 = vmatpush3.msra.mxu0 %v9460_v11 }
 0x50c   : > { %7342 = vmatpush3.msra.mxu1 %v9468_v55  ;;  %7300 = vmatprep.subr.mxu0 %v9485_v36 }
 0x50d   : > { %7343 = vmatprep.subr.mxu1 %v9497_v2  ;;  %7301 = vmatpush3.msra.mxu0 %v9485_v36 }
 0x50e   : > { %7344 = vmatpush3.msra.mxu1 %v9497_v2  ;;  %7302 = vmatprep.subr.mxu0 %v9501_v50  ;;  %v6001_v2 = vld [vmem:[%s9852_s8] ss:$0 sm:$0xff] }
 0x50f   : > { %7345 = vmatprep.subr.mxu1 %v9506_v35  ;;  %7303 = vmatpush3.msra.mxu0 %v9501_v50 }
 0x510   : > { %7346 = vmatpush3.msra.mxu1 %v9506_v35  ;;  %7304 = vmatprep.subr.mxu0 %v9519_v51 }
 0x511   : > { %7347 = vmatprep.subr.mxu1 %v9531_v40  ;;  %7305 = vmatpush3.msra.mxu0 %v9519_v51 }
 0x512   : > { %7348 = vmatpush3.msra.mxu1 %v9531_v40  ;;  %7306 = vmatprep.subr.mxu0 %v9538_v8 }
 0x513   : > { %7349 = vmatprep.subr.mxu1 %v9547_v26  ;;  %7307 = vmatpush3.msra.mxu0 %v9538_v8 }
 0x514   : > { %7350 = vmatpush3.msra.mxu1 %v9547_v26  ;;  %7308 = vmatprep.subr.mxu0 %v9563_v3 }
 0x515   : > { %7351 = vmatprep.subr.mxu1 %v9568_v60  ;;  %7309 = vmatpush3.msra.mxu0 %v9563_v3 }
 0x516   : > { %7352 = vmatpush3.msra.mxu1 %v9568_v60  ;;  %7310 = vmatprep.subr.mxu0 %v9575_v49 }
 0x517   : > { %7353 = vmatprep.subr.mxu1 %v9585_v48  ;;  %7311 = vmatpush3.msra.mxu0 %v9575_v49 }
 0x518   : > { %7354 = vmatpush3.msra.mxu1 %v9585_v48  ;;  %7312 = vmatprep.subr.mxu0 %v9596_v5 }
 0x519   : > { %7355 = vmatprep.subr.mxu1 %v9601_v17  ;;  %7313 = vmatpush3.msra.mxu0 %v9596_v5 }
 0x51a   : > { %7356 = vmatpush3.msra.mxu1 %v9601_v17  ;;  %7314 = vmatprep.subr.mxu0 %v9608_v9 }
 0x51b   : > { %7357 = vmatprep.subr.mxu1 %v9613_v56  ;;  %7315 = vmatpush3.msra.mxu0 %v9608_v9 }
 0x51c   : > { %7358 = vmatpush3.msra.mxu1 %v9613_v56  ;;  %7316 = vmatprep.subr.mxu0 %v9622_v1 }
 0x51d   : > { %7360 = vmatmul.mubr.f32.vlgmr.msra.gmra.mxu1 %v9667_v39  ;;  %7317 = vmatpush3.msra.mxu0 %v9622_v1 }
 0x51e   : > { %7318 = vmatprep.subr.mxu0 %v9634_v34 }
 0x51f   : > { %7319 = vmatpush3.msra.mxu0 %v9634_v34 }
 0x520   : > { %7320 = vmatprep.subr.mxu0 %v9645_v18 }
 0x521   : > { %7321 = vmatpush3.msra.mxu0 %v9645_v18 }
 0x522   : > { %7322 = vmatprep.subr.mxu0 %v9655_v10 }
 0x523   : > { %7323 = vmatpush3.msra.mxu0 %v9655_v10 }
 0x524   : > { %7325 = vmatmul.mubr.f32.vlgmr.msra.gmra.mxu0 %v9667_v39 }
 0x52f   : > { %v6508_v63 = vpop.f32.mrf.mxu1 }
 0x531   : > { %v6509_v6 = vpop.f32.mrf.mxu1 }
 0x532   : > { %v6510_v62 = vadd.f32 %v6509_v6, %v6508_v63 }
 0x533   : > { %v6511_v19 = vpop.f32.mrf.mxu1 }
 0x535   : > { %v6512_v58 = vpop.f32.mrf.mxu1 }
 0x536   : > { %v6513_v51 = vadd.f32 %v6512_v58, %v6511_v19  ;;  %v7394_v58 = vld [vmem:[%s7496_s11 + $0x8] sm:$0xff] }
 0x537   : > { %v6470_v20 = vpop.f32.mrf.mxu0 }
 0x539   : > { %v6471_v31 = vpop.f32.mrf.mxu0 }
 0x53a   : > { %v6472_v24 = vadd.f32 %v6471_v31, %v6470_v20 }
 0x53c   : > { %v6473_v38 = vpop.f32.mrf.mxu0  ;;  %v4411_v14 = vadd.f32 %v6472_v24, %v6001_v2 }
 0x53e   : > { %v6474_v12 = vpop.f32.mrf.mxu0  ;;  %v4658_v60 = vadd.f32 %v6510_v62, %v4411_v14 }
 0x53f   : > { %v6475_v44 = vadd.f32 %v6474_v12, %v6473_v38 }
 0x541   : > { %v4426_v33 = vadd.f32 %v6475_v44, %v6001_v2 }
 0x543   : > { %v4665_v3 = vadd.f32 %v6513_v51, %v4426_v33 }
 0x551   : > { %v6584_v22 = vpop.f32.mrf.mxu1 }
 0x553   : > { %v6585_v16 = vpop.f32.mrf.mxu1 }
 0x554   : > { %v6586_v17 = vadd.f32 %v6585_v16, %v6584_v22 }
 0x556   : > { %v6587_v21 = vpop.f32.mrf.mxu1 }
 0x558   : > { %v6588_v55 = vpop.f32.mrf.mxu1 }
 0x559   : > { %v6589_v48 = vadd.f32 %v6588_v55, %v6587_v21 }
 0x55a   : > { %v6546_v43 = vpop.f32.mrf.mxu0 }
 0x55c   : > { %v6547_v7 = vpop.f32.mrf.mxu0 }
 0x55d   : > { %v6548_v26 = vadd.f32 %v6547_v7, %v6546_v43 }
 0x55f   : > { %v6549_v23 = vpop.f32.mrf.mxu0  ;;  %v4803_v5 = vadd.f32 %v6548_v26, %v4658_v60 }
 0x561   : > { %v6550_v46 = vpop.f32.mrf.mxu0  ;;  %v4920_v1 = vadd.f32 %v6586_v17, %v4803_v5 }
 0x562   : > { %v6551_v40 = vadd.f32 %v6550_v46, %v6549_v23  ;;  %v7395_v23 = vld [vmem:[%s7496_s11] sm:$0xff] }
 0x564   : > { %v4812_v49 = vadd.f32 %v6551_v40, %v4665_v3 }
 0x566   : > { %v4931_v0 = vadd.f32 %v6589_v48, %v4812_v49 }
 0x575   : > { %v6660_v50 = vpop.f32.mrf.mxu1 }
 0x577   : > { %v6661_v8 = vpop.f32.mrf.mxu1 }
 0x578   : > { %v6662_v18 = vadd.f32 %v6661_v8, %v6660_v50 }
 0x57a   : > { %v6663_v47 = vpop.f32.mrf.mxu1 }
 0x57c   : > { %v6664_v56 = vpop.f32.mrf.mxu1 }
 0x57d   : > { %v6665_v34 = vadd.f32 %v6664_v56, %v6663_v47 }
 0x57e   : > { %v6622_v11 = vpop.f32.mrf.mxu0 }
 0x580   : > { %v6623_v36 = vpop.f32.mrf.mxu0 }
 0x581   : > { %v6624_v9 = vadd.f32 %v6623_v36, %v6622_v11 }
 0x583   : > { %v6625_v35 = vpop.f32.mrf.mxu0  ;;  %v5099_v59 = vadd.f32 %v6624_v9, %v4920_v1 }
 0x585   : > { %v6626_v13 = vpop.f32.mrf.mxu0  ;;  %v5210_v53 = vadd.f32 %v6662_v18, %v5099_v59 }
 0x586   : > { %v6627_v25 = vadd.f32 %v6626_v13, %v6625_v35 }
 0x588   : > { %v5106_v37 = vadd.f32 %v6627_v25, %v4931_v0 }
 0x58a   : > { %v5217_v54 = vadd.f32 %v6665_v34, %v5106_v37 }
 0x598   : > { %v7221_v10 = vpop.f32.mrf.mxu1 }
 0x59a   : > { %v5468_v39 = vpop.f32.mrf.mxu1 }
 0x5a1   : > { %v7186_v15 = vpop.f32.mrf.mxu0 }
 0x5a2   : > { %v5318_v4 = vadd.f32 %v7186_v15, %v5217_v54 }
 0x5a3   : > { %v5307_v32 = vpop.f32.mrf.mxu0 }
 0x5a4   : > { %v5308_v61 = vadd.f32 %v5307_v32, %v5210_v53  ;;  %v5475_v57 = vadd.f32 %v7221_v10, %v5318_v4 }
 0x5a6   : > { %v5469_v52 = vadd.f32 %v5468_v39, %v5308_v61 }
 0x5bb   : > { %v7291_v28 = vpop.f32.mrf.mxu1 }
 0x5bd   : > { %v5674_v29 = vpop.f32.mrf.mxu1 }
 0x5c3   : > { %v7256_v45 = vpop.f32.mrf.mxu0 }
 0x5c4   : > { %v5586_v27 = vadd.f32 %v7256_v45, %v5475_v57 }
 0x5c5   : > { %v5578_v30 = vpop.f32.mrf.mxu0 }
 0x5c6   : > { %v5579_v41 = vadd.f32 %v5578_v30, %v5469_v52  ;;  %v5683_v42 = vadd.f32 %v7291_v28, %v5586_v27 }
 0x5c8   : > { %v5675_v38 = vadd.f32 %v5674_v29, %v5579_v41 }
 0x5dd   : > { %v7361_v20 = vpop.f32.mrf.mxu1 }
 0x5df   : > { %v5894_v43 = vpop.f32.mrf.mxu1 }
 0x5e4   : > { %v7326_v31 = vpop.f32.mrf.mxu0 }
 0x5e5   : > { %v5808_v63 = vadd.f32 %v7326_v31, %v5683_v42 }
 0x5e6   : > { %v5801_v6 = vpop.f32.mrf.mxu0 }
 0x5e7   : > { %v5901_v12 = vadd.f32 %v7361_v20, %v5808_v63  ;;  %v5802_v19 = vadd.f32 %v5801_v6, %v5675_v38 }
 0x5e9   : > { %v5905_v7 = vadd.f32 %v7394_v58, %v5901_v12  ;;  %v5895_v22 = vadd.f32 %v5894_v43, %v5802_v19 }
 0x5eb   : > { %5907 = vst [vmem:[%s332_s23 + $0x8] sm:$0xff] %v5905_v7  ;;  %v5904_v16 = vadd.f32 %v7395_v23, %v5895_v22 }
 0x5ed   : > { %5906 = vst [vmem:[%s332_s23] sm:$0xff] %v5904_v16 }
 0x5ee PF: > { %s19_s30 = sadd.s32 1, %s7402_s30  }
 0x5ef   : > { %p16_p4 = scmp.ge.s32.totalorder %s19_s30, 4  }
 0x5f1   :  { %18 = sbr.rel (!%p16_p4) target bundleno = 1 (0x1), region = 86 }

</bundles_post_ra>
